<compile_context>
chip_gen: v7x
topology: tpu7x:2x2x1
jax: 0.10.0
libtpu: 0.0.40
codegen_flags: <defaults>
</compile_context>

<pallas_src>
import functools

import jax
import jax.numpy as jnp
import numpy as np
from jax.experimental import pallas as pl
from jax.experimental.pallas import tpu as pltpu

_BN_EPS = 1e-5
_LANE = 128


def _round_up(x, m):
    return ((x + m - 1) // m) * m


# ----------------------------------------------------------------------------
# Fused per-block Pallas kernel (one grid step == one batch element)
# ----------------------------------------------------------------------------
def _block_kernel(xp_ref,
                  wa_ref, ba_ref,
                  wb_ref, bb_ref,
                  w1_ref, b1_ref, w2_ref, b2_ref,
                  wc_ref, bc_ref,
                  wp_ref, bp_ref,
                  o_ref, a_scr,
                  *, stride, H, W, has_proj, concat_taps):
    P, Hs, Ws_pad, Cbp = a_scr.shape
    Cin_p = xp_ref.shape[-1]
    Ho = (H - 1) // stride + 1
    Wo = (W - 1) // stride + 1
    L = Ho * Wo
    plane_off = ((0, 0),) if stride == 1 else ((0, 0), (0, 1), (1, 0), (1, 1))

    # ---- 1x1 conv-a (BN scale pre-folded into wa) + bias + ReLU.
    # One merged matmul over all parity planes (single MXU weight push).
    xp_all = xp_ref[0].reshape(P * Hs * Ws_pad, Cin_p)            # bf16 view
    ap = jnp.dot(xp_all, wa_ref[...], preferred_element_type=jnp.float32)
    ap = jnp.maximum(ap + ba_ref[...], 0.0)                        # f32

    # Masked store into the bf16 scratch: zero every spatial-padding position
    # so the 3x3 taps below see true zero padding (ReLU(bias) contamination
    # must not leak into the conv-b input).
    row_i = jax.lax.broadcasted_iota(jnp.int32, (Hs, Ws_pad, 1), 0)
    col_i = jax.lax.broadcasted_iota(jnp.int32, (Hs, Ws_pad, 1), 1)
    for p in range(P):
        py, px = plane_off[p]
        rpad = py + stride * row_i
        cpad = px + stride * col_i
        ok = jnp.logical_and(jnp.logical_and(rpad >= 1, rpad <= H),
                             jnp.logical_and(cpad >= 1, cpad <= W))
        ap_p = ap[p * Hs * Ws_pad:(p + 1) * Hs * Ws_pad].reshape(Hs, Ws_pad, Cbp)
        a_scr[p] = jnp.where(ok, ap_p, 0.0).astype(a_scr.dtype)

    # ---- 3x3 grouped conv (dense block-diagonal taps, BN scale pre-folded).
    def tap(ky, kx):
        if stride == 1:
            pidx, r0, c0 = 0, ky, kx
        else:
            pidx = (ky % 2) * 2 + (kx % 2)
            r0, c0 = ky // 2, kx // 2
        # TODO(synk): c0 in {1,2} is a sublane-unaligned slice; a roll-based
        #             pre-shift would keep this copy-free at large shapes.
        return a_scr[pidx, r0:r0 + Ho, c0:c0 + Wo, :].reshape(L, Cbp)

    if concat_taps:
        # Single (L, 9*Cbp) x (9*Cbp, Cbp) matmul: K=9*Cbp keeps the MXU full
        # and moves the accumulation inside the MXU (no 8 f32 VALU adds).
        taps = jnp.concatenate(
            [tap(ky, kx) for ky in range(3) for kx in range(3)], axis=-1)
        acc = jnp.dot(taps, wb_ref[...], preferred_element_type=jnp.float32)
    else:
        acc = jnp.zeros((L, Cbp), jnp.float32)
        for ky in range(3):
            for kx in range(3):
                acc = acc + jnp.dot(tap(ky, kx), wb_ref[ky * 3 + kx],
                                    preferred_element_type=jnp.float32)
    b = jnp.maximum(acc + bb_ref[...], 0.0)                        # (L, Cbp) f32

    # ---- SE: global average pool -> FC + ReLU -> FC + sigmoid.
    pool = jnp.mean(b, axis=0, keepdims=True)                      # (1, Cbp)
    s = jnp.dot(pool.astype(jnp.bfloat16), w1_ref[...],
                preferred_element_type=jnp.float32) + b1_ref[...]
    s = jnp.maximum(s, 0.0)
    s = jnp.dot(s.astype(jnp.bfloat16), w2_ref[...],
                preferred_element_type=jnp.float32) + b2_ref[...]
    s = jax.nn.sigmoid(s)                                          # (1, Cbp)

    # ---- 1x1 conv-c: SE gate folded into the rows of wc (Cbp x Coutp
    # multiplies instead of L x Cbp); BN scale already folded into wc.
    wc_g = (wc_ref[...] * jnp.transpose(s)).astype(jnp.bfloat16)
    c = jnp.dot(b.astype(jnp.bfloat16), wc_g,
                preferred_element_type=jnp.float32) + bc_ref[...]

    # ---- residual: derived from x_planes in-kernel (no duplicate HBM input).
    xv = xp_ref[0].reshape(P, Hs, Ws_pad, Cin_p)
    if stride == 1:
        xr = xv[0, 1:H + 1, 1:W + 1, :].reshape(L, Cin_p)
    else:
        xr = xv[3, 0:Ho, 0:Wo, :].reshape(L, Cin_p)                # parity (1,1)
    if has_proj:
        r = jnp.dot(xr, wp_ref[...], preferred_element_type=jnp.float32)
        r = r + bp_ref[...]
    else:
        r = xr.astype(jnp.float32)
    o_ref[0] = jnp.maximum(r + c, 0.0).astype(o_ref.dtype)


# ----------------------------------------------------------------------------
# Wrapper-side glue: BN folding into weights, padding, planes, pallas_call
# ----------------------------------------------------------------------------
def _fold_bn(gamma, beta, mean, var, eps=_BN_EPS):
    scale = gamma / jnp.sqrt(var + eps)
    return scale, beta - mean * scale


def _grouped_to_dense9(w_g, groups):
    # PyTorch grouped conv weight (O, Cin/groups, 3, 3) -> dense block-diagonal
    # (9, Cin, O) with tap index k = ky*3 + kx.
    out_ch, cg, kh, kw = w_g.shape
    in_ch = cg * groups
    opg = out_ch // groups
    w_full = jnp.zeros((out_ch, in_ch, kh, kw), w_g.dtype)
    for g in range(groups):
        w_full = w_full.at[g * opg:(g + 1) * opg, g * cg:(g + 1) * cg].set(
            w_g[g * opg:(g + 1) * opg])
    return jnp.transpose(w_full, (2, 3, 1, 0)).reshape(kh * kw, in_ch, out_ch)


def _pad2(a, rows, cols):
    return jnp.pad(a, ((0, rows - a.shape[0]), (0, cols - a.shape[1])))


def _pad_row(v, cols):
    return jnp.pad(v.astype(jnp.float32)[None, :], ((0, 0), (0, cols - v.shape[0])))


def pallas_block(x, p, stride, groups, has_proj):
    # x: (N, H, W, Cin_p) bf16, channels already zero-padded to a lane multiple.
    N, H, W, Cin_p = x.shape
    w_b = p["wa"].shape[0]
    w_out = p["wc"].shape[0]
    w_se = p["w_se1"].shape[0]
    Cbp = _round_up(w_b, _LANE)
    Coutp = _round_up(w_out, _LANE)
    Csep = _round_up(w_se, _LANE)
    Ho = (H - 1) // stride + 1
    Wo = (W - 1) // stride + 1
    L = Ho * Wo
    if not has_proj:
        assert Cin_p == Coutp, "identity residual requires Cin_p == Coutp"

    bf = jnp.bfloat16
    # Fold BN scales into the weights in f32, pad channels, then cast bf16.
    sa, ba_v = _fold_bn(*p["bn_a"])
    sb, bb_v = _fold_bn(*p["bn_b"])
    sc, bc_v = _fold_bn(*p["bn_c"])
    wa = _pad2(jnp.transpose(p["wa"][:, :, 0, 0]) * sa[None, :], Cin_p, Cbp).astype(bf)
    ba = _pad_row(ba_v, Cbp)
    wb9 = _grouped_to_dense9(p["wb"], groups) * sb[None, None, :]
    wb9 = jnp.pad(wb9, ((0, 0), (0, Cbp - w_b), (0, Cbp - w_b))).astype(bf)
    bb = _pad_row(bb_v, Cbp)
    wc = _pad2(jnp.transpose(p["wc"][:, :, 0, 0]) * sc[None, :], Cbp, Coutp).astype(bf)
    bc = _pad_row(bc_v, Coutp)
    w1 = _pad2(jnp.transpose(p["w_se1"][:, :, 0, 0]), Cbp, Csep).astype(bf)
    w2 = _pad2(jnp.transpose(p["w_se2"][:, :, 0, 0]), Csep, Cbp).astype(bf)
    b1 = _pad_row(p["b_se1"], Csep)
    b2 = _pad_row(p["b_se2"], Cbp)
    if has_proj:
        sp, bp_v = _fold_bn(*p["bn_p"])
        wp = _pad2(jnp.transpose(p["wp"][:, :, 0, 0]) * sp[None, :],
                   Cin_p, Coutp).astype(bf)
        bp = _pad_row(bp_v, Coutp)
    else:
        wp = jnp.zeros((8, _LANE), bf)                 # unused dummy
        bp = jnp.zeros((1, _LANE), jnp.float32)

    # Spatially zero-pad x; for stride 2 split into 4 parity planes so the
    # kernel's nine 3x3 taps (and the residual) are contiguous VMEM slices.
    x_pad = jnp.pad(x, ((0, 0), (1, 1), (1, 1), (0, 0)))
    if stride == 1:
        P, Hs, Ws = 1, H + 2, W + 2
        planes = x_pad[:, None]
    else:
        Hp, Wp = H + 2, W + 2
        Hp2, Wp2 = Hp + (Hp & 1), Wp + (Wp & 1)
        x_pad = jnp.pad(x_pad, ((0, 0), (0, Hp2 - Hp), (0, Wp2 - Wp), (0, 0)))
        P, Hs, Ws = 4, Hp2 // 2, Wp2 // 2
        planes = jnp.stack([x_pad[:, py::2, px::2, :]
                            for (py, px) in ((0, 0), (0, 1), (1, 0), (1, 1))],
                           axis=1)
    Ws_pad = _round_up(Ws, 8)          # keeps in-kernel row slices tile-aligned
    planes = jnp.pad(planes, ((0, 0), (0, 0), (0, 0), (0, Ws_pad - Ws), (0, 0)))
    x_planes = planes.reshape(N, P, Hs * Ws_pad, Cin_p)

    # K-concat of the 9 taps only when the block width is modest (fills the
    # 256-deep v6e MXU); wide blocks keep the per-tap form to limit VMEM.
    concat_taps = Cbp <= 256
    if concat_taps:
        wb = wb9.reshape(9 * Cbp, Cbp)
        wb_spec = pl.BlockSpec((9 * Cbp, Cbp), lambda n: (0, 0))
    else:
        wb = wb9
        wb_spec = pl.BlockSpec((9, Cbp, Cbp), lambda n: (0, 0, 0))

    kernel = functools.partial(_block_kernel, stride=stride, H=H, W=W,
                               has_proj=has_proj, concat_taps=concat_taps)
    args = (x_planes, wa, ba, wb, bb, w1, b1, w2, b2, wc, bc, wp, bp)

    # Cost estimate / VMEM budget from actual buffer sizes.
    flops_per_n = 2 * (P * Hs * Ws_pad * Cin_p * Cbp
                       + 9 * L * Cbp * Cbp
                       + Cbp * Csep + Csep * Cbp
                       + L * Cbp * Coutp
                       + (L * Cin_p * Coutp if has_proj else 0))
    bytes_accessed = int(sum(int(np.prod(a.shape)) * a.dtype.itemsize for a in args)
                         + N * L * Coutp * 2)
    weight_bytes = sum(int(np.prod(a.shape)) * a.dtype.itemsize for a in args[1:])
    xblk_bytes = P * Hs * Ws_pad * Cin_p * 2
    oblk_bytes = L * Coutp * 2
    scratch_bytes = P * Hs * Ws_pad * Cbp * 2
    interm_bytes = (P * Hs * Ws_pad * Cbp * 4
                    + (L * 9 * Cbp * 2 if concat_taps else 0)
                    + 4 * L * max(Cbp, Coutp) * 4)
    needed = int(scratch_bytes + 2 * (xblk_bytes + oblk_bytes) + weight_bytes
                 + interm_bytes + (2 << 20))
    try:
        vmem_cap = int(pltpu.get_tpu_info().vmem_capacity_bytes)
    except Exception:
        vmem_cap = 64 * 1024 * 1024    # conservative (v7x per-TC) fallback
    vmem_limit = max(32 * 1024 * 1024, min(int(0.85 * vmem_cap), 2 * needed))

    in_specs = [
        pl.BlockSpec((1, P, Hs * Ws_pad, Cin_p), lambda n: (n, 0, 0, 0)),
        pl.BlockSpec(wa.shape, lambda n: (0, 0)),
        pl.BlockSpec(ba.shape, lambda n: (0, 0)),
        wb_spec,
        pl.BlockSpec(bb.shape, lambda n: (0, 0)),
        pl.BlockSpec(w1.shape, lambda n: (0, 0)),
        pl.BlockSpec(b1.shape, lambda n: (0, 0)),
        pl.BlockSpec(w2.shape, lambda n: (0, 0)),
        pl.BlockSpec(b2.shape, lambda n: (0, 0)),
        pl.BlockSpec(wc.shape, lambda n: (0, 0)),
        pl.BlockSpec(bc.shape, lambda n: (0, 0)),
        pl.BlockSpec(wp.shape, lambda n: (0, 0)),
        pl.BlockSpec(bp.shape, lambda n: (0, 0)),
    ]
    out = pl.pallas_call(
        kernel,
        out_shape=jax.ShapeDtypeStruct((N, L, Coutp), jnp.bfloat16),
        grid=(N,),
        in_specs=in_specs,
        out_specs=pl.BlockSpec((1, L, Coutp), lambda n: (n, 0, 0)),
        scratch_shapes=[pltpu.VMEM((P, Hs, Ws_pad, Cbp), jnp.bfloat16)],
        compiler_params=pltpu.CompilerParams(
            dimension_semantics=("parallel",),
            vmem_limit_bytes=vmem_limit),
        cost_estimate=pl.CostEstimate(flops=int(N * flops_per_n),
                                      transcendentals=int(N * (Cbp + Csep)),
                                      bytes_accessed=bytes_accessed),
    )(*args)
    return out.reshape(N, Ho, Wo, Coutp)


def anystage_forward_pallas(x_nchw, stage_params, w_in, w_out, stride, bm, gw):
    x = jnp.transpose(x_nchw, (0, 2, 3, 1))                  # NCHW -> NHWC
    Cin_p = _round_up(w_in, _LANE)
    x = jnp.pad(x, ((0, 0), (0, 0), (0, 0), (0, Cin_p - w_in))).astype(jnp.bfloat16)
    for i, p in enumerate(stage_params):
        b_stride = stride if i == 0 else 1
        b_w_in = w_in if i == 0 else w_out
        w_b = int(round(w_out * bm))
        groups = w_b // gw
        has_proj = (b_w_in != w_out) or (b_stride != 1)
        x = pallas_block(x, p, b_stride, groups, has_proj)   # (N, Ho, Wo, 128k) bf16
    out = x[..., :w_out].astype(jnp.float32)
    return jnp.transpose(out, (0, 3, 1, 2))                  # NHWC -> NCHW


# ----------------------------------------------------------------------------
# Pure-JAX f32 reference (for correctness check)
# ----------------------------------------------------------------------------
def _ref_conv(x, w_oihw, s, pad, fg=1):
    return jax.lax.conv_general_dilated(
        x, jnp.transpose(w_oihw, (2, 3, 1, 0)),
        (s, s), [(pad, pad), (pad, pad)],
        dimension_numbers=("NHWC", "HWIO", "NHWC"),
        feature_group_count=fg)


def _ref_bn(x, prm, eps=_BN_EPS):
    g, b, m, v = prm
    return (x - m) / jnp.sqrt(v + eps) * g + b


def ref_block(x, p, stride, groups, has_proj):
    a = jax.nn.relu(_ref_bn(_ref_conv(x, p["wa"], 1, 0), p["bn_a"]))
    b = jax.nn.relu(_ref_bn(_ref_conv(a, p["wb"], stride, 1, groups), p["bn_b"]))
    s = jnp.mean(b, axis=(1, 2), keepdims=True)
    s = jax.nn.relu(_ref_conv(s, p["w_se1"], 1, 0) + p["b_se1"])
    s = jax.nn.sigmoid(_ref_conv(s, p["w_se2"], 1, 0) + p["b_se2"])
    b = b * s
    c = _ref_bn(_ref_conv(b, p["wc"], 1, 0), p["bn_c"])
    r = _ref_bn(_ref_conv(x, p["wp"], stride, 0), p["bn_p"]) if has_proj else x
    return jax.nn.relu(r + c)


def anystage_forward_ref(x_nchw, stage_params, w_in, w_out, stride, bm, gw):
    x = jnp.transpose(x_nchw, (0, 2, 3, 1))
    for i, p in enumerate(stage_params):
        b_stride = stride if i == 0 else 1
        b_w_in = w_in if i == 0 else w_out
        w_b = int(round(w_out * bm))
        groups = w_b // gw
        has_proj = (b_w_in != w_out) or (b_stride != 1)
        x = ref_block(x, p, b_stride, groups, has_proj)
    return jnp.transpose(x, (0, 3, 1, 2))


# ----------------------------------------------------------------------------
# Deterministic parameter init (PyTorch conv weight shapes)
# ----------------------------------------------------------------------------
def _init_bn(key, c):
    k1, k2, k3, k4 = jax.random.split(key, 4)
    gamma = 1.0 + 0.1 * jax.random.normal(k1, (c,), jnp.float32)
    beta = 0.1 * jax.random.normal(k2, (c,), jnp.float32)
    mean = 0.1 * jax.random.normal(k3, (c,), jnp.float32)
    var = 1.0 + 0.1 * jnp.abs(jax.random.normal(k4, (c,), jnp.float32))
    return (gamma, beta, mean, var)


def init_block_params(key, w_in, w_out, stride, bm, gw, se_r):
    w_b = int(round(w_out * bm))
    groups = w_b // gw
    cg = w_b // groups
    w_se = int(round(w_in * se_r))
    ks = jax.random.split(key, 12)
    p = {
        "wa": 0.2 * jax.random.normal(ks[0], (w_b, w_in, 1, 1), jnp.float32),
        "bn_a": _init_bn(ks[1], w_b),
        "wb": 0.2 * jax.random.normal(ks[2], (w_b, cg, 3, 3), jnp.float32),
        "bn_b": _init_bn(ks[3], w_b),
        "w_se1": 0.2 * jax.random.normal(ks[4], (w_se, w_b, 1, 1), jnp.float32),
        "b_se1": 0.1 * jax.random.normal(ks[5], (w_se,), jnp.float32),
        "w_se2": 0.2 * jax.random.normal(ks[6], (w_b, w_se, 1, 1), jnp.float32),
        "b_se2": 0.1 * jax.random.normal(ks[7], (w_b,), jnp.float32),
        "wc": 0.2 * jax.random.normal(ks[8], (w_out, w_b, 1, 1), jnp.float32),
        "bn_c": _init_bn(ks[9], w_out),
    }
    if (w_in != w_out) or (stride != 1):
        p["wp"] = 0.2 * jax.random.normal(ks[10], (w_out, w_in, 1, 1), jnp.float32)
        p["bn_p"] = _init_bn(ks[11], w_out)
    return p


if __name__ == "__main__":
    # AnyStage config: w_in, w_out, stride, d, bm, gw, se_r
    w_in, w_out, stride, d, bm, gw, se_r = 8, 16, 2, 2, 1.0, 4, 0.25

    key = jax.random.PRNGKey(0)
    kx, kp = jax.random.split(key)
    x = jax.random.normal(kx, (2, w_in, 16, 16), jnp.float32)   # NCHW

    stage_params = []
    bkeys = jax.random.split(kp, d)
    for i in range(d):
        b_stride = stride if i == 0 else 1
        b_w_in = w_in if i == 0 else w_out
        stage_params.append(
            init_block_params(bkeys[i], b_w_in, w_out, b_stride, bm, gw, se_r))

    fwd = jax.jit(anystage_forward_pallas, static_argnums=(2, 3, 4, 5, 6))
    out = jax.block_until_ready(fwd(x, stage_params, w_in, w_out, stride, bm, gw))

    ref = anystage_forward_ref(x, stage_params, w_in, w_out, stride, bm, gw)
    # bf16 matmul inputs with f32 accumulation -> loosened tolerance vs f32 ref.
    np.testing.assert_allclose(np.asarray(out), np.asarray(ref),
                               rtol=5e-2, atol=5e-2)
    print("KERNEL_OK")
</pallas_src>

<mosaic_0001>
module attributes {stable_mosaic.version = 11 : i64} {
  func.func @_block_kernel(%arg0: i32, %arg1: memref<1x4x144x128xbf16, #tpu.memory_space<vmem>>, %arg2: memref<128x128xbf16, #tpu.memory_space<vmem>>, %arg3: memref<1x128xf32, #tpu.memory_space<vmem>>, %arg4: memref<1152x128xbf16, #tpu.memory_space<vmem>>, %arg5: memref<1x128xf32, #tpu.memory_space<vmem>>, %arg6: memref<128x128xbf16, #tpu.memory_space<vmem>>, %arg7: memref<1x128xf32, #tpu.memory_space<vmem>>, %arg8: memref<128x128xbf16, #tpu.memory_space<vmem>>, %arg9: memref<1x128xf32, #tpu.memory_space<vmem>>, %arg10: memref<128x128xbf16, #tpu.memory_space<vmem>>, %arg11: memref<1x128xf32, #tpu.memory_space<vmem>>, %arg12: memref<128x128xbf16, #tpu.memory_space<vmem>>, %arg13: memref<1x128xf32, #tpu.memory_space<vmem>>, %arg14: memref<1x64x128xbf16, #tpu.memory_space<vmem>>, %arg15: memref<4x9x16x128xbf16, #tpu.memory_space<vmem>>) attributes {dimension_semantics = [#tpu.dimension_semantics<parallel>], iteration_bounds = array<i64: 2>, scalar_prefetch = 0 : i64, scratch_operands = 1 : i64, tpu.core_type = #tpu.core_type<tc>, window_params = [{transform_indices = @transform_0, window_bounds = array<i64: 1, 4, 144, 128>}, {pipeline_mode = #tpu.pipeline_mode<synchronous>, transform_indices = @transform_1, window_bounds = array<i64: 128, 128>}, {pipeline_mode = #tpu.pipeline_mode<synchronous>, transform_indices = @transform_2, window_bounds = array<i64: 1, 128>}, {pipeline_mode = #tpu.pipeline_mode<synchronous>, transform_indices = @transform_3, window_bounds = array<i64: 1152, 128>}, {pipeline_mode = #tpu.pipeline_mode<synchronous>, transform_indices = @transform_4, window_bounds = array<i64: 1, 128>}, {pipeline_mode = #tpu.pipeline_mode<synchronous>, transform_indices = @transform_5, window_bounds = array<i64: 128, 128>}, {pipeline_mode = #tpu.pipeline_mode<synchronous>, transform_indices = @transform_6, window_bounds = array<i64: 1, 128>}, {pipeline_mode = #tpu.pipeline_mode<synchronous>, transform_indices = @transform_7, window_bounds = array<i64: 128, 128>}, {pipeline_mode = #tpu.pipeline_mode<synchronous>, transform_indices = @transform_8, window_bounds = array<i64: 1, 128>}, {pipeline_mode = #tpu.pipeline_mode<synchronous>, transform_indices = @transform_9, window_bounds = array<i64: 128, 128>}, {pipeline_mode = #tpu.pipeline_mode<synchronous>, transform_indices = @transform_10, window_bounds = array<i64: 1, 128>}, {pipeline_mode = #tpu.pipeline_mode<synchronous>, transform_indices = @transform_11, window_bounds = array<i64: 128, 128>}, {pipeline_mode = #tpu.pipeline_mode<synchronous>, transform_indices = @transform_12, window_bounds = array<i64: 1, 128>}, {transform_indices = @transform_13, window_bounds = array<i64: 1, 64, 128>}]} {
    %c0 = arith.constant 0 : index
    %c0_0 = arith.constant 0 : index
    %c0_1 = arith.constant 0 : index
    %c0_2 = arith.constant 0 : index
    %0 = vector.load %arg1[%c0, %c0_0, %c0_1, %c0_2] : memref<1x4x144x128xbf16, #tpu.memory_space<vmem>>, vector<1x4x144x128xbf16>
    %1 = vector.shape_cast %0 : vector<1x4x144x128xbf16> to vector<4x144x128xbf16>
    %2 = vector.shape_cast %1 : vector<4x144x128xbf16> to vector<576x128xbf16>
    %c0_3 = arith.constant 0 : index
    %c0_4 = arith.constant 0 : index
    %3 = vector.load %arg2[%c0_3, %c0_4] : memref<128x128xbf16, #tpu.memory_space<vmem>>, vector<128x128xbf16>
    %cst = arith.constant dense<0.000000e+00> : vector<576x128xf32>
    %4 = tpu.matmul %2, %3, %cst {dimension_numbers = #tpu.dot_dimension_numbers<[1], [0], [0], [1], [0, 0, 1, 1], [], []>} : vector<576x128xbf16>, vector<128x128xbf16>, vector<576x128xf32> -> vector<576x128xf32>
    %c0_5 = arith.constant 0 : index
    %c0_6 = arith.constant 0 : index
    %5 = vector.load %arg3[%c0_5, %c0_6] : memref<1x128xf32, #tpu.memory_space<vmem>>, vector<1x128xf32>
    %6 = vector.broadcast %5 : vector<1x128xf32> to vector<576x128xf32>
    %7 = arith.addf %4, %6 : vector<576x128xf32>
    %cst_7 = arith.constant 0.000000e+00 : f32
    %8 = vector.broadcast %cst_7 : f32 to vector<576x128xf32>
    %9 = arith.maximumf %7, %8 : vector<576x128xf32>
    %10 = tpu.iota {dimensions = array<i32: 0>} : vector<9x16x1xi32>
    %11 = tpu.iota {dimensions = array<i32: 1>} : vector<9x16x1xi32>
    %c2_i32 = arith.constant 2 : i32
    %12 = vector.broadcast %c2_i32 : i32 to vector<9x16x1xi32>
    %13 = arith.muli %12, %10 : vector<9x16x1xi32>
    %c0_i32 = arith.constant 0 : i32
    %14 = vector.broadcast %c0_i32 : i32 to vector<9x16x1xi32>
    %15 = arith.addi %14, %13 : vector<9x16x1xi32>
    %c2_i32_8 = arith.constant 2 : i32
    %16 = vector.broadcast %c2_i32_8 : i32 to vector<9x16x1xi32>
    %17 = arith.muli %16, %11 : vector<9x16x1xi32>
    %c0_i32_9 = arith.constant 0 : i32
    %18 = vector.broadcast %c0_i32_9 : i32 to vector<9x16x1xi32>
    %19 = arith.addi %18, %17 : vector<9x16x1xi32>
    %c1_i32 = arith.constant 1 : i32
    %20 = vector.broadcast %c1_i32 : i32 to vector<9x16x1xi32>
    %21 = arith.cmpi sge, %15, %20 : vector<9x16x1xi32>
    %c16_i32 = arith.constant 16 : i32
    %22 = vector.broadcast %c16_i32 : i32 to vector<9x16x1xi32>
    %23 = arith.cmpi sle, %15, %22 : vector<9x16x1xi32>
    %24 = arith.andi %21, %23 : vector<9x16x1xi1>
    %c1_i32_10 = arith.constant 1 : i32
    %25 = vector.broadcast %c1_i32_10 : i32 to vector<9x16x1xi32>
    %26 = arith.cmpi sge, %19, %25 : vector<9x16x1xi32>
    %c16_i32_11 = arith.constant 16 : i32
    %27 = vector.broadcast %c16_i32_11 : i32 to vector<9x16x1xi32>
    %28 = arith.cmpi sle, %19, %27 : vector<9x16x1xi32>
    %29 = arith.andi %26, %28 : vector<9x16x1xi1>
    %30 = arith.andi %24, %29 : vector<9x16x1xi1>
    %31 = vector.extract_strided_slice %9 {offsets = [0, 0], sizes = [144, 128], strides = [1, 1]} : vector<576x128xf32> to vector<144x128xf32>
    %32 = vector.shape_cast %31 : vector<144x128xf32> to vector<9x16x128xf32>
    %cst_12 = arith.constant 0.000000e+00 : f32
    %33 = vector.shape_cast %30 : vector<9x16x1xi1> to vector<9x16x1xi1>
    %34 = vector.broadcast %33 : vector<9x16x1xi1> to vector<9x16x128xi1>
    %35 = vector.broadcast %cst_12 : f32 to vector<9x16x128xf32>
    %36 = arith.select %34, %32, %35 : vector<9x16x128xi1>, vector<9x16x128xf32>
    %37 = arith.truncf %36 : vector<9x16x128xf32> to vector<9x16x128xbf16>
    %c0_13 = arith.constant 0 : index
    %c0_14 = arith.constant 0 : index
    %c0_15 = arith.constant 0 : index
    %c0_16 = arith.constant 0 : index
    %38 = vector.load %arg15[%c0_13, %c0_14, %c0_15, %c0_16] : memref<4x9x16x128xbf16, #tpu.memory_space<vmem>>, vector<1x9x16x128xbf16>
    %39 = vector.shape_cast %38 : vector<1x9x16x128xbf16> to vector<9x16x128xbf16>
    %40 = vector.shape_cast %37 : vector<9x16x128xbf16> to vector<1x9x16x128xbf16>
    tpu.vector_store %arg15[%c0_13, %c0_14, %c0_15, %c0_16], %40 {strides = array<i32>} : memref<4x9x16x128xbf16, #tpu.memory_space<vmem>>, vector<1x9x16x128xbf16>,
    %c2_i32_17 = arith.constant 2 : i32
    %41 = vector.broadcast %c2_i32_17 : i32 to vector<9x16x1xi32>
    %42 = arith.muli %41, %10 : vector<9x16x1xi32>
    %c0_i32_18 = arith.constant 0 : i32
    %43 = vector.broadcast %c0_i32_18 : i32 to vector<9x16x1xi32>
    %44 = arith.addi %43, %42 : vector<9x16x1xi32>
    %c2_i32_19 = arith.constant 2 : i32
    %45 = vector.broadcast %c2_i32_19 : i32 to vector<9x16x1xi32>
    %46 = arith.muli %45, %11 : vector<9x16x1xi32>
    %c1_i32_20 = arith.constant 1 : i32
    %47 = vector.broadcast %c1_i32_20 : i32 to vector<9x16x1xi32>
    %48 = arith.addi %47, %46 : vector<9x16x1xi32>
    %c1_i32_21 = arith.constant 1 : i32
    %49 = vector.broadcast %c1_i32_21 : i32 to vector<9x16x1xi32>
    %50 = arith.cmpi sge, %44, %49 : vector<9x16x1xi32>
    %c16_i32_22 = arith.constant 16 : i32
    %51 = vector.broadcast %c16_i32_22 : i32 to vector<9x16x1xi32>
    %52 = arith.cmpi sle, %44, %51 : vector<9x16x1xi32>
    %53 = arith.andi %50, %52 : vector<9x16x1xi1>
    %c1_i32_23 = arith.constant 1 : i32
    %54 = vector.broadcast %c1_i32_23 : i32 to vector<9x16x1xi32>
    %55 = arith.cmpi sge, %48, %54 : vector<9x16x1xi32>
    %c16_i32_24 = arith.constant 16 : i32
    %56 = vector.broadcast %c16_i32_24 : i32 to vector<9x16x1xi32>
    %57 = arith.cmpi sle, %48, %56 : vector<9x16x1xi32>
    %58 = arith.andi %55, %57 : vector<9x16x1xi1>
    %59 = arith.andi %53, %58 : vector<9x16x1xi1>
    %60 = vector.extract_strided_slice %9 {offsets = [144, 0], sizes = [144, 128], strides = [1, 1]} : vector<576x128xf32> to vector<144x128xf32>
    %61 = vector.shape_cast %60 : vector<144x128xf32> to vector<9x16x128xf32>
    %cst_25 = arith.constant 0.000000e+00 : f32
    %62 = vector.shape_cast %59 : vector<9x16x1xi1> to vector<9x16x1xi1>
    %63 = vector.broadcast %62 : vector<9x16x1xi1> to vector<9x16x128xi1>
    %64 = vector.broadcast %cst_25 : f32 to vector<9x16x128xf32>
    %65 = arith.select %63, %61, %64 : vector<9x16x128xi1>, vector<9x16x128xf32>
    %66 = arith.truncf %65 : vector<9x16x128xf32> to vector<9x16x128xbf16>
    %c1 = arith.constant 1 : index
    %c0_26 = arith.constant 0 : index
    %c0_27 = arith.constant 0 : index
    %c0_28 = arith.constant 0 : index
    %67 = vector.load %arg15[%c1, %c0_26, %c0_27, %c0_28] : memref<4x9x16x128xbf16, #tpu.memory_space<vmem>>, vector<1x9x16x128xbf16>
    %68 = vector.shape_cast %67 : vector<1x9x16x128xbf16> to vector<9x16x128xbf16>
    %69 = vector.shape_cast %66 : vector<9x16x128xbf16> to vector<1x9x16x128xbf16>
    tpu.vector_store %arg15[%c1, %c0_26, %c0_27, %c0_28], %69 {strides = array<i32>} : memref<4x9x16x128xbf16, #tpu.memory_space<vmem>>, vector<1x9x16x128xbf16>,
    %c2_i32_29 = arith.constant 2 : i32
    %70 = vector.broadcast %c2_i32_29 : i32 to vector<9x16x1xi32>
    %71 = arith.muli %70, %10 : vector<9x16x1xi32>
    %c1_i32_30 = arith.constant 1 : i32
    %72 = vector.broadcast %c1_i32_30 : i32 to vector<9x16x1xi32>
    %73 = arith.addi %72, %71 : vector<9x16x1xi32>
    %c2_i32_31 = arith.constant 2 : i32
    %74 = vector.broadcast %c2_i32_31 : i32 to vector<9x16x1xi32>
    %75 = arith.muli %74, %11 : vector<9x16x1xi32>
    %c0_i32_32 = arith.constant 0 : i32
    %76 = vector.broadcast %c0_i32_32 : i32 to vector<9x16x1xi32>
    %77 = arith.addi %76, %75 : vector<9x16x1xi32>
    %c1_i32_33 = arith.constant 1 : i32
    %78 = vector.broadcast %c1_i32_33 : i32 to vector<9x16x1xi32>
    %79 = arith.cmpi sge, %73, %78 : vector<9x16x1xi32>
    %c16_i32_34 = arith.constant 16 : i32
    %80 = vector.broadcast %c16_i32_34 : i32 to vector<9x16x1xi32>
    %81 = arith.cmpi sle, %73, %80 : vector<9x16x1xi32>
    %82 = arith.andi %79, %81 : vector<9x16x1xi1>
    %c1_i32_35 = arith.constant 1 : i32
    %83 = vector.broadcast %c1_i32_35 : i32 to vector<9x16x1xi32>
    %84 = arith.cmpi sge, %77, %83 : vector<9x16x1xi32>
    %c16_i32_36 = arith.constant 16 : i32
    %85 = vector.broadcast %c16_i32_36 : i32 to vector<9x16x1xi32>
    %86 = arith.cmpi sle, %77, %85 : vector<9x16x1xi32>
    %87 = arith.andi %84, %86 : vector<9x16x1xi1>
    %88 = arith.andi %82, %87 : vector<9x16x1xi1>
    %89 = vector.extract_strided_slice %9 {offsets = [288, 0], sizes = [144, 128], strides = [1, 1]} : vector<576x128xf32> to vector<144x128xf32>
    %90 = vector.shape_cast %89 : vector<144x128xf32> to vector<9x16x128xf32>
    %cst_37 = arith.constant 0.000000e+00 : f32
    %91 = vector.shape_cast %88 : vector<9x16x1xi1> to vector<9x16x1xi1>
    %92 = vector.broadcast %91 : vector<9x16x1xi1> to vector<9x16x128xi1>
    %93 = vector.broadcast %cst_37 : f32 to vector<9x16x128xf32>
    %94 = arith.select %92, %90, %93 : vector<9x16x128xi1>, vector<9x16x128xf32>
    %95 = arith.truncf %94 : vector<9x16x128xf32> to vector<9x16x128xbf16>
    %c2 = arith.constant 2 : index
    %c0_38 = arith.constant 0 : index
    %c0_39 = arith.constant 0 : index
    %c0_40 = arith.constant 0 : index
    %96 = vector.load %arg15[%c2, %c0_38, %c0_39, %c0_40] : memref<4x9x16x128xbf16, #tpu.memory_space<vmem>>, vector<1x9x16x128xbf16>
    %97 = vector.shape_cast %96 : vector<1x9x16x128xbf16> to vector<9x16x128xbf16>
    %98 = vector.shape_cast %95 : vector<9x16x128xbf16> to vector<1x9x16x128xbf16>
    tpu.vector_store %arg15[%c2, %c0_38, %c0_39, %c0_40], %98 {strides = array<i32>} : memref<4x9x16x128xbf16, #tpu.memory_space<vmem>>, vector<1x9x16x128xbf16>,
    %c2_i32_41 = arith.constant 2 : i32
    %99 = vector.broadcast %c2_i32_41 : i32 to vector<9x16x1xi32>
    %100 = arith.muli %99, %10 : vector<9x16x1xi32>
    %c1_i32_42 = arith.constant 1 : i32
    %101 = vector.broadcast %c1_i32_42 : i32 to vector<9x16x1xi32>
    %102 = arith.addi %101, %100 : vector<9x16x1xi32>
    %c2_i32_43 = arith.constant 2 : i32
    %103 = vector.broadcast %c2_i32_43 : i32 to vector<9x16x1xi32>
    %104 = arith.muli %103, %11 : vector<9x16x1xi32>
    %c1_i32_44 = arith.constant 1 : i32
    %105 = vector.broadcast %c1_i32_44 : i32 to vector<9x16x1xi32>
    %106 = arith.addi %105, %104 : vector<9x16x1xi32>
    %c1_i32_45 = arith.constant 1 : i32
    %107 = vector.broadcast %c1_i32_45 : i32 to vector<9x16x1xi32>
    %108 = arith.cmpi sge, %102, %107 : vector<9x16x1xi32>
    %c16_i32_46 = arith.constant 16 : i32
    %109 = vector.broadcast %c16_i32_46 : i32 to vector<9x16x1xi32>
    %110 = arith.cmpi sle, %102, %109 : vector<9x16x1xi32>
    %111 = arith.andi %108, %110 : vector<9x16x1xi1>
    %c1_i32_47 = arith.constant 1 : i32
    %112 = vector.broadcast %c1_i32_47 : i32 to vector<9x16x1xi32>
    %113 = arith.cmpi sge, %106, %112 : vector<9x16x1xi32>
    %c16_i32_48 = arith.constant 16 : i32
    %114 = vector.broadcast %c16_i32_48 : i32 to vector<9x16x1xi32>
    %115 = arith.cmpi sle, %106, %114 : vector<9x16x1xi32>
    %116 = arith.andi %113, %115 : vector<9x16x1xi1>
    %117 = arith.andi %111, %116 : vector<9x16x1xi1>
    %118 = vector.extract_strided_slice %9 {offsets = [432, 0], sizes = [144, 128], strides = [1, 1]} : vector<576x128xf32> to vector<144x128xf32>
    %119 = vector.shape_cast %118 : vector<144x128xf32> to vector<9x16x128xf32>
    %cst_49 = arith.constant 0.000000e+00 : f32
    %120 = vector.shape_cast %117 : vector<9x16x1xi1> to vector<9x16x1xi1>
    %121 = vector.broadcast %120 : vector<9x16x1xi1> to vector<9x16x128xi1>
    %122 = vector.broadcast %cst_49 : f32 to vector<9x16x128xf32>
    %123 = arith.select %121, %119, %122 : vector<9x16x128xi1>, vector<9x16x128xf32>
    %124 = arith.truncf %123 : vector<9x16x128xf32> to vector<9x16x128xbf16>
    %c3 = arith.constant 3 : index
    %c0_50 = arith.constant 0 : index
    %c0_51 = arith.constant 0 : index
    %c0_52 = arith.constant 0 : index
    %125 = vector.load %arg15[%c3, %c0_50, %c0_51, %c0_52] : memref<4x9x16x128xbf16, #tpu.memory_space<vmem>>, vector<1x9x16x128xbf16>
    %126 = vector.shape_cast %125 : vector<1x9x16x128xbf16> to vector<9x16x128xbf16>
    %127 = vector.shape_cast %124 : vector<9x16x128xbf16> to vector<1x9x16x128xbf16>
    tpu.vector_store %arg15[%c3, %c0_50, %c0_51, %c0_52], %127 {strides = array<i32>} : memref<4x9x16x128xbf16, #tpu.memory_space<vmem>>, vector<1x9x16x128xbf16>,
    %c0_53 = arith.constant 0 : index
    %c0_54 = arith.constant 0 : index
    %c0_55 = arith.constant 0 : index
    %c0_56 = arith.constant 0 : index
    %128 = vector.load %arg15[%c0_53, %c0_54, %c0_55, %c0_56] : memref<4x9x16x128xbf16, #tpu.memory_space<vmem>>, vector<1x8x8x128xbf16>
    %129 = vector.shape_cast %128 : vector<1x8x8x128xbf16> to vector<8x8x128xbf16>
    %130 = vector.shape_cast %129 : vector<8x8x128xbf16> to vector<64x128xbf16>
    %c1_57 = arith.constant 1 : index
    %c0_58 = arith.constant 0 : index
    %c0_59 = arith.constant 0 : index
    %c0_60 = arith.constant 0 : index
    %131 = vector.load %arg15[%c1_57, %c0_58, %c0_59, %c0_60] : memref<4x9x16x128xbf16, #tpu.memory_space<vmem>>, vector<1x8x8x128xbf16>
    %132 = vector.shape_cast %131 : vector<1x8x8x128xbf16> to vector<8x8x128xbf16>
    %133 = vector.shape_cast %132 : vector<8x8x128xbf16> to vector<64x128xbf16>
    %c0_61 = arith.constant 0 : index
    %c0_62 = arith.constant 0 : index
    %c1_63 = arith.constant 1 : index
    %c0_64 = arith.constant 0 : index
    %134 = vector.load %arg15[%c0_61, %c0_62, %c1_63, %c0_64] : memref<4x9x16x128xbf16, #tpu.memory_space<vmem>>, vector<1x8x8x128xbf16>
    %135 = vector.shape_cast %134 : vector<1x8x8x128xbf16> to vector<8x8x128xbf16>
    %136 = vector.shape_cast %135 : vector<8x8x128xbf16> to vector<64x128xbf16>
    %c2_65 = arith.constant 2 : index
    %c0_66 = arith.constant 0 : index
    %c0_67 = arith.constant 0 : index
    %c0_68 = arith.constant 0 : index
    %137 = vector.load %arg15[%c2_65, %c0_66, %c0_67, %c0_68] : memref<4x9x16x128xbf16, #tpu.memory_space<vmem>>, vector<1x8x8x128xbf16>
    %138 = vector.shape_cast %137 : vector<1x8x8x128xbf16> to vector<8x8x128xbf16>
    %139 = vector.shape_cast %138 : vector<8x8x128xbf16> to vector<64x128xbf16>
    %c3_69 = arith.constant 3 : index
    %c0_70 = arith.constant 0 : index
    %c0_71 = arith.constant 0 : index
    %c0_72 = arith.constant 0 : index
    %140 = vector.load %arg15[%c3_69, %c0_70, %c0_71, %c0_72] : memref<4x9x16x128xbf16, #tpu.memory_space<vmem>>, vector<1x8x8x128xbf16>
    %141 = vector.shape_cast %140 : vector<1x8x8x128xbf16> to vector<8x8x128xbf16>
    %142 = vector.shape_cast %141 : vector<8x8x128xbf16> to vector<64x128xbf16>
    %c2_73 = arith.constant 2 : index
    %c0_74 = arith.constant 0 : index
    %c1_75 = arith.constant 1 : index
    %c0_76 = arith.constant 0 : index
    %143 = vector.load %arg15[%c2_73, %c0_74, %c1_75, %c0_76] : memref<4x9x16x128xbf16, #tpu.memory_space<vmem>>, vector<1x8x8x128xbf16>
    %144 = vector.shape_cast %143 : vector<1x8x8x128xbf16> to vector<8x8x128xbf16>
    %145 = vector.shape_cast %144 : vector<8x8x128xbf16> to vector<64x128xbf16>
    %c0_77 = arith.constant 0 : index
    %c1_78 = arith.constant 1 : index
    %c0_79 = arith.constant 0 : index
    %c0_80 = arith.constant 0 : index
    %146 = vector.load %arg15[%c0_77, %c1_78, %c0_79, %c0_80] : memref<4x9x16x128xbf16, #tpu.memory_space<vmem>>, vector<1x8x8x128xbf16>
    %147 = vector.shape_cast %146 : vector<1x8x8x128xbf16> to vector<8x8x128xbf16>
    %148 = vector.shape_cast %147 : vector<8x8x128xbf16> to vector<64x128xbf16>
    %c1_81 = arith.constant 1 : index
    %c1_82 = arith.constant 1 : index
    %c0_83 = arith.constant 0 : index
    %c0_84 = arith.constant 0 : index
    %149 = vector.load %arg15[%c1_81, %c1_82, %c0_83, %c0_84] : memref<4x9x16x128xbf16, #tpu.memory_space<vmem>>, vector<1x8x8x128xbf16>
    %150 = vector.shape_cast %149 : vector<1x8x8x128xbf16> to vector<8x8x128xbf16>
    %151 = vector.shape_cast %150 : vector<8x8x128xbf16> to vector<64x128xbf16>
    %c0_85 = arith.constant 0 : index
    %c1_86 = arith.constant 1 : index
    %c1_87 = arith.constant 1 : index
    %c0_88 = arith.constant 0 : index
    %152 = vector.load %arg15[%c0_85, %c1_86, %c1_87, %c0_88] : memref<4x9x16x128xbf16, #tpu.memory_space<vmem>>, vector<1x8x8x128xbf16>
    %153 = vector.shape_cast %152 : vector<1x8x8x128xbf16> to vector<8x8x128xbf16>
    %154 = vector.shape_cast %153 : vector<8x8x128xbf16> to vector<64x128xbf16>
    %155 = tpu.concatenate %130, %133, %136, %139, %142, %145, %148, %151, %154 in 1 : vector<64x128xbf16>, vector<64x128xbf16>, vector<64x128xbf16>, vector<64x128xbf16>, vector<64x128xbf16>, vector<64x128xbf16>, vector<64x128xbf16>, vector<64x128xbf16>, vector<64x128xbf16> -> vector<64x1152xbf16>
    %c0_89 = arith.constant 0 : index
    %c0_90 = arith.constant 0 : index
    %156 = vector.load %arg4[%c0_89, %c0_90] : memref<1152x128xbf16, #tpu.memory_space<vmem>>, vector<1152x128xbf16>
    %cst_91 = arith.constant dense<0.000000e+00> : vector<64x128xf32>
    %157 = tpu.matmul %155, %156, %cst_91 {dimension_numbers = #tpu.dot_dimension_numbers<[1], [0], [0], [1], [0, 0, 1, 1], [], []>} : vector<64x1152xbf16>, vector<1152x128xbf16>, vector<64x128xf32> -> vector<64x128xf32>
    %c0_92 = arith.constant 0 : index
    %c0_93 = arith.constant 0 : index
    %158 = vector.load %arg5[%c0_92, %c0_93] : memref<1x128xf32, #tpu.memory_space<vmem>>, vector<1x128xf32>
    %159 = vector.broadcast %158 : vector<1x128xf32> to vector<64x128xf32>
    %160 = arith.addf %157, %159 : vector<64x128xf32>
    %cst_94 = arith.constant 0.000000e+00 : f32
    %161 = vector.broadcast %cst_94 : f32 to vector<64x128xf32>
    %162 = arith.maximumf %160, %161 : vector<64x128xf32>
    %cst_95 = arith.constant dense<0.000000e+00> : vector<128xf32>
    %163 = vector.multi_reduction <add>, %162, %cst_95 [0] : vector<64x128xf32> to vector<128xf32>
    %164 = vector.shape_cast %163 : vector<128xf32> to vector<1x128xf32>
    %cst_96 = arith.constant 6.400000e+01 : f32
    %165 = vector.broadcast %cst_96 : f32 to vector<1x128xf32>
    %166 = arith.divf %164, %165 : vector<1x128xf32>
    %167 = arith.truncf %166 : vector<1x128xf32> to vector<1x128xbf16>
    %c0_97 = arith.constant 0 : index
    %c0_98 = arith.constant 0 : index
    %168 = vector.load %arg6[%c0_97, %c0_98] : memref<128x128xbf16, #tpu.memory_space<vmem>>, vector<128x128xbf16>
    %cst_99 = arith.constant dense<0.000000e+00> : vector<1x128xf32>
    %169 = tpu.matmul %167, %168, %cst_99 {dimension_numbers = #tpu.dot_dimension_numbers<[1], [0], [0], [1], [0, 0, 1, 1], [], []>} : vector<1x128xbf16>, vector<128x128xbf16>, vector<1x128xf32> -> vector<1x128xf32>
    %c0_100 = arith.constant 0 : index
    %c0_101 = arith.constant 0 : index
    %170 = vector.load %arg7[%c0_100, %c0_101] : memref<1x128xf32, #tpu.memory_space<vmem>>, vector<1x128xf32>
    %171 = arith.addf %169, %170 : vector<1x128xf32>
    %cst_102 = arith.constant 0.000000e+00 : f32
    %172 = vector.broadcast %cst_102 : f32 to vector<1x128xf32>
    %173 = arith.maximumf %171, %172 : vector<1x128xf32>
    %174 = arith.truncf %173 : vector<1x128xf32> to vector<1x128xbf16>
    %c0_103 = arith.constant 0 : index
    %c0_104 = arith.constant 0 : index
    %175 = vector.load %arg8[%c0_103, %c0_104] : memref<128x128xbf16, #tpu.memory_space<vmem>>, vector<128x128xbf16>
    %cst_105 = arith.constant dense<0.000000e+00> : vector<1x128xf32>
    %176 = tpu.matmul %174, %175, %cst_105 {dimension_numbers = #tpu.dot_dimension_numbers<[1], [0], [0], [1], [0, 0, 1, 1], [], []>} : vector<1x128xbf16>, vector<128x128xbf16>, vector<1x128xf32> -> vector<1x128xf32>
    %c0_106 = arith.constant 0 : index
    %c0_107 = arith.constant 0 : index
    %177 = vector.load %arg9[%c0_106, %c0_107] : memref<1x128xf32, #tpu.memory_space<vmem>>, vector<1x128xf32>
    %178 = arith.addf %176, %177 : vector<1x128xf32>
    %179 = arith.negf %178 : vector<1x128xf32>
    %180 = math.exp %179 : vector<1x128xf32>
    %cst_108 = arith.constant 1.000000e+00 : f32
    %181 = vector.broadcast %cst_108 : f32 to vector<1x128xf32>
    %182 = arith.addf %181, %180 : vector<1x128xf32>
    %183 = arith.divf %181, %182 : vector<1x128xf32>
    %c0_109 = arith.constant 0 : index
    %c0_110 = arith.constant 0 : index
    %184 = vector.load %arg10[%c0_109, %c0_110] : memref<128x128xbf16, #tpu.memory_space<vmem>>, vector<128x128xbf16>
    %185 = tpu.transpose %183, [1, 0] : vector<1x128xf32> -> vector<128x1xf32>
    %186 = arith.extf %184 : vector<128x128xbf16> to vector<128x128xf32>
    %187 = vector.broadcast %185 : vector<128x1xf32> to vector<128x128xf32>
    %188 = arith.mulf %186, %187 : vector<128x128xf32>
    %189 = arith.truncf %188 : vector<128x128xf32> to vector<128x128xbf16>
    %190 = arith.truncf %162 : vector<64x128xf32> to vector<64x128xbf16>
    %cst_111 = arith.constant dense<0.000000e+00> : vector<64x128xf32>
    %191 = tpu.matmul %190, %189, %cst_111 {dimension_numbers = #tpu.dot_dimension_numbers<[1], [0], [0], [1], [0, 0, 1, 1], [], []>} : vector<64x128xbf16>, vector<128x128xbf16>, vector<64x128xf32> -> vector<64x128xf32>
    %c0_112 = arith.constant 0 : index
    %c0_113 = arith.constant 0 : index
    %192 = vector.load %arg11[%c0_112, %c0_113] : memref<1x128xf32, #tpu.memory_space<vmem>>, vector<1x128xf32>
    %193 = vector.broadcast %192 : vector<1x128xf32> to vector<64x128xf32>
    %194 = arith.addf %191, %193 : vector<64x128xf32>
    %c0_114 = arith.constant 0 : index
    %c0_115 = arith.constant 0 : index
    %c0_116 = arith.constant 0 : index
    %c0_117 = arith.constant 0 : index
    %195 = vector.load %arg1[%c0_114, %c0_115, %c0_116, %c0_117] : memref<1x4x144x128xbf16, #tpu.memory_space<vmem>>, vector<1x4x144x128xbf16>
    %196 = vector.shape_cast %195 : vector<1x4x144x128xbf16> to vector<4x144x128xbf16>
    %197 = vector.shape_cast %196 : vector<4x144x128xbf16> to vector<4x9x16x128xbf16>
    %198 = vector.extract_strided_slice %197 {offsets = [3, 0, 0, 0], sizes = [1, 8, 8, 128], strides = [1, 1, 1, 1]} : vector<4x9x16x128xbf16> to vector<1x8x8x128xbf16>
    %199 = vector.shape_cast %198 : vector<1x8x8x128xbf16> to vector<8x8x128xbf16>
    %200 = vector.shape_cast %199 : vector<8x8x128xbf16> to vector<64x128xbf16>
    %c0_118 = arith.constant 0 : index
    %c0_119 = arith.constant 0 : index
    %201 = vector.load %arg12[%c0_118, %c0_119] : memref<128x128xbf16, #tpu.memory_space<vmem>>, vector<128x128xbf16>
    %cst_120 = arith.constant dense<0.000000e+00> : vector<64x128xf32>
    %202 = tpu.matmul %200, %201, %cst_120 {dimension_numbers = #tpu.dot_dimension_numbers<[1], [0], [0], [1], [0, 0, 1, 1], [], []>} : vector<64x128xbf16>, vector<128x128xbf16>, vector<64x128xf32> -> vector<64x128xf32>
    %c0_121 = arith.constant 0 : index
    %c0_122 = arith.constant 0 : index
    %203 = vector.load %arg13[%c0_121, %c0_122] : memref<1x128xf32, #tpu.memory_space<vmem>>, vector<1x128xf32>
    %204 = vector.broadcast %203 : vector<1x128xf32> to vector<64x128xf32>
    %205 = arith.addf %202, %204 : vector<64x128xf32>
    %206 = arith.addf %205, %194 : vector<64x128xf32>
    %cst_123 = arith.constant 0.000000e+00 : f32
    %207 = vector.broadcast %cst_123 : f32 to vector<64x128xf32>
    %208 = arith.maximumf %206, %207 : vector<64x128xf32>
    %209 = arith.truncf %208 : vector<64x128xf32> to vector<64x128xbf16>
    %c0_124 = arith.constant 0 : index
    %c0_125 = arith.constant 0 : index
    %c0_126 = arith.constant 0 : index
    %210 = vector.load %arg14[%c0_124, %c0_125, %c0_126] : memref<1x64x128xbf16, #tpu.memory_space<vmem>>, vector<1x64x128xbf16>
    %211 = vector.shape_cast %210 : vector<1x64x128xbf16> to vector<64x128xbf16>
    %212 = vector.shape_cast %209 : vector<64x128xbf16> to vector<1x64x128xbf16>
    tpu.vector_store %arg14[%c0_124, %c0_125, %c0_126], %212 {strides = array<i32>} : memref<1x64x128xbf16, #tpu.memory_space<vmem>>, vector<1x64x128xbf16>,
    return
  }
  func.func @transform_0(%arg0: i32) -> (i32, i32, i32, i32) {
    %c0_i32 = arith.constant 0 : i32
    %c0_i32_0 = arith.constant 0 : i32
    %c0_i32_1 = arith.constant 0 : i32
    %c0_i32_2 = arith.constant 0 : i32
    return %arg0, %c0_i32, %c0_i32_0, %c0_i32_1 : i32, i32, i32, i32
  }
  func.func @transform_1(%arg0: i32) -> (i32, i32) {
    %c0_i32 = arith.constant 0 : i32
    %c0_i32_0 = arith.constant 0 : i32
    %c0_i32_1 = arith.constant 0 : i32
    return %c0_i32, %c0_i32_0 : i32, i32
  }
  func.func @transform_2(%arg0: i32) -> (i32, i32) {
    %c0_i32 = arith.constant 0 : i32
    %c0_i32_0 = arith.constant 0 : i32
    %c0_i32_1 = arith.constant 0 : i32
    return %c0_i32, %c0_i32_0 : i32, i32
  }
  func.func @transform_3(%arg0: i32) -> (i32, i32) {
    %c0_i32 = arith.constant 0 : i32
    %c0_i32_0 = arith.constant 0 : i32
    %c0_i32_1 = arith.constant 0 : i32
    return %c0_i32, %c0_i32_0 : i32, i32
  }
  func.func @transform_4(%arg0: i32) -> (i32, i32) {
    %c0_i32 = arith.constant 0 : i32
    %c0_i32_0 = arith.constant 0 : i32
    %c0_i32_1 = arith.constant 0 : i32
    return %c0_i32, %c0_i32_0 : i32, i32
  }
  func.func @transform_5(%arg0: i32) -> (i32, i32) {
    %c0_i32 = arith.constant 0 : i32
    %c0_i32_0 = arith.constant 0 : i32
    %c0_i32_1 = arith.constant 0 : i32
    return %c0_i32, %c0_i32_0 : i32, i32
  }
  func.func @transform_6(%arg0: i32) -> (i32, i32) {
    %c0_i32 = arith.constant 0 : i32
    %c0_i32_0 = arith.constant 0 : i32
    %c0_i32_1 = arith.constant 0 : i32
    return %c0_i32, %c0_i32_0 : i32, i32
  }
  func.func @transform_7(%arg0: i32) -> (i32, i32) {
    %c0_i32 = arith.constant 0 : i32
    %c0_i32_0 = arith.constant 0 : i32
    %c0_i32_1 = arith.constant 0 : i32
    return %c0_i32, %c0_i32_0 : i32, i32
  }
  func.func @transform_8(%arg0: i32) -> (i32, i32) {
    %c0_i32 = arith.constant 0 : i32
    %c0_i32_0 = arith.constant 0 : i32
    %c0_i32_1 = arith.constant 0 : i32
    return %c0_i32, %c0_i32_0 : i32, i32
  }
  func.func @transform_9(%arg0: i32) -> (i32, i32) {
    %c0_i32 = arith.constant 0 : i32
    %c0_i32_0 = arith.constant 0 : i32
    %c0_i32_1 = arith.constant 0 : i32
    return %c0_i32, %c0_i32_0 : i32, i32
  }
  func.func @transform_10(%arg0: i32) -> (i32, i32) {
    %c0_i32 = arith.constant 0 : i32
    %c0_i32_0 = arith.constant 0 : i32
    %c0_i32_1 = arith.constant 0 : i32
    return %c0_i32, %c0_i32_0 : i32, i32
  }
  func.func @transform_11(%arg0: i32) -> (i32, i32) {
    %c0_i32 = arith.constant 0 : i32
    %c0_i32_0 = arith.constant 0 : i32
    %c0_i32_1 = arith.constant 0 : i32
    return %c0_i32, %c0_i32_0 : i32, i32
  }
  func.func @transform_12(%arg0: i32) -> (i32, i32) {
    %c0_i32 = arith.constant 0 : i32
    %c0_i32_0 = arith.constant 0 : i32
    %c0_i32_1 = arith.constant 0 : i32
    return %c0_i32, %c0_i32_0 : i32, i32
  }
  func.func @transform_13(%arg0: i32) -> (i32, i32, i32) {
    %c0_i32 = arith.constant 0 : i32
    %c0_i32_0 = arith.constant 0 : i32
    %c0_i32_1 = arith.constant 0 : i32
    return %arg0, %c0_i32, %c0_i32_0 : i32, i32, i32
  }
}

module attributes {stable_mosaic.version = 11 : i64} {
  func.func @_block_kernel(%arg0: i32, %arg1: memref<1x1x160x128xbf16, #tpu.memory_space<vmem>>, %arg2: memref<128x128xbf16, #tpu.memory_space<vmem>>, %arg3: memref<1x128xf32, #tpu.memory_space<vmem>>, %arg4: memref<1152x128xbf16, #tpu.memory_space<vmem>>, %arg5: memref<1x128xf32, #tpu.memory_space<vmem>>, %arg6: memref<128x128xbf16, #tpu.memory_space<vmem>>, %arg7: memref<1x128xf32, #tpu.memory_space<vmem>>, %arg8: memref<128x128xbf16, #tpu.memory_space<vmem>>, %arg9: memref<1x128xf32, #tpu.memory_space<vmem>>, %arg10: memref<128x128xbf16, #tpu.memory_space<vmem>>, %arg11: memref<1x128xf32, #tpu.memory_space<vmem>>, %arg12: memref<8x128xbf16, #tpu.memory_space<vmem>>, %arg13: memref<1x128xf32, #tpu.memory_space<vmem>>, %arg14: memref<1x64x128xbf16, #tpu.memory_space<vmem>>, %arg15: memref<1x10x16x128xbf16, #tpu.memory_space<vmem>>) attributes {dimension_semantics = [#tpu.dimension_semantics<parallel>], iteration_bounds = array<i64: 2>, scalar_prefetch = 0 : i64, scratch_operands = 1 : i64, tpu.core_type = #tpu.core_type<tc>, window_params = [{transform_indices = @transform_0, window_bounds = array<i64: 1, 1, 160, 128>}, {pipeline_mode = #tpu.pipeline_mode<synchronous>, transform_indices = @transform_1, window_bounds = array<i64: 128, 128>}, {pipeline_mode = #tpu.pipeline_mode<synchronous>, transform_indices = @transform_2, window_bounds = array<i64: 1, 128>}, {pipeline_mode = #tpu.pipeline_mode<synchronous>, transform_indices = @transform_3, window_bounds = array<i64: 1152, 128>}, {pipeline_mode = #tpu.pipeline_mode<synchronous>, transform_indices = @transform_4, window_bounds = array<i64: 1, 128>}, {pipeline_mode = #tpu.pipeline_mode<synchronous>, transform_indices = @transform_5, window_bounds = array<i64: 128, 128>}, {pipeline_mode = #tpu.pipeline_mode<synchronous>, transform_indices = @transform_6, window_bounds = array<i64: 1, 128>}, {pipeline_mode = #tpu.pipeline_mode<synchronous>, transform_indices = @transform_7, window_bounds = array<i64: 128, 128>}, {pipeline_mode = #tpu.pipeline_mode<synchronous>, transform_indices = @transform_8, window_bounds = array<i64: 1, 128>}, {pipeline_mode = #tpu.pipeline_mode<synchronous>, transform_indices = @transform_9, window_bounds = array<i64: 128, 128>}, {pipeline_mode = #tpu.pipeline_mode<synchronous>, transform_indices = @transform_10, window_bounds = array<i64: 1, 128>}, {pipeline_mode = #tpu.pipeline_mode<synchronous>, transform_indices = @transform_11, window_bounds = array<i64: 8, 128>}, {pipeline_mode = #tpu.pipeline_mode<synchronous>, transform_indices = @transform_12, window_bounds = array<i64: 1, 128>}, {transform_indices = @transform_13, window_bounds = array<i64: 1, 64, 128>}]} {
    %c0 = arith.constant 0 : index
    %c0_0 = arith.constant 0 : index
    %c0_1 = arith.constant 0 : index
    %c0_2 = arith.constant 0 : index
    %0 = vector.load %arg1[%c0, %c0_0, %c0_1, %c0_2] : memref<1x1x160x128xbf16, #tpu.memory_space<vmem>>, vector<1x1x160x128xbf16>
    %1 = vector.shape_cast %0 : vector<1x1x160x128xbf16> to vector<1x160x128xbf16>
    %2 = vector.shape_cast %1 : vector<1x160x128xbf16> to vector<160x128xbf16>
    %c0_3 = arith.constant 0 : index
    %c0_4 = arith.constant 0 : index
    %3 = vector.load %arg2[%c0_3, %c0_4] : memref<128x128xbf16, #tpu.memory_space<vmem>>, vector<128x128xbf16>
    %cst = arith.constant dense<0.000000e+00> : vector<160x128xf32>
    %4 = tpu.matmul %2, %3, %cst {dimension_numbers = #tpu.dot_dimension_numbers<[1], [0], [0], [1], [0, 0, 1, 1], [], []>} : vector<160x128xbf16>, vector<128x128xbf16>, vector<160x128xf32> -> vector<160x128xf32>
    %c0_5 = arith.constant 0 : index
    %c0_6 = arith.constant 0 : index
    %5 = vector.load %arg3[%c0_5, %c0_6] : memref<1x128xf32, #tpu.memory_space<vmem>>, vector<1x128xf32>
    %6 = vector.broadcast %5 : vector<1x128xf32> to vector<160x128xf32>
    %7 = arith.addf %4, %6 : vector<160x128xf32>
    %cst_7 = arith.constant 0.000000e+00 : f32
    %8 = vector.broadcast %cst_7 : f32 to vector<160x128xf32>
    %9 = arith.maximumf %7, %8 : vector<160x128xf32>
    %10 = tpu.iota {dimensions = array<i32: 0>} : vector<10x16x1xi32>
    %11 = tpu.iota {dimensions = array<i32: 1>} : vector<10x16x1xi32>
    %c1_i32 = arith.constant 1 : i32
    %12 = vector.broadcast %c1_i32 : i32 to vector<10x16x1xi32>
    %13 = arith.muli %12, %10 : vector<10x16x1xi32>
    %c0_i32 = arith.constant 0 : i32
    %14 = vector.broadcast %c0_i32 : i32 to vector<10x16x1xi32>
    %15 = arith.addi %14, %13 : vector<10x16x1xi32>
    %c1_i32_8 = arith.constant 1 : i32
    %16 = vector.broadcast %c1_i32_8 : i32 to vector<10x16x1xi32>
    %17 = arith.muli %16, %11 : vector<10x16x1xi32>
    %c0_i32_9 = arith.constant 0 : i32
    %18 = vector.broadcast %c0_i32_9 : i32 to vector<10x16x1xi32>
    %19 = arith.addi %18, %17 : vector<10x16x1xi32>
    %c1_i32_10 = arith.constant 1 : i32
    %20 = vector.broadcast %c1_i32_10 : i32 to vector<10x16x1xi32>
    %21 = arith.cmpi sge, %15, %20 : vector<10x16x1xi32>
    %c8_i32 = arith.constant 8 : i32
    %22 = vector.broadcast %c8_i32 : i32 to vector<10x16x1xi32>
    %23 = arith.cmpi sle, %15, %22 : vector<10x16x1xi32>
    %24 = arith.andi %21, %23 : vector<10x16x1xi1>
    %c1_i32_11 = arith.constant 1 : i32
    %25 = vector.broadcast %c1_i32_11 : i32 to vector<10x16x1xi32>
    %26 = arith.cmpi sge, %19, %25 : vector<10x16x1xi32>
    %c8_i32_12 = arith.constant 8 : i32
    %27 = vector.broadcast %c8_i32_12 : i32 to vector<10x16x1xi32>
    %28 = arith.cmpi sle, %19, %27 : vector<10x16x1xi32>
    %29 = arith.andi %26, %28 : vector<10x16x1xi1>
    %30 = arith.andi %24, %29 : vector<10x16x1xi1>
    %31 = vector.shape_cast %9 : vector<160x128xf32> to vector<10x16x128xf32>
    %cst_13 = arith.constant 0.000000e+00 : f32
    %32 = vector.shape_cast %30 : vector<10x16x1xi1> to vector<10x16x1xi1>
    %33 = vector.broadcast %32 : vector<10x16x1xi1> to vector<10x16x128xi1>
    %34 = vector.broadcast %cst_13 : f32 to vector<10x16x128xf32>
    %35 = arith.select %33, %31, %34 : vector<10x16x128xi1>, vector<10x16x128xf32>
    %36 = arith.truncf %35 : vector<10x16x128xf32> to vector<10x16x128xbf16>
    %c0_14 = arith.constant 0 : index
    %c0_15 = arith.constant 0 : index
    %c0_16 = arith.constant 0 : index
    %c0_17 = arith.constant 0 : index
    %37 = vector.load %arg15[%c0_14, %c0_15, %c0_16, %c0_17] : memref<1x10x16x128xbf16, #tpu.memory_space<vmem>>, vector<1x10x16x128xbf16>
    %38 = vector.shape_cast %37 : vector<1x10x16x128xbf16> to vector<10x16x128xbf16>
    %39 = vector.shape_cast %36 : vector<10x16x128xbf16> to vector<1x10x16x128xbf16>
    tpu.vector_store %arg15[%c0_14, %c0_15, %c0_16, %c0_17], %39 {strides = array<i32>} : memref<1x10x16x128xbf16, #tpu.memory_space<vmem>>, vector<1x10x16x128xbf16>,
    %c0_18 = arith.constant 0 : index
    %c0_19 = arith.constant 0 : index
    %c0_20 = arith.constant 0 : index
    %c0_21 = arith.constant 0 : index
    %40 = vector.load %arg15[%c0_18, %c0_19, %c0_20, %c0_21] : memref<1x10x16x128xbf16, #tpu.memory_space<vmem>>, vector<1x8x8x128xbf16>
    %41 = vector.shape_cast %40 : vector<1x8x8x128xbf16> to vector<8x8x128xbf16>
    %42 = vector.shape_cast %41 : vector<8x8x128xbf16> to vector<64x128xbf16>
    %c0_22 = arith.constant 0 : index
    %c0_23 = arith.constant 0 : index
    %c1 = arith.constant 1 : index
    %c0_24 = arith.constant 0 : index
    %43 = vector.load %arg15[%c0_22, %c0_23, %c1, %c0_24] : memref<1x10x16x128xbf16, #tpu.memory_space<vmem>>, vector<1x8x8x128xbf16>
    %44 = vector.shape_cast %43 : vector<1x8x8x128xbf16> to vector<8x8x128xbf16>
    %45 = vector.shape_cast %44 : vector<8x8x128xbf16> to vector<64x128xbf16>
    %c0_25 = arith.constant 0 : index
    %c0_26 = arith.constant 0 : index
    %c2 = arith.constant 2 : index
    %c0_27 = arith.constant 0 : index
    %46 = vector.load %arg15[%c0_25, %c0_26, %c2, %c0_27] : memref<1x10x16x128xbf16, #tpu.memory_space<vmem>>, vector<1x8x8x128xbf16>
    %47 = vector.shape_cast %46 : vector<1x8x8x128xbf16> to vector<8x8x128xbf16>
    %48 = vector.shape_cast %47 : vector<8x8x128xbf16> to vector<64x128xbf16>
    %c0_28 = arith.constant 0 : index
    %c1_29 = arith.constant 1 : index
    %c0_30 = arith.constant 0 : index
    %c0_31 = arith.constant 0 : index
    %49 = vector.load %arg15[%c0_28, %c1_29, %c0_30, %c0_31] : memref<1x10x16x128xbf16, #tpu.memory_space<vmem>>, vector<1x8x8x128xbf16>
    %50 = vector.shape_cast %49 : vector<1x8x8x128xbf16> to vector<8x8x128xbf16>
    %51 = vector.shape_cast %50 : vector<8x8x128xbf16> to vector<64x128xbf16>
    %c0_32 = arith.constant 0 : index
    %c1_33 = arith.constant 1 : index
    %c1_34 = arith.constant 1 : index
    %c0_35 = arith.constant 0 : index
    %52 = vector.load %arg15[%c0_32, %c1_33, %c1_34, %c0_35] : memref<1x10x16x128xbf16, #tpu.memory_space<vmem>>, vector<1x8x8x128xbf16>
    %53 = vector.shape_cast %52 : vector<1x8x8x128xbf16> to vector<8x8x128xbf16>
    %54 = vector.shape_cast %53 : vector<8x8x128xbf16> to vector<64x128xbf16>
    %c0_36 = arith.constant 0 : index
    %c1_37 = arith.constant 1 : index
    %c2_38 = arith.constant 2 : index
    %c0_39 = arith.constant 0 : index
    %55 = vector.load %arg15[%c0_36, %c1_37, %c2_38, %c0_39] : memref<1x10x16x128xbf16, #tpu.memory_space<vmem>>, vector<1x8x8x128xbf16>
    %56 = vector.shape_cast %55 : vector<1x8x8x128xbf16> to vector<8x8x128xbf16>
    %57 = vector.shape_cast %56 : vector<8x8x128xbf16> to vector<64x128xbf16>
    %c0_40 = arith.constant 0 : index
    %c2_41 = arith.constant 2 : index
    %c0_42 = arith.constant 0 : index
    %c0_43 = arith.constant 0 : index
    %58 = vector.load %arg15[%c0_40, %c2_41, %c0_42, %c0_43] : memref<1x10x16x128xbf16, #tpu.memory_space<vmem>>, vector<1x8x8x128xbf16>
    %59 = vector.shape_cast %58 : vector<1x8x8x128xbf16> to vector<8x8x128xbf16>
    %60 = vector.shape_cast %59 : vector<8x8x128xbf16> to vector<64x128xbf16>
    %c0_44 = arith.constant 0 : index
    %c2_45 = arith.constant 2 : index
    %c1_46 = arith.constant 1 : index
    %c0_47 = arith.constant 0 : index
    %61 = vector.load %arg15[%c0_44, %c2_45, %c1_46, %c0_47] : memref<1x10x16x128xbf16, #tpu.memory_space<vmem>>, vector<1x8x8x128xbf16>
    %62 = vector.shape_cast %61 : vector<1x8x8x128xbf16> to vector<8x8x128xbf16>
    %63 = vector.shape_cast %62 : vector<8x8x128xbf16> to vector<64x128xbf16>
    %c0_48 = arith.constant 0 : index
    %c2_49 = arith.constant 2 : index
    %c2_50 = arith.constant 2 : index
    %c0_51 = arith.constant 0 : index
    %64 = vector.load %arg15[%c0_48, %c2_49, %c2_50, %c0_51] : memref<1x10x16x128xbf16, #tpu.memory_space<vmem>>, vector<1x8x8x128xbf16>
    %65 = vector.shape_cast %64 : vector<1x8x8x128xbf16> to vector<8x8x128xbf16>
    %66 = vector.shape_cast %65 : vector<8x8x128xbf16> to vector<64x128xbf16>
    %67 = tpu.concatenate %42, %45, %48, %51, %54, %57, %60, %63, %66 in 1 : vector<64x128xbf16>, vector<64x128xbf16>, vector<64x128xbf16>, vector<64x128xbf16>, vector<64x128xbf16>, vector<64x128xbf16>, vector<64x128xbf16>, vector<64x128xbf16>, vector<64x128xbf16> -> vector<64x1152xbf16>
    %c0_52 = arith.constant 0 : index
    %c0_53 = arith.constant 0 : index
    %68 = vector.load %arg4[%c0_52, %c0_53] : memref<1152x128xbf16, #tpu.memory_space<vmem>>, vector<1152x128xbf16>
    %cst_54 = arith.constant dense<0.000000e+00> : vector<64x128xf32>
    %69 = tpu.matmul %67, %68, %cst_54 {dimension_numbers = #tpu.dot_dimension_numbers<[1], [0], [0], [1], [0, 0, 1, 1], [], []>} : vector<64x1152xbf16>, vector<1152x128xbf16>, vector<64x128xf32> -> vector<64x128xf32>
    %c0_55 = arith.constant 0 : index
    %c0_56 = arith.constant 0 : index
    %70 = vector.load %arg5[%c0_55, %c0_56] : memref<1x128xf32, #tpu.memory_space<vmem>>, vector<1x128xf32>
    %71 = vector.broadcast %70 : vector<1x128xf32> to vector<64x128xf32>
    %72 = arith.addf %69, %71 : vector<64x128xf32>
    %cst_57 = arith.constant 0.000000e+00 : f32
    %73 = vector.broadcast %cst_57 : f32 to vector<64x128xf32>
    %74 = arith.maximumf %72, %73 : vector<64x128xf32>
    %cst_58 = arith.constant dense<0.000000e+00> : vector<128xf32>
    %75 = vector.multi_reduction <add>, %74, %cst_58 [0] : vector<64x128xf32> to vector<128xf32>
    %76 = vector.shape_cast %75 : vector<128xf32> to vector<1x128xf32>
    %cst_59 = arith.constant 6.400000e+01 : f32
    %77 = vector.broadcast %cst_59 : f32 to vector<1x128xf32>
    %78 = arith.divf %76, %77 : vector<1x128xf32>
    %79 = arith.truncf %78 : vector<1x128xf32> to vector<1x128xbf16>
    %c0_60 = arith.constant 0 : index
    %c0_61 = arith.constant 0 : index
    %80 = vector.load %arg6[%c0_60, %c0_61] : memref<128x128xbf16, #tpu.memory_space<vmem>>, vector<128x128xbf16>
    %cst_62 = arith.constant dense<0.000000e+00> : vector<1x128xf32>
    %81 = tpu.matmul %79, %80, %cst_62 {dimension_numbers = #tpu.dot_dimension_numbers<[1], [0], [0], [1], [0, 0, 1, 1], [], []>} : vector<1x128xbf16>, vector<128x128xbf16>, vector<1x128xf32> -> vector<1x128xf32>
    %c0_63 = arith.constant 0 : index
    %c0_64 = arith.constant 0 : index
    %82 = vector.load %arg7[%c0_63, %c0_64] : memref<1x128xf32, #tpu.memory_space<vmem>>, vector<1x128xf32>
    %83 = arith.addf %81, %82 : vector<1x128xf32>
    %cst_65 = arith.constant 0.000000e+00 : f32
    %84 = vector.broadcast %cst_65 : f32 to vector<1x128xf32>
    %85 = arith.maximumf %83, %84 : vector<1x128xf32>
    %86 = arith.truncf %85 : vector<1x128xf32> to vector<1x128xbf16>
    %c0_66 = arith.constant 0 : index
    %c0_67 = arith.constant 0 : index
    %87 = vector.load %arg8[%c0_66, %c0_67] : memref<128x128xbf16, #tpu.memory_space<vmem>>, vector<128x128xbf16>
    %cst_68 = arith.constant dense<0.000000e+00> : vector<1x128xf32>
    %88 = tpu.matmul %86, %87, %cst_68 {dimension_numbers = #tpu.dot_dimension_numbers<[1], [0], [0], [1], [0, 0, 1, 1], [], []>} : vector<1x128xbf16>, vector<128x128xbf16>, vector<1x128xf32> -> vector<1x128xf32>
    %c0_69 = arith.constant 0 : index
    %c0_70 = arith.constant 0 : index
    %89 = vector.load %arg9[%c0_69, %c0_70] : memref<1x128xf32, #tpu.memory_space<vmem>>, vector<1x128xf32>
    %90 = arith.addf %88, %89 : vector<1x128xf32>
    %91 = arith.negf %90 : vector<1x128xf32>
    %92 = math.exp %91 : vector<1x128xf32>
    %cst_71 = arith.constant 1.000000e+00 : f32
    %93 = vector.broadcast %cst_71 : f32 to vector<1x128xf32>
    %94 = arith.addf %93, %92 : vector<1x128xf32>
    %95 = arith.divf %93, %94 : vector<1x128xf32>
    %c0_72 = arith.constant 0 : index
    %c0_73 = arith.constant 0 : index
    %96 = vector.load %arg10[%c0_72, %c0_73] : memref<128x128xbf16, #tpu.memory_space<vmem>>, vector<128x128xbf16>
    %97 = tpu.transpose %95, [1, 0] : vector<1x128xf32> -> vector<128x1xf32>
    %98 = arith.extf %96 : vector<128x128xbf16> to vector<128x128xf32>
    %99 = vector.broadcast %97 : vector<128x1xf32> to vector<128x128xf32>
    %100 = arith.mulf %98, %99 : vector<128x128xf32>
    %101 = arith.truncf %100 : vector<128x128xf32> to vector<128x128xbf16>
    %102 = arith.truncf %74 : vector<64x128xf32> to vector<64x128xbf16>
    %cst_74 = arith.constant dense<0.000000e+00> : vector<64x128xf32>
    %103 = tpu.matmul %102, %101, %cst_74 {dimension_numbers = #tpu.dot_dimension_numbers<[1], [0], [0], [1], [0, 0, 1, 1], [], []>} : vector<64x128xbf16>, vector<128x128xbf16>, vector<64x128xf32> -> vector<64x128xf32>
    %c0_75 = arith.constant 0 : index
    %c0_76 = arith.constant 0 : index
    %104 = vector.load %arg11[%c0_75, %c0_76] : memref<1x128xf32, #tpu.memory_space<vmem>>, vector<1x128xf32>
    %105 = vector.broadcast %104 : vector<1x128xf32> to vector<64x128xf32>
    %106 = arith.addf %103, %105 : vector<64x128xf32>
    %c0_77 = arith.constant 0 : index
    %c0_78 = arith.constant 0 : index
    %c0_79 = arith.constant 0 : index
    %c0_80 = arith.constant 0 : index
    %107 = vector.load %arg1[%c0_77, %c0_78, %c0_79, %c0_80] : memref<1x1x160x128xbf16, #tpu.memory_space<vmem>>, vector<1x1x160x128xbf16>
    %108 = vector.shape_cast %107 : vector<1x1x160x128xbf16> to vector<1x160x128xbf16>
    %109 = vector.shape_cast %108 : vector<1x160x128xbf16> to vector<1x10x16x128xbf16>
    %110 = vector.extract_strided_slice %109 {offsets = [0, 1, 1, 0], sizes = [1, 8, 8, 128], strides = [1, 1, 1, 1]} : vector<1x10x16x128xbf16> to vector<1x8x8x128xbf16>
    %111 = vector.shape_cast %110 : vector<1x8x8x128xbf16> to vector<8x8x128xbf16>
    %112 = vector.shape_cast %111 : vector<8x8x128xbf16> to vector<64x128xbf16>
    %113 = arith.extf %112 : vector<64x128xbf16> to vector<64x128xf32>
    %114 = arith.addf %113, %106 : vector<64x128xf32>
    %cst_81 = arith.constant 0.000000e+00 : f32
    %115 = vector.broadcast %cst_81 : f32 to vector<64x128xf32>
    %116 = arith.maximumf %114, %115 : vector<64x128xf32>
    %117 = arith.truncf %116 : vector<64x128xf32> to vector<64x128xbf16>
    %c0_82 = arith.constant 0 : index
    %c0_83 = arith.constant 0 : index
    %c0_84 = arith.constant 0 : index
    %118 = vector.load %arg14[%c0_82, %c0_83, %c0_84] : memref<1x64x128xbf16, #tpu.memory_space<vmem>>, vector<1x64x128xbf16>
    %119 = vector.shape_cast %118 : vector<1x64x128xbf16> to vector<64x128xbf16>
    %120 = vector.shape_cast %117 : vector<64x128xbf16> to vector<1x64x128xbf16>
    tpu.vector_store %arg14[%c0_82, %c0_83, %c0_84], %120 {strides = array<i32>} : memref<1x64x128xbf16, #tpu.memory_space<vmem>>, vector<1x64x128xbf16>,
    return
  }
  func.func @transform_0(%arg0: i32) -> (i32, i32, i32, i32) {
    %c0_i32 = arith.constant 0 : i32
    %c0_i32_0 = arith.constant 0 : i32
    %c0_i32_1 = arith.constant 0 : i32
    %c0_i32_2 = arith.constant 0 : i32
    return %arg0, %c0_i32, %c0_i32_0, %c0_i32_1 : i32, i32, i32, i32
  }
  func.func @transform_1(%arg0: i32) -> (i32, i32) {
    %c0_i32 = arith.constant 0 : i32
    %c0_i32_0 = arith.constant 0 : i32
    %c0_i32_1 = arith.constant 0 : i32
    return %c0_i32, %c0_i32_0 : i32, i32
  }
  func.func @transform_2(%arg0: i32) -> (i32, i32) {
    %c0_i32 = arith.constant 0 : i32
    %c0_i32_0 = arith.constant 0 : i32
    %c0_i32_1 = arith.constant 0 : i32
    return %c0_i32, %c0_i32_0 : i32, i32
  }
  func.func @transform_3(%arg0: i32) -> (i32, i32) {
    %c0_i32 = arith.constant 0 : i32
    %c0_i32_0 = arith.constant 0 : i32
    %c0_i32_1 = arith.constant 0 : i32
    return %c0_i32, %c0_i32_0 : i32, i32
  }
  func.func @transform_4(%arg0: i32) -> (i32, i32) {
    %c0_i32 = arith.constant 0 : i32
    %c0_i32_0 = arith.constant 0 : i32
    %c0_i32_1 = arith.constant 0 : i32
    return %c0_i32, %c0_i32_0 : i32, i32
  }
  func.func @transform_5(%arg0: i32) -> (i32, i32) {
    %c0_i32 = arith.constant 0 : i32
    %c0_i32_0 = arith.constant 0 : i32
    %c0_i32_1 = arith.constant 0 : i32
    return %c0_i32, %c0_i32_0 : i32, i32
  }
  func.func @transform_6(%arg0: i32) -> (i32, i32) {
    %c0_i32 = arith.constant 0 : i32
    %c0_i32_0 = arith.constant 0 : i32
    %c0_i32_1 = arith.constant 0 : i32
    return %c0_i32, %c0_i32_0 : i32, i32
  }
  func.func @transform_7(%arg0: i32) -> (i32, i32) {
    %c0_i32 = arith.constant 0 : i32
    %c0_i32_0 = arith.constant 0 : i32
    %c0_i32_1 = arith.constant 0 : i32
    return %c0_i32, %c0_i32_0 : i32, i32
  }
  func.func @transform_8(%arg0: i32) -> (i32, i32) {
    %c0_i32 = arith.constant 0 : i32
    %c0_i32_0 = arith.constant 0 : i32
    %c0_i32_1 = arith.constant 0 : i32
    return %c0_i32, %c0_i32_0 : i32, i32
  }
  func.func @transform_9(%arg0: i32) -> (i32, i32) {
    %c0_i32 = arith.constant 0 : i32
    %c0_i32_0 = arith.constant 0 : i32
    %c0_i32_1 = arith.constant 0 : i32
    return %c0_i32, %c0_i32_0 : i32, i32
  }
  func.func @transform_10(%arg0: i32) -> (i32, i32) {
    %c0_i32 = arith.constant 0 : i32
    %c0_i32_0 = arith.constant 0 : i32
    %c0_i32_1 = arith.constant 0 : i32
    return %c0_i32, %c0_i32_0 : i32, i32
  }
  func.func @transform_11(%arg0: i32) -> (i32, i32) {
    %c0_i32 = arith.constant 0 : i32
    %c0_i32_0 = arith.constant 0 : i32
    %c0_i32_1 = arith.constant 0 : i32
    return %c0_i32, %c0_i32_0 : i32, i32
  }
  func.func @transform_12(%arg0: i32) -> (i32, i32) {
    %c0_i32 = arith.constant 0 : i32
    %c0_i32_0 = arith.constant 0 : i32
    %c0_i32_1 = arith.constant 0 : i32
    return %c0_i32, %c0_i32_0 : i32, i32
  }
  func.func @transform_13(%arg0: i32) -> (i32, i32, i32) {
    %c0_i32 = arith.constant 0 : i32
    %c0_i32_0 = arith.constant 0 : i32
    %c0_i32_1 = arith.constant 0 : i32
    return %arg0, %c0_i32, %c0_i32_0 : i32, i32, i32
  }
}

</mosaic_0001>

<bundles_post_ra>
// kernel: anystage_forward_pallas.2
= control target key start
LH: loop header
LB: loop body
LE: loop exit
PB: predicated region body
PF: predicated region fallthrough
CT: control target
= control target key end

     0   :  { %s4904_s25 = smov 0   ;;  %s5812_s0 = inlined_call_operand.vmem [shape: bf16[2,4,144,128], index: 0, kind: input, shape index: {}]   ;;  %s5813_s1 = inlined_call_operand.vmem [shape: bf16[128,128], index: 1, kind: input, shape index: {}]   ;;  %s5814_s2 = inlined_call_operand.vmem [shape: f32[1,128], index: 2, kind: input, shape index: {}]   ;;  %s5815_s3 = inlined_call_operand.vmem [shape: bf16[1152,128], index: 3, kind: input, shape index: {}]   ;;  %s5816_s4 = inlined_call_operand.vmem [shape: f32[1,128], index: 4, kind: input, shape index: {}]   ;;  %s5817_s5 = inlined_call_operand.vmem [shape: bf16[128,128], index: 5, kind: input, shape index: {}]   ;;  %s5818_s6 = inlined_call_operand.vmem [shape: f32[1,128], index: 6, kind: input, shape index: {}]   ;;  %s5819_s7 = inlined_call_operand.vmem [shape: bf16[128,128], index: 7, kind: input, shape index: {}]   ;;  %s5820_s8 = inlined_call_operand.vmem [shape: f32[1,128], index: 8, kind: input, shape index: {}]   ;;  %s5821_s9 = inlined_call_operand.vmem [shape: bf16[128,128], index: 9, kind: input, shape index: {}]   ;;  %s5822_s10 = inlined_call_operand.vmem [shape: f32[1,128], index: 10, kind: input, shape index: {}]   ;;  %s5823_s11 = inlined_call_operand.vmem [shape: bf16[128,128], index: 11, kind: input, shape index: {}]   ;;  %s5824_s12 = inlined_call_operand.vmem [shape: f32[1,128], index: 12, kind: input, shape index: {}]   ;;  %s5825_s13 = inlined_call_operand.vmem [shape: bf16[2,64,128], index: 13, kind: output, shape index: {}]  }
   0x1 LB: > { %s3782_s26 = sadd.s32 4294967295, %s4828_s25   ;;  %p3786_p0 = scmp.ge.s32.totalorder %s4828_s25, 1  ;;  %s4828_s25 = sphi %s4904_s25, %s23_s25  }
   0x2   : > { %p387_p1 = scmp.lt.s32.totalorder %s4828_s25, 3 }
   0x4   : > { %p388_p2 = pnand %p3786_p0, %p387_p1 }
   0x5   : > { %v4601_v0 = vld [vmem:[%s5813_s1] sm:$0xff] (!%p388_p2)   ;;  %p431_p3 = scmp.lt.s32.totalorder (!%p388_p2), %s3782_s26, 1  ;;  %v4602_v1 = vld [vmem:[%s5813_s1 + $0x8] sm:$0xff] (!%p388_p2)   ;;  %v4603_v2 = vld [vmem:[%s5813_s1 + $0x10] sm:$0xff] (!%p388_p2)   ;;  %v4830_v35 = vmov (!%p388_p2), 0.0|0.0   ;;  %v1194_v62 = vlaneseq (!%p388_p2)  ;;  %vm4832_vm15 = vmmov (!%p388_p2), 0  }
   0x6   : > { %391 = sbr.rel (%p388_p2) target bundleno = 1738 (0x6ca), region = 72  ;;  %4362 = vmatprep.subr.bf16.mxu0 (!%p388_p2), %v4601_v0  ;;  %v4604_v3 = vld [vmem:[%s5813_s1 + $0x18] sm:$0xff] (!%p388_p2)   ;;  %v4605_v5 = vld [vmem:[%s5813_s1 + $0x20] sm:$0xff] (!%p388_p2)   ;;  %v4606_v6 = vld [vmem:[%s5813_s1 + $0x28] sm:$0xff] (!%p388_p2)   ;;  %1301 = vst [vmem:[#allocation2 + $0x48] sm:$0xff] (!%p388_p2), %v4830_v35 }
   0x7   : > { %4363 = vmatpush3.bf16.msra.mxu0 (!%p388_p2), %v4601_v0  ;;  %v4607_v7 = vld [vmem:[%s5813_s1 + $0x30] sm:$0xff] (!%p388_p2)   ;;  %v4608_v8 = vld [vmem:[%s5813_s1 + $0x38] sm:$0xff] (!%p388_p2)   ;;  %1244 = vst [vmem:[#allocation2] sm:$0xff] (!%p388_p2), %v4830_v35  ;;  %v4645_v40 = vld [vmem:[%s5815_s3 + $0x40] sm:$0xff] (!%p388_p2)   ;;  %v1195_v63 = vshrl.u32 (!%p388_p2), %v1194_v62, 7 }
   0x8   : > { %4364 = vmatprep.subr.bf16.mxu0 (!%p388_p2), %v4602_v1  ;;  %v4646_v41 = vld [vmem:[%s5815_s3] sm:$0xff] (!%p388_p2)   ;;  %4148 = vmatprep.subr.bf16.mxu1 (!%p388_p2), %v4645_v40  ;;  %v4647_v42 = vld [vmem:[%s5815_s3 + $0x48] sm:$0xff] (!%p388_p2)   ;;  %v4649_v46 = vld [vmem:[%s5815_s3 + $0x50] sm:$0xff] (!%p388_p2)   ;;  %vm1448_vm12 = vsmask.f32 (!%p388_p2), 3328 }
   0x9   : > { %4149 = vmatpush3.bf16.msra.mxu1 (!%p388_p2), %v4646_v41  ;;  %v4648_v43 = vld [vmem:[%s5815_s3 + $0x8] sm:$0xff] (!%p388_p2)   ;;  %v4650_v47 = vld [vmem:[%s5815_s3 + $0x10] sm:$0xff] (!%p388_p2)   ;;  %v4651_v48 = vld [vmem:[%s5815_s3 + $0x58] sm:$0xff] (!%p388_p2)   ;;  %v1196_v0 = vadd.s32 (!%p388_p2), 8, %v1195_v63  ;;  %vm1449_vm13 = vsmask.f32 (!%p388_p2), 7440 }
   0xa   : > { %4150 = vmatprep.subr.bf16.mxu1 (!%p388_p2), %v4647_v42  ;;  %v4652_v49 = vld [vmem:[%s5815_s3 + $0x18] sm:$0xff] (!%p388_p2)   ;;  %v4653_v52 = vld [vmem:[%s5815_s3 + $0x60] sm:$0xff] (!%p388_p2)   ;;  %v4655_v54 = vld [vmem:[%s5815_s3 + $0x68] sm:$0xff] (!%p388_p2)  }
   0xb   : > { %4365 = vmatpush3.bf16.msra.mxu0 (!%p388_p2), %v4602_v1  ;;  %v4654_v53 = vld [vmem:[%s5815_s3 + $0x20] sm:$0xff] (!%p388_p2)   ;;  %v4656_v55 = vld [vmem:[%s5815_s3 + $0x28] sm:$0xff] (!%p388_p2)   ;;  %v4657_v57 = vld [vmem:[%s5815_s3 + $0x70] sm:$0xff] (!%p388_p2)   ;;  %v5031_v1 = vmul.u32 (!%p388_p2), 2, %v1195_v63 }
   0xc   : > { %4366 = vmatprep.subr.bf16.mxu0 (!%p388_p2), %v4603_v2  ;;  %v4658_v58 = vld [vmem:[%s5815_s3 + $0x30] sm:$0xff] (!%p388_p2)   ;;  %v4659_v59 = vld [vmem:[%s5815_s3 + $0x78] sm:$0xff] (!%p388_p2)   ;;  %v4663_v61 = vld [vmem:[%s5815_s3 + $0xc0] sm:$0xff] (!%p388_p2)  }
   0xd   : > { %s5837_s26 = smov (!%p431_p3, %s3782_s26), 1  ;;  %4151 = vmatpush3.bf16.msra.mxu1 %v4648_v43  ;;  %v4660_v60 = vld [vmem:[%s5815_s3 + $0x38] sm:$0xff]   ;;  %vm1199_vm0 = vcmp.ge.s32.totalorder %v5031_v1, 1  ;;  %vm1201_vm1 = vcmp.le.s32.totalorder %v5031_v1, 16  ;;  %vm5252_vm14 = vmor %vm1448_vm12, %vm1449_vm13 }
   0xe   : > { %s4586_s16 = smul.u32 288, %s5837_s26  ;;  %4152 = vmatprep.subr.bf16.mxu1 %v4649_v46  ;;  %vm5045_vm4 = vmand %vm1199_vm0, %vm1201_vm1  ;;  %s4033_s30 = sshll.u32 %s5837_s26, 5 }
   0xf   : > { %4367 = vmatpush3.bf16.msra.mxu0 %v4603_v2  ;;  %v5033_v2 = vmul.u32 2, %v1196_v0  ;;  %s440_s15 = scalar_lea.vmem %s5825_s13, %s4033_s30 }
  0x10   : > { %s4927_s19 = scalar_lea.vmem %s5812_s0, %s4586_s16  ;;  %4368 = vmatprep.subr.bf16.mxu0 %v4604_v3 }
  0x11   : > { %v4609_v4 = vld [vmem:[%s4927_s19] sm:$0xff]   ;;  %v4610_v9 = vld [vmem:[%s4927_s19 + $0x8] sm:$0xff]   ;;  %v4611_v10 = vld [vmem:[%s4927_s19 + $0x10] sm:$0xff]   ;;  %4153 = vmatpush3.bf16.msra.mxu1 %v4650_v47  ;;  %vm1200_vm2 = vcmp.ge.s32.totalorder %v5033_v2, 1  ;;  %vm1202_vm3 = vcmp.le.s32.totalorder %v5033_v2, 16 }
  0x12   : > { %4378 = vmatprep.mubr.bf16.mxu0 %v4609_v4  ;;  %v4612_v11 = vld [vmem:[%s4927_s19 + $0x18] sm:$0xff]   ;;  %v4613_v12 = vld [vmem:[%s4927_s19 + $0x20] sm:$0xff]   ;;  %v4614_v13 = vld [vmem:[%s4927_s19 + $0x28] sm:$0xff]   ;;  %4154 = vmatprep.subr.bf16.mxu1 %v4651_v48 }
  0x13   : > { %4369 = vmatpush3.bf16.msra.mxu0 %v4604_v3  ;;  %v4615_v14 = vld [vmem:[%s4927_s19 + $0x30] sm:$0xff]   ;;  %v4616_v15 = vld [vmem:[%s4927_s19 + $0x38] sm:$0xff]   ;;  %v4617_v16 = vld [vmem:[%s4927_s19 + $0x40] sm:$0xff]  }
  0x14   : > { %4370 = vmatprep.subr.bf16.mxu0 %v4605_v5  ;;  %v4618_v17 = vld [vmem:[%s4927_s19 + $0x48] sm:$0xff]   ;;  %v4619_v18 = vld [vmem:[%s4927_s19 + $0x50] sm:$0xff]   ;;  %v4620_v19 = vld [vmem:[%s4927_s19 + $0x58] sm:$0xff]  }
  0x15   : > { %v4621_v20 = vld [vmem:[%s4927_s19 + $0x60] sm:$0xff]   ;;  %v4622_v21 = vld [vmem:[%s4927_s19 + $0x68] sm:$0xff]   ;;  %v4623_v22 = vld [vmem:[%s4927_s19 + $0x70] sm:$0xff]   ;;  %4155 = vmatpush3.bf16.msra.mxu1 %v4652_v49 }
  0x16   : > { %v4624_v23 = vld [vmem:[%s4927_s19 + $0x78] sm:$0xff]   ;;  %v4625_v24 = vld [vmem:[%s4927_s19 + $0x80] sm:$0xff]   ;;  %v4626_v25 = vld [vmem:[%s4927_s19 + $0x88] sm:$0xff]   ;;  %4156 = vmatprep.subr.bf16.mxu1 %v4653_v52 }
  0x17   : > { %4371 = vmatpush3.bf16.msra.mxu0 %v4605_v5  ;;  %v4627_v26 = vld [vmem:[%s4927_s19 + $0x90] sm:$0xff]   ;;  %v4628_v27 = vld [vmem:[%s4927_s19 + $0x98] sm:$0xff]   ;;  %v4629_v28 = vld [vmem:[%s4927_s19 + $0xa0] sm:$0xff]  }
  0x18   : > { %4372 = vmatprep.subr.bf16.mxu0 %v4606_v6  ;;  %v4630_v29 = vld [vmem:[%s4927_s19 + $0xa8] sm:$0xff]   ;;  %v4631_v30 = vld [vmem:[%s4927_s19 + $0xb0] sm:$0xff]   ;;  %v4632_v31 = vld [vmem:[%s4927_s19 + $0xb8] sm:$0xff]  }
  0x19   : > { %v4633_v32 = vld [vmem:[%s4927_s19 + $0xc0] sm:$0xff]   ;;  %v4634_v33 = vld [vmem:[%s4927_s19 + $0xc8] sm:$0xff]   ;;  %v4635_v34 = vld [vmem:[%s4927_s19 + $0xd0] sm:$0xff]   ;;  %4157 = vmatpush3.bf16.msra.mxu1 %v4654_v53 }
  0x1a   : > { %v4636_v36 = vld [vmem:[%s4927_s19 + $0xd8] sm:$0xff]   ;;  %v4637_v37 = vld [vmem:[%s4927_s19 + $0xe0] sm:$0xff]   ;;  %v4638_v38 = vld [vmem:[%s4927_s19 + $0xe8] sm:$0xff]   ;;  %4158 = vmatprep.subr.bf16.mxu1 %v4655_v54 }
  0x1b   : > { %4373 = vmatpush3.bf16.msra.mxu0 %v4606_v6  ;;  %v4639_v39 = vld [vmem:[%s4927_s19 + $0xf0] sm:$0xff]   ;;  %v4640_v44 = vld [vmem:[%s4927_s19 + $0xf8] sm:$0xff]   ;;  %v4641_v45 = vld [vmem:[%s4927_s19 + $0x100] sm:$0xff]  }
  0x1c   : > { %4374 = vmatprep.subr.bf16.mxu0 %v4607_v7  ;;  %v4642_v50 = vld [vmem:[%s4927_s19 + $0x108] sm:$0xff]   ;;  %v4643_v51 = vld [vmem:[%s4927_s19 + $0x110] sm:$0xff]   ;;  %v4644_v56 = vld [vmem:[%s4927_s19 + $0x118] sm:$0xff]  }
  0x1d   : > { %4159 = vmatpush3.bf16.msra.mxu1 %v4656_v55  ;;  %v5038_v3 = vld [vmem:[%s5814_s2] ss:$0 sm:$0xff]  ;;  %vm5050_vm5 = vmand %vm1200_vm2, %vm1202_vm3 }
  0x1e   : > { %4160 = vmatprep.subr.bf16.mxu1 %v4657_v57 }
  0x1f   : > { %4375 = vmatpush3.bf16.msra.mxu0 %v4607_v7 }
  0x20   : > { %4376 = vmatprep.subr.bf16.mxu0 %v4608_v8 }
  0x21   : > { %4161 = vmatpush3.bf16.msra.mxu1 %v4658_v58 }
  0x22   : > { %4162 = vmatprep.subr.bf16.mxu1 %v4659_v59 }
  0x23   : > { %4377 = vmatpush3.bf16.msra.mxu0 %v4608_v8 }
  0x25   : > { %4163 = vmatpush3.bf16.msra.mxu1 %v4660_v60 }
  0x26   : > { %4379 = vmatmul.mubr.bf16.vlgmr.msra.gmra.mrb[0].mxu0 %v4610_v9  ;;  %4188 = vmatprep.subr.bf16.mxu1 %v4663_v61 }
  0x27   : > { %4382 = vmatprep.mubr.bf16.mxu0 %v4611_v10 }
  0x2e   : > { %4383 = vmatmul.mubr.bf16.gmra.mrb[4].mxu0 %v4612_v11 }
  0x2f   : > { %4386 = vmatprep.mubr.bf16.mxu0 %v4613_v12 }
  0x36   : > { %4387 = vmatmul.mubr.bf16.gmra.mrb[8].mxu0 %v4614_v13 }
  0x37   : > { %4390 = vmatprep.mubr.bf16.mxu0 %v4615_v14 }
  0x3e   : > { %4391 = vmatmul.mubr.bf16.gmra.mrb[12].mxu0 %v4616_v15 }
  0x3f   : > { %4394 = vmatprep.mubr.bf16.mxu0 %v4617_v16 }
  0x46   : > { %4395 = vmatmul.mubr.bf16.gmra.mrb[16].mxu0 %v4618_v17 }
  0x47   : > { %4398 = vmatprep.mubr.bf16.mxu0 %v4619_v18 }
  0x4e   : > { %4399 = vmatmul.mubr.bf16.gmra.mrb[20].mxu0 %v4620_v19 }
  0x4f   : > { %4402 = vmatprep.mubr.bf16.mxu0 %v4621_v20 }
  0x56   : > { %4403 = vmatmul.mubr.bf16.gmra.mrb[24].mxu0 %v4622_v21 }
  0x57   : > { %4406 = vmatprep.mubr.bf16.mxu0 %v4623_v22 }
  0x5e   : > { %4407 = vmatmul.mubr.bf16.gmra.mrb[28].mxu0 %v4624_v23 }
  0x5f   : > { %4410 = vmatprep.mubr.bf16.mxu0 %v4625_v24 }
  0x66   : > { %4411 = vmatmul.mubr.bf16.gmra.mrb[32].mxu0 %v4626_v25 }
  0x67   : > { %4414 = vmatprep.mubr.bf16.mxu0 %v4627_v26 }
  0x6e   : > { %4415 = vmatmul.mubr.bf16.gmra.mrb[36].mxu0 %v4628_v27 }
  0x6f   : > { %4418 = vmatprep.mubr.bf16.mxu0 %v4629_v28 }
  0x76   : > { %4419 = vmatmul.mubr.bf16.gmra.mrb[40].mxu0 %v4630_v29 }
  0x77   : > { %4422 = vmatprep.mubr.bf16.mxu0 %v4631_v30 }
  0x7e   : > { %4423 = vmatmul.mubr.bf16.gmra.mrb[44].mxu0 %v4632_v31 }
  0x7f   : > { %4426 = vmatprep.mubr.bf16.mxu0 %v4633_v32 }
  0x86   : > { %4427 = vmatmul.mubr.bf16.gmra.mrb[48].mxu0 %v4634_v33 }
  0x87   : > { %4430 = vmatprep.mubr.bf16.mxu0 %v4635_v34 }
  0x8e   : > { %4431 = vmatmul.mubr.bf16.gmra.mrb[52].mxu0 %v4636_v36 }
  0x8f   : > { %4434 = vmatprep.mubr.bf16.mxu0 %v4637_v37 }
  0x96   : > { %4435 = vmatmul.mubr.bf16.gmra.mrb[56].mxu0 %v4638_v38 }
  0x97   : > { %4438 = vmatprep.mubr.bf16.mxu0 %v4639_v39 }
  0x9e   : > { %4439 = vmatmul.mubr.bf16.gmra.mrb[60].mxu0 %v4640_v44 }
  0x9f   : > { %4442 = vmatprep.mubr.bf16.mxu0 %v4641_v45 }
  0xa6   : > { %4443 = vmatmul.mubr.bf16.gmra.mrb[64].mxu0 %v4642_v50 }
  0xa7   : > { %4446 = vmatprep.mubr.bf16.mxu0 %v4643_v51 }
  0xae   : > { %4447 = vmatmul.mubr.bf16.gmra.mrb[68].mxu0 %v4644_v56 }
  0xf9   : > { %v4380_v4 = vpop.f32.mrb[0].mxu0 }
  0xfa   : > { %v844_v5 = vadd.f32 %v4380_v4, %v5038_v3  ;;  %v835_v6 = vpop.f32.mrb[1].mxu0 }
  0xfb   : > { %v4381_v7 = vpop.f32.mrb[2].mxu0 }
  0xfc   : > { %v1124_v8 = vmax.f32 %v844_v5, 0.0  ;;  %v847_v10 = vadd.f32 %v4381_v7, %v5038_v3  ;;  %v838_v11 = vpop.f32.mrb[3].mxu0 }
  0xfe   : > { %v1125_v13 = vmax.f32 %v847_v10, 0.0  ;;  %v1219_v14 = vsel %vm5045_vm4, %v1124_v8, 0.0 }
 0x100   : > { %v1220_v15 = vsel %vm5050_vm5, %v1125_v13, 0.0 }
 0x101   : > { %v1236_v16 = vpack.c.bf16 %v1220_v15, %v1219_v14  ;;  %v4384_v17 = vpop.f32.mrb[4].mxu0 }
 0x102   : > { %v860_v18 = vadd.f32 %v4384_v17, %v5038_v3  ;;  %v851_v19 = vpop.f32.mrb[5].mxu0 }
 0x103   : > { %1245 = vst [vmem:[#allocation2 + $0x8] sm:$0xff] %v1236_v16  ;;  %v852_v20 = vadd.f32 %v5038_v3, %v851_v19  ;;  %v4385_v21 = vpop.f32.mrb[6].mxu0  ;;  %v1253_v19 = vadd.s32 1, %v5031_v1 }
 0x104   : > { %v1128_v22 = vmax.f32 %v860_v18, 0.0  ;;  %v863_v23 = vadd.f32 %v4385_v21, %v5038_v3  ;;  %v854_v24 = vpop.f32.mrb[7].mxu0 }
 0x105   : > { %v1126_v25 = vmax.f32 %v852_v20, 0.0  ;;  %v855_v26 = vadd.f32 %v5038_v3, %v854_v24  ;;  %v1254_v20 = vadd.s32 1, %v5033_v2  ;;  %vm1255_vm6 = vcmp.ge.s32.totalorder %v1253_v19, 1 }
 0x106   : > { %v1129_v27 = vmax.f32 %v863_v23, 0.0  ;;  %v1223_v29 = vsel %vm5045_vm4, %v1128_v22, 0.0  ;;  %vm1257_vm7 = vcmp.le.s32.totalorder %v1253_v19, 16 }
 0x107   : > { %v1127_v28 = vmax.f32 %v855_v26, 0.0  ;;  %v1221_v31 = vsel %vm5045_vm4, %v1126_v25, 0.0  ;;  %vm1256_vm8 = vcmp.ge.s32.totalorder %v1254_v20, 1  ;;  %vm1258_vm9 = vcmp.le.s32.totalorder %v1254_v20, 16  ;;  %vm5104_vm10 = vmand %vm1255_vm6, %vm1257_vm7 }
 0x108   : > { %v1224_v30 = vsel %vm5050_vm5, %v1129_v27, 0.0  ;;  %vm5111_vm11 = vmand %vm1256_vm8, %vm1258_vm9 }
 0x109   : > { %v1238_v32 = vpack.c.bf16 %v1224_v30, %v1223_v29  ;;  %v1222_v33 = vsel %vm5050_vm5, %v1127_v28, 0.0  ;;  %v4388_v34 = vpop.f32.mrb[8].mxu0  ;;  %v4750_v29 = vld [vmem:[%s5815_s3 + $0x1e8] sm:$0xff]  }
 0x10a   : > { %v1237_v35 = vpack.c.bf16 %v1222_v33, %v1221_v31  ;;  %v876_v36 = vadd.f32 %v4388_v34, %v5038_v3  ;;  %v867_v37 = vpop.f32.mrb[9].mxu0 }
 0x10b   : > { %1247 = vst [vmem:[#allocation2 + $0x18] sm:$0xff] %v1238_v32  ;;  %v868_v38 = vadd.f32 %v5038_v3, %v867_v37  ;;  %v4389_v39 = vpop.f32.mrb[10].mxu0  ;;  %v5109_v32 = vld [vmem:[#allocation2] sm:$0x1f] }
 0x10c   : > { %1246 = vst [vmem:[#allocation2 + $0x10] sm:$0xff] %v1237_v35  ;;  %v1132_v40 = vmax.f32 %v876_v36, 0.0  ;;  %v879_v41 = vadd.f32 %v4389_v39, %v5038_v3  ;;  %v870_v42 = vpop.f32.mrb[11].mxu0  ;;  %v3836_v19 = vcombine.high %v5109_v32, %v5109_v32 }
 0x10d   : > { %v1130_v43 = vmax.f32 %v868_v38, 0.0  ;;  %v871_v44 = vadd.f32 %v5038_v3, %v870_v42  ;;  %v3835_v38 = vcombine.low %v5109_v32, %v5109_v32 }
 0x10e   : > { %v1133_v45 = vmax.f32 %v879_v41, 0.0  ;;  %v1227_v47 = vsel %vm5045_vm4, %v1132_v40, 0.0 }
 0x10f   : > { %v1131_v46 = vmax.f32 %v871_v44, 0.0  ;;  %v1225_v49 = vsel %vm5045_vm4, %v1130_v43, 0.0 }
 0x110   : > { %v1228_v48 = vsel %vm5050_vm5, %v1133_v45, 0.0 }
 0x111   : > { %v1240_v50 = vpack.c.bf16 %v1228_v48, %v1227_v47  ;;  %v1226_v51 = vsel %vm5050_vm5, %v1131_v46, 0.0  ;;  %v4392_v52 = vpop.f32.mrb[12].mxu0 }
 0x112   : > { %v1239_v53 = vpack.c.bf16 %v1226_v51, %v1225_v49  ;;  %v892_v54 = vadd.f32 %v4392_v52, %v5038_v3  ;;  %v883_v55 = vpop.f32.mrb[13].mxu0  ;;  %v1455_v51 = vshll.u32 %v3835_v38, 16 }
 0x113   : > { %1249 = vst [vmem:[#allocation2 + $0x28] sm:$0xff] %v1240_v50  ;;  %v884_v56 = vadd.f32 %v5038_v3, %v883_v55  ;;  %v4393_v57 = vpop.f32.mrb[14].mxu0  ;;  %v1452_v50 = vshrl.u32 %v3835_v38, 16  ;;  %v4669_v38 = vld [vmem:[%s5815_s3 + $0xd0] sm:$0xff]  }
 0x114   : > { %1248 = vst [vmem:[#allocation2 + $0x20] sm:$0xff] %v1239_v53  ;;  %v1136_v58 = vmax.f32 %v892_v54, 0.0  ;;  %v895_v59 = vadd.f32 %v4393_v57, %v5038_v3  ;;  %v886_v60 = vpop.f32.mrb[15].mxu0 }
 0x115   : > { %v1134_v61 = vmax.f32 %v884_v56, 0.0  ;;  %v887_v62 = vadd.f32 %v5038_v3, %v886_v60  ;;  %v1457_v60 = vrot.slane %v1455_v51, 5 }
 0x116   : > { %v1137_v63 = vmax.f32 %v895_v59, 0.0  ;;  %v1231_v4 = vsel %vm5045_vm4, %v1136_v58, 0.0  ;;  %v1454_v59 = vrot.slane %v1452_v50, 4  ;;  %v4671_v50 = vld [vmem:[%s5815_s3 + $0xd8] sm:$0xff]  }
 0x117   : > { %v1135_v0 = vmax.f32 %v887_v62, 0.0  ;;  %v1229_v6 = vsel %vm5045_vm4, %v1134_v61, 0.0 }
 0x118   : > { %v1232_v5 = vsel %vm5050_vm5, %v1137_v63, 0.0  ;;  %v5134_v63 = vld [vmem:[#allocation2 + $0x8] sm:$0x1f] }
 0x119   : > { %v1242_v7 = vpack.c.bf16 %v1232_v5, %v1231_v4  ;;  %v1230_v8 = vsel %vm5050_vm5, %v1135_v0, 0.0  ;;  %v4396_v10 = vpop.f32.mrb[16].mxu0  ;;  %v5136_v0 = vld [vmem:[#allocation2 + $0x18] sm:$0x1f]  ;;  %v3837_v20 = vcombine.low %v5134_v63, %v5134_v63 }
 0x11a   : > { %v1241_v11 = vpack.c.bf16 %v1230_v8, %v1229_v6  ;;  %v899_v13 = vpop.f32.mrb[17].mxu0  ;;  %v5142_v8 = vld [vmem:[#allocation2 + $0x10] sm:$0x1f] }
 0x11b   : > { %1251 = vst [vmem:[#allocation2 + $0x38] sm:$0xff] %v1242_v7  ;;  %v900_v14 = vadd.f32 %v5038_v3, %v899_v13  ;;  %v4397_v15 = vpop.f32.mrb[18].mxu0 }
 0x11c   : > { %1250 = vst [vmem:[#allocation2 + $0x30] sm:$0xff] %v1241_v11  ;;  %v902_v16 = vpop.f32.mrb[19].mxu0 }
 0x11d   : > { %v1138_v17 = vmax.f32 %v900_v14, 0.0  ;;  %v903_v18 = vadd.f32 %v5038_v3, %v902_v16  ;;  %v4664_v14 = vld [vmem:[%s5815_s3 + $0x80] sm:$0xff]  }
 0x11f   : > { %v1139_v21 = vmax.f32 %v903_v18, 0.0  ;;  %v1233_v22 = vsel %vm5045_vm4, %v1138_v17, 0.0  ;;  %v4665_v18 = vld [vmem:[%s5815_s3 + $0xc8] sm:$0xff]  }
 0x121   : > { %v1234_v23 = vsel %vm5050_vm5, %v1139_v21, 0.0  ;;  %v4400_v24 = vpop.f32.mrb[20].mxu0  ;;  %v1458_v21 = vor.u32 %v1457_v60, %v1454_v59  ;;  %v4668_v59 = vld [vmem:[#allocation2 + $0x10] ss:$8 sps:$4 sm:$0xff]   ;;  %v3838_v60 = vcombine.high %v5134_v63, %v5134_v63 }
 0x122   : > { %v1243_v25 = vpack.c.bf16 %v1234_v23, %v1233_v22  ;;  %v924_v26 = vadd.f32 %v4400_v24, %v5038_v3  ;;  %v915_v27 = vpop.f32.mrb[21].mxu0 }
 0x123   : > { %v916_v1 = vadd.f32 %v5038_v3, %v915_v27  ;;  %v4401_v28 = vpop.f32.mrb[22].mxu0  ;;  %v5165_v32 = vrot.slane %v1458_v21, 4 }
 0x124   : > { %1252 = vst [vmem:[#allocation2 + $0x40] sm:$0xff] %v1243_v25  ;;  %v1144_v2 = vmax.f32 %v924_v26, 0.0  ;;  %v927_v30 = vadd.f32 %v4401_v28, %v5038_v3  ;;  %v918_v31 = vpop.f32.mrb[23].mxu0  ;;  %v4662_v25 = vld [vmem:[#allocation2] ss:$8 sps:$4 sm:$0xff]   ;;  %v3841_v26 = vcombine.low %v5136_v0, %v5136_v0  ;;  %v3839_v28 = vcombine.low %v5142_v8, %v5142_v8 }
 0x125   : > { %v1142_v33 = vmax.f32 %v916_v1, 0.0  ;;  %v919_v35 = vadd.f32 %v5038_v3, %v918_v31  ;;  %v4666_v31 = vld [vmem:[%s5815_s3 + $0x88] sm:$0xff]  }
 0x126   : > { %v1145_v36 = vmax.f32 %v927_v30, 0.0  ;;  %v1277_v39 = vsel %vm5104_vm10, %v1144_v2, 0.0  ;;  %v1483_v51 = vshll.u32 %v3839_v28, 16 }
 0x127   : > { %v1143_v37 = vmax.f32 %v919_v35, 0.0  ;;  %v1275_v41 = vsel %vm5104_vm10, %v1142_v33, 0.0  ;;  %v5167_v33 = vshll.u32 %v3836_v19, 16  ;;  %v1466_v35 = vshrl.u32 %v3837_v20, 16 }
 0x128   : > { %v1278_v40 = vsel %vm5111_vm11, %v1145_v36, 0.0 }
 0x129   : > { %v1293_v42 = vpack.c.bf16 %v1278_v40, %v1277_v39  ;;  %v1276_v43 = vsel %vm5111_vm11, %v1143_v37, 0.0  ;;  %v4404_v44 = vpop.f32.mrb[24].mxu0  ;;  %v1469_v39 = vshll.u32 %v3837_v20, 16  ;;  %v1494_v40 = vshrl.u32 %v3841_v26, 16 }
 0x12a   : > { %v1292_v45 = vpack.c.bf16 %v1276_v43, %v1275_v41  ;;  %v940_v46 = vadd.f32 %v4404_v44, %v5038_v3  ;;  %v931_v47 = vpop.f32.mrb[25].mxu0 }
 0x12b   : > { %1303 = vst [vmem:[#allocation2 + $0x58] sm:$0xff] %v1293_v42  ;;  %v932_v48 = vadd.f32 %v5038_v3, %v931_v47  ;;  %v4405_v49 = vpop.f32.mrb[26].mxu0 }
 0x12c   : > { %1302 = vst [vmem:[#allocation2 + $0x50] sm:$0xff] %v1292_v45  ;;  %v1148_v52 = vmax.f32 %v940_v46, 0.0  ;;  %v943_v53 = vadd.f32 %v4405_v49, %v5038_v3  ;;  %v934_v54 = vpop.f32.mrb[27].mxu0  ;;  %v4670_v45 = vld [vmem:[%s5815_s3 + $0x90] sm:$0xff]   ;;  %v1480_v46 = vshrl.u32 %v3839_v28, 16 }
 0x12d   : > { %v1146_v55 = vmax.f32 %v932_v48, 0.0  ;;  %v935_v56 = vadd.f32 %v5038_v3, %v934_v54 }
 0x12e   : > { %v1149_v57 = vmax.f32 %v943_v53, 0.0  ;;  %v1281_v61 = vsel %vm5104_vm10, %v1148_v52, 0.0 }
 0x12f   : > { %v1147_v58 = vmax.f32 %v935_v56, 0.0  ;;  %v1279_v4 = vsel %vm5104_vm10, %v1146_v55, 0.0  ;;  %v1497_v55 = vshll.u32 %v3841_v26, 16  ;;  %v5218_v26 = vshll.u32 %v3838_v60, 16 }
 0x130   : > { %v1282_v62 = vsel %vm5111_vm11, %v1149_v57, 0.0 }
 0x131   : > { %v1295_v5 = vpack.c.bf16 %v1282_v62, %v1281_v61  ;;  %v1280_v6 = vsel %vm5111_vm11, %v1147_v58, 0.0  ;;  %v4408_v7 = vpop.f32.mrb[28].mxu0 }
 0x132   : > { %v1294_v10 = vpack.c.bf16 %v1280_v6, %v1279_v4  ;;  %v956_v11 = vadd.f32 %v4408_v7, %v5038_v3  ;;  %v947_v13 = vpop.f32.mrb[29].mxu0  ;;  %v1468_v4 = vrot.slane %v1466_v35, 4  ;;  %v5192_v6 = vld [vmem:[#allocation2 + $0x20] sm:$0x1f] }
 0x133   : > { %1305 = vst [vmem:[#allocation2 + $0x68] sm:$0xff] %v1295_v5  ;;  %v948_v15 = vadd.f32 %v5038_v3, %v947_v13  ;;  %v4409_v16 = vpop.f32.mrb[30].mxu0  ;;  %v4661_v17 = vld [vmem:[#allocation2 + $0x48] ss:$8 sps:$4 sm:$0xff]   ;;  %v1471_v5 = vrot.slane %v1469_v39, 5  ;;  %v1496_v13 = vrot.slane %v1494_v40, 4  ;;  %v3843_v20 = vcombine.low %v5192_v6, %v5192_v6 }
 0x134   : > { %1304 = vst [vmem:[#allocation2 + $0x60] sm:$0xff] %v1294_v10  ;;  %v1152_v22 = vmax.f32 %v956_v11, 0.0  ;;  %v959_v23 = vadd.f32 %v4409_v16, %v5038_v3  ;;  %v950_v24 = vpop.f32.mrb[31].mxu0  ;;  %2724 = vmatprep.mubr.bf16.mxu1 %v4661_v17  ;;  %v3840_v10 = vcombine.high %v5142_v8, %v5142_v8  ;;  %v3842_v11 = vcombine.high %v5136_v0, %v5136_v0  ;;  %v4675_v0 = vld [vmem:[%s5815_s3 + $0xe0] sm:$0xff]  }
 0x135   : > { %v1150_v27 = vmax.f32 %v948_v15, 0.0  ;;  %v951_v1 = vadd.f32 %v5038_v3, %v950_v24  ;;  %2725 = vmatmul.mubr.bf16.vlgmr.msra.gmra.mrb[0].mxu1 %v4662_v25  ;;  %v1482_v15 = vrot.slane %v1480_v46, 4  ;;  %v1485_v16 = vrot.slane %v1483_v51, 5  ;;  %v4676_v25 = vld [vmem:[%s5815_s3 + $0xa0] sm:$0xff]  }
 0x136   : > { %v1153_v2 = vmax.f32 %v959_v23, 0.0  ;;  %4189 = vmatpush3.bf16.msra.mxu1 %v4664_v14  ;;  %v1285_v36 = vsel %vm5104_vm10, %v1152_v22, 0.0  ;;  %v4672_v14 = vld [vmem:[%s5815_s3 + $0x98] sm:$0xff]   ;;  %v1499_v17 = vrot.slane %v1497_v55, 5  ;;  %v1463_v8 = vrot.slane %v5167_v33, 5 }
 0x137   : > { %v1151_v30 = vmax.f32 %v951_v1, 0.0  ;;  %4190 = vmatprep.subr.bf16.mxu1 %v4665_v18  ;;  %v1283_v41 = vsel %vm5104_vm10, %v1150_v27, 0.0  ;;  %v5220_v27 = vld [vmem:[#allocation2 + $0x28] sm:$0x1f]  ;;  %v1472_v35 = vor.u32 %v1471_v5, %v1468_v4  ;;  %v1486_v40 = vor.u32 %v1485_v16, %v1482_v15  ;;  %v4681_v4 = vld [vmem:[%s5815_s3 + $0xf0] sm:$0xff]   ;;  %v4789_v5 = vld [vmem:[%s5817_s5] sm:$0xff]  }
 0x138   : > { %v1286_v37 = vsel %vm5111_vm11, %v1153_v2, 0.0  ;;  %v1508_v46 = vshrl.u32 %v3843_v20, 16  ;;  %v3844_v51 = vcombine.high %v5192_v6, %v5192_v6  ;;  %v3845_v55 = vcombine.low %v5220_v27, %v5220_v27  ;;  %v5265_v16 = vld [vmem:[#allocation2 + $0x30] sm:$0x1f] }
 0x139   : > { %v1297_v42 = vpack.c.bf16 %v1286_v37, %v1285_v36  ;;  %v1284_v43 = vsel %vm5111_vm11, %v1151_v30, 0.0  ;;  %v4412_v44 = vpop.f32.mrb[32].mxu0  ;;  %v4674_v30 = vld [vmem:[#allocation2 + $0x20] ss:$8 sps:$4 sm:$0xff]   ;;  %v5226_v36 = vshll.u32 %v3840_v10, 16  ;;  %v5286_v33 = vcombine.low %v5265_v16, %v5265_v16 }
 0x13a   : > { %v1296_v47 = vpack.c.bf16 %v1284_v43, %v1283_v41  ;;  %v972_v48 = vadd.f32 %v4412_v44, %v5038_v3  ;;  %v963_v49 = vpop.f32.mrb[33].mxu0  ;;  %4191 = vmatpush3.bf16.msra.mxu1 %v4666_v31  ;;  %v4677_v31 = vld [vmem:[%s5815_s3 + $0xe8] sm:$0xff]   ;;  %v1500_v41 = vor.u32 %v1499_v17, %v1496_v13  ;;  %v1510_v6 = vrot.slane %v1508_v46, 4 }
 0x13b   : > { %1307 = vst [vmem:[#allocation2 + $0x78] sm:$0xff] %v1297_v42  ;;  %v964_v52 = vadd.f32 %v5038_v3, %v963_v49  ;;  %v4413_v53 = vpop.f32.mrb[34].mxu0  ;;  %v4667_v54 = vld [vmem:[#allocation2 + $0x58] ss:$8 sps:$4 sm:$0xff]   ;;  %4192 = vmatprep.subr.bf16.mxu1 %v4669_v38  ;;  %v5229_v42 = vshll.u32 %v3842_v11, 16  ;;  %v5263_v15 = vshll.u32 %v3844_v51, 16 }
 0x13c   : > { %1306 = vst [vmem:[#allocation2 + $0x70] sm:$0xff] %v1296_v47  ;;  %v1156_v56 = vmax.f32 %v972_v48, 0.0  ;;  %v975_v57 = vadd.f32 %v4413_v53, %v5038_v3  ;;  %v966_v58 = vpop.f32.mrb[35].mxu0  ;;  %2732 = vmatprep.mubr.bf16.mxu1 %v4667_v54  ;;  %v1511_v47 = vshll.u32 %v3843_v20, 16  ;;  %v1473_v53 = vrot.slane %v1472_v35, 4 }
 0x13d   : > { %v1154_v61 = vmax.f32 %v964_v52, 0.0  ;;  %v967_v62 = vadd.f32 %v5038_v3, %v966_v58  ;;  %2733 = vmatmul.mubr.bf16.gmra.mrb[4].mxu1 %v4668_v59  ;;  %v1491_v54 = vrot.slane %v5226_v36, 5  ;;  %v1487_v58 = vrot.slane %v1486_v40, 4 }
 0x13e   : > { %v1157_v7 = vmax.f32 %v975_v57, 0.0  ;;  %4193 = vmatpush3.bf16.msra.mxu1 %v4670_v45  ;;  %v1289_v18 = vsel %vm5104_vm10, %v1156_v56, 0.0  ;;  %v4678_v57 = vld [vmem:[%s5815_s3 + $0xa8] sm:$0xff]   ;;  %v1501_v59 = vrot.slane %v1500_v41, 4  ;;  %v1505_v60 = vrot.slane %v5229_v42, 5  ;;  %v4684_v42 = vld [vmem:[%s5815_s3 + $0xb8] sm:$0xff]  }
 0x13f   : > { %v1155_v63 = vmax.f32 %v967_v62, 0.0  ;;  %4194 = vmatprep.subr.bf16.mxu1 %v4671_v50  ;;  %v1287_v21 = vsel %vm5104_vm10, %v1154_v61, 0.0  ;;  %v1477_v50 = vrot.slane %v5218_v26, 5  ;;  %v1522_v20 = vshrl.u32 %v3845_v55, 16 }
 0x140   : > { %v1290_v19 = vsel %vm5111_vm11, %v1157_v7, 0.0  ;;  %v1513_v7 = vrot.slane %v1511_v47, 5  ;;  %v3846_v26 = vcombine.high %v5220_v27, %v5220_v27  ;;  %v5293_v27 = vsel %vm5252_vm14, %v1487_v58, %v1491_v54 }
 0x141   : > { %v1299_v22 = vpack.c.bf16 %v1290_v19, %v1289_v18  ;;  %v1288_v23 = vsel %vm5111_vm11, %v1155_v63, 0.0  ;;  %v4416_v24 = vpop.f32.mrb[36].mxu0 }
 0x142   : > { %v1298_v1 = vpack.c.bf16 %v1288_v23, %v1287_v21  ;;  %v988_v28 = vadd.f32 %v4416_v24, %v5038_v3  ;;  %v979_v2 = vpop.f32.mrb[37].mxu0  ;;  %4195 = vmatpush3.bf16.msra.mxu1 %v4672_v14  ;;  %v4682_v14 = vld [vmem:[%s5815_s3 + $0xb0] sm:$0xff]   ;;  %v5271_v21 = vld [vmem:[#allocation2 + $0x38] sm:$0x1f]  ;;  %v1514_v35 = vor.u32 %v1513_v7, %v1510_v6 }
 0x143   : > { %1309 = vst [vmem:[#allocation2 + $0x88] sm:$0xff] %v1299_v22  ;;  %v980_v37 = vadd.f32 %v5038_v3, %v979_v2  ;;  %v4417_v38 = vpop.f32.mrb[38].mxu0  ;;  %v4673_v39 = vld [vmem:[#allocation2 + $0x68] ss:$8 sps:$4 sm:$0xff]   ;;  %4196 = vmatprep.subr.bf16.mxu1 %v4675_v0  ;;  %v4683_v0 = vld [vmem:[%s5815_s3 + $0xf8] sm:$0xff]   ;;  %v3849_v40 = vcombine.low %v5271_v21, %v5271_v21 }
 0x144   : > { %1308 = vst [vmem:[#allocation2 + $0x80] sm:$0xff] %v1298_v1  ;;  %v1160_v43 = vmax.f32 %v988_v28, 0.0  ;;  %v991_v44 = vadd.f32 %v4417_v38, %v5038_v3  ;;  %v982_v45 = vpop.f32.mrb[39].mxu0  ;;  %2740 = vmatprep.mubr.bf16.mxu1 %v4673_v39  ;;  %v1525_v1 = vshll.u32 %v3845_v55, 16  ;;  %v5297_v38 = vsel %vm5252_vm14, %v1501_v59, %v1505_v60  ;;  %v4696_v55 = vld [vmem:[%s5815_s3 + $0x100] sm:$0xff]  }
 0x145   : > { %v1158_v48 = vmax.f32 %v980_v37, 0.0  ;;  %v983_v49 = vadd.f32 %v5038_v3, %v982_v45  ;;  %2741 = vmatmul.mubr.bf16.gmra.mrb[8].mxu1 %v4674_v30  ;;  %v1519_v39 = vrot.slane %v5263_v15, 5  ;;  %v5305_v45 = vshll.u32 %v3846_v26, 16 }
 0x146   : > { %v1161_v52 = vmax.f32 %v991_v44, 0.0  ;;  %4197 = vmatpush3.bf16.msra.mxu1 %v4676_v25  ;;  %v1312_v61 = vsel %vm5045_vm4, %v1160_v43, 0.0  ;;  %v5279_v25 = vsel %vm5252_vm14, %v5165_v32, %v1463_v8  ;;  %v1478_v8 = vsel %vm5252_vm14, %v1473_v53, %v1477_v50 }
 0x147   : > { %v1159_v56 = vmax.f32 %v983_v49, 0.0  ;;  %4198 = vmatprep.subr.bf16.mxu1 %v4677_v31  ;;  %v1310_v10 = vsel %vm5045_vm4, %v1158_v48, 0.0  ;;  %v4680_v31 = vld [vmem:[#allocation2 + $0x30] ss:$8 sps:$4 sm:$0xff]   ;;  %v1524_v43 = vrot.slane %v1522_v20, 4  ;;  %v1527_v44 = vrot.slane %v1525_v1, 5 }
 0x148   : > { %v1313_v62 = vsel %vm5050_vm5, %v1161_v52, 0.0  ;;  %v4691_v48 = vld [vmem:[%s5815_s3 + $0x140] sm:$0xff]   ;;  %v1515_v49 = vrot.slane %v1514_v35, 4  ;;  %v1536_v50 = vshrl.u32 %v5286_v33, 16  ;;  %v3891_v60 = vcombine.low %v5279_v25, %v1478_v8  ;;  %v4700_v8 = vld [vmem:[%s5815_s3 + $0x150] sm:$0xff]  }
 0x149   : > { %v1329_v11 = vpack.c.bf16 %v1313_v62, %v1312_v61  ;;  %v1311_v13 = vsel %vm5050_vm5, %v1159_v56, 0.0  ;;  %v4420_v63 = vpop.f32.mrb[40].mxu0  ;;  %v1539_v56 = vshll.u32 %v5286_v33, 16  ;;  %v1550_v61 = vshrl.u32 %v3849_v40, 16 }
 0x14a   : > { %v1328_v17 = vpack.c.bf16 %v1311_v13, %v1310_v10  ;;  %v1004_v18 = vadd.f32 %v4420_v63, %v5038_v3  ;;  %v995_v19 = vpop.f32.mrb[41].mxu0  ;;  %4199 = vmatpush3.bf16.msra.mxu1 %v4678_v57  ;;  %v3892_v10 = vcombine.low %v5293_v27, %v5297_v38  ;;  %v1553_v13 = vshll.u32 %v3849_v40, 16  ;;  %v4709_v38 = vld [vmem:[%s5815_s3 + $0x160] sm:$0xff]  }
 0x14b   : > { %1339 = vst [vmem:[#allocation2 + $0x98] sm:$0xff] %v1329_v11  ;;  %v996_v22 = vadd.f32 %v5038_v3, %v995_v19  ;;  %v4421_v23 = vpop.f32.mrb[42].mxu0  ;;  %v4679_v24 = vld [vmem:[#allocation2 + $0x78] ss:$8 sps:$4 sm:$0xff]   ;;  %4200 = vmatprep.subr.bf16.mxu1 %v4681_v4  ;;  %v3850_v11 = vcombine.high %v5271_v21, %v5271_v21  ;;  %v1533_v19 = vrot.slane %v5305_v45, 5  ;;  %v3848_v26 = vcombine.high %v5265_v16, %v5265_v16 }
 0x14c   : > { %1338 = vst [vmem:[#allocation2 + $0x90] sm:$0xff] %v1328_v17  ;;  %v1164_v28 = vmax.f32 %v1004_v18, 0.0  ;;  %v1007_v2 = vadd.f32 %v4421_v23, %v5038_v3  ;;  %v998_v30 = vpop.f32.mrb[43].mxu0  ;;  %2748 = vmatprep.mubr.bf16.mxu1 %v4679_v24  ;;  %v4697_v17 = vld [vmem:[%s5815_s3 + $0x148] sm:$0xff]   ;;  %v1528_v18 = vor.u32 %v1527_v44, %v1524_v43  ;;  %v5342_v23 = vsel %vm5252_vm14, %v1515_v49, %v1519_v39 }
 0x14d   : > { %v1162_v36 = vmax.f32 %v996_v22, 0.0  ;;  %v999_v32 = vadd.f32 %v5038_v3, %v998_v30  ;;  %2749 = vmatmul.mubr.bf16.gmra.mrb[12].mxu1 %v4680_v31  ;;  %v1538_v1 = vrot.slane %v1536_v50, 4  ;;  %v4698_v30 = vld [vmem:[%s5815_s3 + $0x108] sm:$0xff]   ;;  %v1541_v31 = vrot.slane %v1539_v56, 5 }
 0x14e   : > { %v1165_v37 = vmax.f32 %v1007_v2, 0.0  ;;  %4201 = vmatpush3.bf16.msra.mxu1 %v4682_v14  ;;  %v1316_v46 = vsel %vm5045_vm4, %v1164_v28, 0.0  ;;  %v1552_v35 = vrot.slane %v1550_v61, 4  ;;  %v1555_v33 = vrot.slane %v1553_v13, 5 }
 0x14f   : > { %v1163_v41 = vmax.f32 %v999_v32, 0.0  ;;  %4202 = vmatprep.subr.bf16.mxu1 %v4683_v0  ;;  %v1314_v51 = vsel %vm5045_vm4, %v1162_v36, 0.0 }
 0x150   : > { %v1317_v47 = vsel %vm5050_vm5, %v1165_v37, 0.0  ;;  %v1529_v37 = vrot.slane %v1528_v18, 4 }
 0x151   : > { %v1331_v52 = vpack.c.bf16 %v1317_v47, %v1316_v46  ;;  %v1315_v53 = vsel %vm5050_vm5, %v1163_v41, 0.0  ;;  %v4424_v54 = vpop.f32.mrb[44].mxu0  ;;  %v4705_v47 = vld [vmem:[%s5815_s3 + $0x110] sm:$0xff]  }
 0x152   : > { %v1330_v57 = vpack.c.bf16 %v1315_v53, %v1314_v51  ;;  %v1020_v58 = vadd.f32 %v4424_v54, %v5038_v3  ;;  %v1011_v59 = vpop.f32.mrb[45].mxu0  ;;  %v5325_v62 = vld [vmem:[#allocation2 + $0x98] sm:$0x1f]  ;;  %4203 = vmatpush3.bf16.msra.mxu1 %v4684_v42  ;;  %v1542_v53 = vor.u32 %v1541_v31, %v1538_v1  ;;  %v5369_v54 = vshll.u32 %v3848_v26, 16 }
 0x153   : > { %1341 = vst [vmem:[#allocation2 + $0xa8] sm:$0xff] %v1331_v52  ;;  %v1012_v4 = vadd.f32 %v5038_v3, %v1011_v59  ;;  %v4425_v6 = vpop.f32.mrb[46].mxu0  ;;  %v4685_v7 = vld [vmem:[#allocation2 + $0x90] ss:$8 sps:$4 sm:$0xff]   ;;  %4228 = vmatprep.subr.bf16.mxu1 %v4691_v48  ;;  %v3853_v28 = vcombine.low %v5325_v62, %v5325_v62  ;;  %v1534_v59 = vsel %vm5252_vm14, %v1529_v37, %v1533_v19 }
 0x154   : > { %1340 = vst [vmem:[#allocation2 + $0xa0] sm:$0xff] %v1330_v57  ;;  %v1168_v63 = vmax.f32 %v1020_v58, 0.0  ;;  %v1023_v14 = vadd.f32 %v4425_v6, %v5038_v3  ;;  %v1014_v15 = vpop.f32.mrb[47].mxu0  ;;  %v5337_v0 = vld [vmem:[#allocation2 + $0x90] sm:$0x1f]  ;;  %2789 = vmatprep.mubr.bf16.mxu1 %v4685_v7  ;;  %v3893_v12 = vcombine.low %v5342_v23, %v1534_v59 }
 0x155   : > { %v1166_v20 = vmax.f32 %v1012_v4, 0.0  ;;  %v1015_v22 = vadd.f32 %v5038_v3, %v1014_v15  ;;  %v3851_v24 = vcombine.low %v5337_v0, %v5337_v0  ;;  %2790 = vmatmul.mubr.bf16.vlgmr.msra.gmra.mrb[16].mxu1 %v3891_v60  ;;  %v1642_v48 = vshrl.u32 %v3853_v28, 16  ;;  %v4706_v60 = vld [vmem:[%s5815_s3 + $0x158] sm:$0xff]  }
 0x156   : > { %v1169_v25 = vmax.f32 %v1023_v14, 0.0  ;;  %4229 = vmatpush3.bf16.msra.mxu1 %v4696_v55  ;;  %v1320_v36 = vsel %vm5045_vm4, %v1168_v63, 0.0  ;;  %v1645_v49 = vshll.u32 %v3853_v28, 16  ;;  %v1556_v55 = vor.u32 %v1555_v33, %v1552_v35  ;;  %v4714_v33 = vld [vmem:[%s5815_s3 + $0x120] sm:$0xff]  }
 0x157   : > { %v1167_v2 = vmax.f32 %v1015_v22, 0.0  ;;  %v1318_v32 = vsel %vm5045_vm4, %v1166_v20, 0.0  ;;  %4230 = vmatprep.subr.bf16.mxu1 %v4697_v17  ;;  %v1628_v42 = vshrl.u32 %v3851_v24, 16  ;;  %v1631_v43 = vshll.u32 %v3851_v24, 16 }
 0x158   : > { %v1321_v16 = vsel %vm5050_vm5, %v1169_v25, 0.0  ;;  %v3852_v61 = vcombine.high %v5337_v0, %v5337_v0  ;;  %v1559_v15 = vshll.u32 %v3850_v11, 16  ;;  %v1644_v17 = vrot.slane %v1642_v48, 4  ;;  %v4707_v0 = vld [vmem:[%s5815_s3 + $0x118] sm:$0xff]  }
 0x159   : > { %v1333_v39 = vpack.c.bf16 %v1321_v16, %v1320_v36  ;;  %v1319_v40 = vsel %vm5050_vm5, %v1167_v2, 0.0  ;;  %v4428_v41 = vpop.f32.mrb[48].mxu0  ;;  %v1630_v7 = vrot.slane %v1628_v42, 4  ;;  %v1633_v13 = vrot.slane %v1631_v43, 5 }
 0x15a   : > { %v1332_v44 = vpack.c.bf16 %v1319_v40, %v1318_v32  ;;  %v1036_v45 = vadd.f32 %v4428_v41, %v5038_v3  ;;  %v1027_v46 = vpop.f32.mrb[49].mxu0  ;;  %4231 = vmatpush3.bf16.msra.mxu1 %v4698_v30  ;;  %v1647_v18 = vrot.slane %v1645_v49, 5  ;;  %v1543_v20 = vrot.slane %v1542_v53, 4  ;;  %v5393_v25 = vld [vmem:[#allocation2 + $0xa8] sm:$0x1f] }
 0x15b   : > { %1343 = vst [vmem:[#allocation2 + $0xb8] sm:$0xff] %v1333_v39  ;;  %v1028_v50 = vadd.f32 %v5038_v3, %v1027_v46  ;;  %v4429_v51 = vpop.f32.mrb[50].mxu0  ;;  %v4690_v52 = vld [vmem:[#allocation2 + $0xa0] ss:$8 sps:$4 sm:$0xff]   ;;  %4232 = vmatprep.subr.bf16.mxu1 %v4700_v8  ;;  %v1557_v22 = vrot.slane %v1556_v55, 4  ;;  %v3854_v24 = vcombine.high %v5325_v62, %v5325_v62  ;;  %v1634_v2 = vor.u32 %v1633_v13, %v1630_v7  ;;  %v4721_v55 = vld [vmem:[%s5815_s3 + $0x170] sm:$0xff]  }
 0x15c   : > { %1342 = vst [vmem:[#allocation2 + $0xb0] sm:$0xff] %v1332_v44  ;;  %v1172_v56 = vmax.f32 %v1036_v45, 0.0  ;;  %v1039_v57 = vadd.f32 %v4429_v51, %v5038_v3  ;;  %v1030_v58 = vpop.f32.mrb[51].mxu0  ;;  %2797 = vmatprep.mubr.bf16.mxu1 %v4690_v52  ;;  %v5380_v63 = vld [vmem:[#allocation2 + $0xa0] sm:$0x1f]  ;;  %v1648_v36 = vor.u32 %v1647_v18, %v1644_v17  ;;  %v3857_v32 = vcombine.low %v5393_v25, %v5393_v25  ;;  %v4719_v41 = vld [vmem:[%s5815_s3 + $0x168] sm:$0xff]  }
 0x15d   : > { %v1170_v4 = vmax.f32 %v1028_v50, 0.0  ;;  %v1031_v6 = vadd.f32 %v5038_v3, %v1030_v58  ;;  %2798 = vmatmul.mubr.bf16.gmra.mrb[20].mxu1 %v3892_v10  ;;  %v1637_v10 = vshll.u32 %v3852_v61, 16  ;;  %v3855_v11 = vcombine.low %v5380_v63, %v5380_v63 }
 0x15e   : > { %v1173_v14 = vmax.f32 %v1039_v57, 0.0  ;;  %4233 = vmatpush3.bf16.msra.mxu1 %v4705_v47  ;;  %v1324_v27 = vsel %vm5045_vm4, %v1172_v56, 0.0  ;;  %v1651_v8 = vshll.u32 %v3854_v24, 16  ;;  %v1547_v44 = vrot.slane %v5369_v54, 5  ;;  %v4720_v54 = vld [vmem:[%s5815_s3 + $0x128] sm:$0xff]  }
 0x15f   : > { %v1171_v19 = vmax.f32 %v1031_v6, 0.0  ;;  %4234 = vmatprep.subr.bf16.mxu1 %v4706_v60  ;;  %v1322_v62 = vsel %vm5045_vm4, %v1170_v4, 0.0  ;;  %v1656_v42 = vshrl.u32 %v3855_v11, 16  ;;  %v1659_v43 = vshll.u32 %v3855_v11, 16 }
 0x160   : > { %v1325_v21 = vsel %vm5050_vm5, %v1173_v14, 0.0  ;;  %v1561_v45 = vrot.slane %v1559_v15, 5  ;;  %v1635_v46 = vrot.slane %v1634_v2, 4  ;;  %v1649_v47 = vrot.slane %v1648_v36, 4  ;;  %v5447_v14 = vld [vmem:[%s5814_s2] ss:$0 sm:$0xff] }
 0x161   : > { %v1335_v26 = vpack.c.bf16 %v1325_v21, %v1324_v27  ;;  %v1323_v1 = vsel %vm5050_vm5, %v1171_v19, 0.0  ;;  %v4432_v28 = vpop.f32.mrb[52].mxu0  ;;  %v1670_v48 = vshrl.u32 %v3857_v32, 16  ;;  %v1673_v49 = vshll.u32 %v3857_v32, 16  ;;  %v4722_v27 = vld [vmem:[%s5815_s3 + $0x130] sm:$0xff]  }
 0x162   : > { %v1334_v30 = vpack.c.bf16 %v1323_v1, %v1322_v62  ;;  %v1052_v31 = vadd.f32 %v4432_v28, %v5038_v3  ;;  %v1043_v35 = vpop.f32.mrb[53].mxu0  ;;  %4235 = vmatpush3.bf16.msra.mxu1 %v4707_v0  ;;  %v1562_v51 = vsel %vm5252_vm14, %v1557_v22, %v1561_v45  ;;  %v1639_v52 = vrot.slane %v1637_v10, 5  ;;  %v5436_v60 = vld [vmem:[#allocation2 + $0xb8] sm:$0x1f] }
 0x163   : > { %1345 = vst [vmem:[#allocation2 + $0xc8] sm:$0xff] %v1335_v26  ;;  %v4433_v9 = vpop.f32.mrb[54].mxu0  ;;  %v4699_v16 = vld [vmem:[#allocation2 + $0xb0] ss:$8 sps:$4 sm:$0xff]   ;;  %4236 = vmatprep.subr.bf16.mxu1 %v4709_v38  ;;  %v1653_v53 = vrot.slane %v1651_v8, 5  ;;  %v1658_v58 = vrot.slane %v1656_v42, 4  ;;  %v3856_v7 = vcombine.high %v5380_v63, %v5380_v63  ;;  %v3858_v21 = vcombine.high %v5393_v25, %v5393_v25 }
 0x164   : > { %1344 = vst [vmem:[#allocation2 + $0xc0] sm:$0xff] %v1334_v30  ;;  %v1176_v37 = vmax.f32 %v1052_v31, 0.0  ;;  %v1055_v39 = vadd.f32 %v4433_v9, %v5038_v3  ;;  %v1046_v40 = vpop.f32.mrb[55].mxu0  ;;  %2805 = vmatprep.mubr.bf16.mxu1 %v4699_v16  ;;  %v5420_v50 = vld [vmem:[#allocation2 + $0xb0] sm:$0x1f]  ;;  %v1548_v3 = vsel %vm5252_vm14, %v1543_v20, %v1547_v44  ;;  %v1661_v59 = vrot.slane %v1659_v43, 5 }
 0x165   : > { %2806 = vmatmul.mubr.bf16.gmra.mrb[24].mxu1 %v3893_v12  ;;  %v1640_v6 = vsel %vm5252_vm14, %v1635_v46, %v1639_v52  ;;  %v3859_v13 = vcombine.low %v5420_v50, %v5420_v50  ;;  %v1654_v18 = vsel %vm5252_vm14, %v1649_v47, %v1653_v53  ;;  %v1672_v19 = vrot.slane %v1670_v48, 4  ;;  %v4723_v26 = vld [vmem:[%s5815_s3 + $0x178] sm:$0xff]   ;;  %v4726_v12 = vld [vmem:[%s5815_s3 + $0x1c0] sm:$0xff]  }
 0x166   : > { %v1177_v23 = vmax.f32 %v1055_v39, 0.0  ;;  %4237 = vmatpush3.bf16.msra.mxu1 %v4714_v33  ;;  %v1347_v56 = vsel %vm5104_vm10, %v1176_v37, 0.0  ;;  %v1675_v0 = vrot.slane %v1673_v49, 5  ;;  %v3894_v24 = vcombine.low %v1548_v3, %v1562_v51  ;;  %v4724_v16 = vld [vmem:[%s5815_s3 + $0x138] sm:$0xff]  }
 0x167   : > { %4238 = vmatprep.subr.bf16.mxu1 %v4719_v41  ;;  %v3861_v38 = vcombine.low %v5436_v60, %v5436_v60  ;;  %v1662_v1 = vor.u32 %v1661_v59, %v1658_v58  ;;  %v3860_v28 = vcombine.high %v5420_v50, %v5420_v50  ;;  %v3903_v25 = vcombine.low %v1640_v6, %v1654_v18 }
 0x168   : > { %v1348_v57 = vsel %vm5111_vm11, %v1177_v23, 0.0  ;;  %v1684_v31 = vshrl.u32 %v3859_v13, 16  ;;  %v1665_v33 = vshll.u32 %v3856_v7, 16  ;;  %v1676_v36 = vor.u32 %v1675_v0, %v1672_v19 }
 0x169   : > { %v1365_v61 = vpack.c.bf16 %v1348_v57, %v1347_v56  ;;  %v4436_v4 = vpop.f32.mrb[56].mxu0  ;;  %v1687_v32 = vshll.u32 %v3859_v13, 16  ;;  %v1679_v8 = vshll.u32 %v3858_v21, 16  ;;  %v1698_v37 = vshrl.u32 %v3861_v38, 16 }
 0x16a   : > { %v1068_v15 = vadd.f32 %v5447_v14, %v4436_v4  ;;  %v1059_v17 = vpop.f32.mrb[57].mxu0  ;;  %4239 = vmatpush3.bf16.msra.mxu1 %v4720_v54  ;;  %v1701_v39 = vshll.u32 %v3861_v38, 16  ;;  %v1663_v42 = vrot.slane %v1662_v1, 4  ;;  %v5477_v43 = vshll.u32 %v3860_v28, 16  ;;  %v5485_v49 = vld [vmem:[#allocation2 + $0xc8] sm:$0x1f] }
 0x16b   : > { %1375 = vst [vmem:[#allocation2 + $0xd8] sm:$0xff] %v1365_v61  ;;  %v1060_v20 = vadd.f32 %v5447_v14, %v1059_v17  ;;  %v4437_v63 = vpop.f32.mrb[58].mxu0  ;;  %v4708_v22 = vld [vmem:[#allocation2 + $0xc0] ss:$8 sps:$4 sm:$0xff]   ;;  %4240 = vmatprep.subr.bf16.mxu1 %v4721_v55  ;;  %v1686_v48 = vrot.slane %v1684_v31, 4  ;;  %v1677_v52 = vrot.slane %v1676_v36, 4  ;;  %v3865_v7 = vcombine.low %v5485_v49, %v5485_v49 }
 0x16c   : > { %v1180_v10 = vmax.f32 %v1068_v15, 0.0  ;;  %v1071_v11 = vadd.f32 %v5447_v14, %v4437_v63  ;;  %v1062_v62 = vpop.f32.mrb[59].mxu0  ;;  %2813 = vmatprep.mubr.bf16.mxu1 %v4708_v22  ;;  %v5479_v44 = vld [vmem:[#allocation2 + $0xc0] sm:$0x1f]  ;;  %v1689_v53 = vrot.slane %v1687_v32, 5  ;;  %v1700_v56 = vrot.slane %v1698_v37, 4 }
 0x16d   : > { %v1178_v2 = vmax.f32 %v1060_v20, 0.0  ;;  %v1063_v30 = vadd.f32 %v5447_v14, %v1062_v62  ;;  %2814 = vmatmul.mubr.bf16.gmra.mrb[28].mxu1 %v3894_v24  ;;  %v1703_v57 = vrot.slane %v1701_v39, 5  ;;  %v3863_v58 = vcombine.low %v5479_v44, %v5479_v44 }
 0x16e   : > { %v1181_v35 = vmax.f32 %v1071_v11, 0.0  ;;  %2854 = vmatprep.mubr.bf16.mxu1 %v3903_v25  ;;  %4241 = vmatpush3.bf16.msra.mxu1 %v4722_v27  ;;  %v1351_v40 = vsel %vm5104_vm10, %v1180_v10, 0.0  ;;  %v1667_v6 = vrot.slane %v1665_v33, 5  ;;  %v1681_v17 = vrot.slane %v1679_v8, 5  ;;  %v4732_v33 = vld [vmem:[%s5815_s3 + $0x1c8] sm:$0xff]  }
 0x16f   : > { %v1179_v9 = vmax.f32 %v1063_v30, 0.0  ;;  %4242 = vmatprep.subr.bf16.mxu1 %v4723_v26  ;;  %v1349_v45 = vsel %vm5104_vm10, %v1178_v2, 0.0  ;;  %v3862_v18 = vcombine.high %v5436_v60, %v5436_v60  ;;  %v1690_v20 = vor.u32 %v1689_v53, %v1686_v48  ;;  %v4731_v2 = vld [vmem:[%s5815_s3 + $0x180] sm:$0xff]   ;;  %v4735_v53 = vld [vmem:[%s5815_s3 + $0x1d0] sm:$0xff]  }
 0x170   : > { %v1352_v41 = vsel %vm5111_vm11, %v1181_v35, 0.0  ;;  %v1668_v0 = vsel %vm5252_vm14, %v1663_v42, %v1667_v6  ;;  %v1695_v63 = vrot.slane %v5477_v43, 5  ;;  %v1682_v24 = vsel %vm5252_vm14, %v1677_v52, %v1681_v17  ;;  %v4741_v17 = vld [vmem:[%s5815_s3 + $0x1d8] sm:$0xff]  }
 0x171   : > { %v1367_v46 = vpack.c.bf16 %v1352_v41, %v1351_v40  ;;  %v1350_v23 = vsel %vm5111_vm11, %v1179_v9, 0.0  ;;  %v4440_v47 = vpop.f32.mrb[60].mxu0  ;;  %v1704_v27 = vor.u32 %v1703_v57, %v1700_v56  ;;  %v1712_v21 = vshrl.u32 %v3863_v58, 16 }
 0x172   : > { %v1366_v50 = vpack.c.bf16 %v1350_v23, %v1349_v45  ;;  %v1084_v3 = vadd.f32 %v5447_v14, %v4440_v47  ;;  %v1075_v51 = vpop.f32.mrb[61].mxu0  ;;  %4243 = vmatpush3.bf16.msra.mxu1 %v4724_v16  ;;  %v1715_v60 = vshll.u32 %v3863_v58, 16  ;;  %v1726_v11 = vshrl.u32 %v3865_v7, 16 }
 0x173   : > { %1377 = vst [vmem:[#allocation2 + $0xe8] sm:$0xff] %v1367_v46  ;;  %v1076_v54 = vadd.f32 %v5447_v14, %v1075_v51  ;;  %v4441_v55 = vpop.f32.mrb[62].mxu0  ;;  %4268 = vmatprep.subr.bf16.mxu1 %v4726_v12  ;;  %v1729_v30 = vshll.u32 %v3865_v7, 16  ;;  %v1691_v36 = vrot.slane %v1690_v20, 4  ;;  %v1707_v32 = vshll.u32 %v3862_v18, 16 }
 0x174   : > { %1376 = vst [vmem:[#allocation2 + $0xe0] sm:$0xff] %v1366_v50  ;;  %v1184_v59 = vmax.f32 %v1084_v3, 0.0  ;;  %v1087_v61 = vadd.f32 %v5447_v14, %v4441_v55  ;;  %v1078_v4 = vpop.f32.mrb[63].mxu0  ;;  %v3904_v8 = vcombine.low %v1668_v0, %v1682_v24  ;;  %v1705_v37 = vrot.slane %v1704_v27, 4  ;;  %v4733_v50 = vld [vmem:[%s5815_s3 + $0x188] sm:$0xff]  }
 0x175   : > { %v1182_v13 = vmax.f32 %v1076_v54, 0.0  ;;  %v1079_v15 = vadd.f32 %v5447_v14, %v1078_v4  ;;  %v1714_v42 = vrot.slane %v1712_v21, 4  ;;  %v1717_v43 = vrot.slane %v1715_v60, 5  ;;  %v4742_v60 = vld [vmem:[%s5815_s3 + $0x198] sm:$0xff]  }
 0x176   : > { %v1185_v19 = vmax.f32 %v1087_v61, 0.0  ;;  %v1355_v38 = vsel %vm5104_vm10, %v1184_v59, 0.0  ;;  %v1728_v23 = vrot.slane %v1726_v11, 4  ;;  %v1731_v47 = vrot.slane %v1729_v30, 5 }
 0x177   : > { %v1183_v22 = vmax.f32 %v1079_v15, 0.0  ;;  %v1353_v62 = vsel %vm5104_vm10, %v1182_v13, 0.0  ;;  %v1709_v3 = vrot.slane %v1707_v32, 5  ;;  %v3864_v51 = vcombine.high %v5479_v44, %v5479_v44  ;;  %v4740_v15 = vld [vmem:[%s5815_s3 + $0x190] sm:$0xff]  }
 0x178   : > { %v1356_v10 = vsel %vm5111_vm11, %v1185_v19, 0.0  ;;  %v1696_v54 = vsel %vm5252_vm14, %v1691_v36, %v1695_v63  ;;  %v3866_v55 = vcombine.high %v5485_v49, %v5485_v49  ;;  %v1718_v58 = vor.u32 %v1717_v43, %v1714_v42  ;;  %v4753_v36 = vld [vmem:[%s5815_s3 + $0x1f0] sm:$0xff]   ;;  %v1757_v42 = vld [vmem:[#allocation2 + $0x8] sm:$0x1f] }
 0x179   : > { %v1369_v26 = vpack.c.bf16 %v1356_v10, %v1355_v38  ;;  %v1354_v1 = vsel %vm5111_vm11, %v1183_v22, 0.0  ;;  %v4444_v28 = vpop.f32.mrb[64].mxu0  ;;  %v1710_v44 = vsel %vm5252_vm14, %v1705_v37, %v1709_v3  ;;  %v1732_v7 = vor.u32 %v1731_v47, %v1728_v23  ;;  %v4754_v32 = vld [vmem:[%s5815_s3 + $0x1b0] sm:$0xff]   ;;  %v4759_v37 = vld [vmem:[%s5815_s3 + $0x200] sm:$0xff]  }
 0x17a   : > { %v1368_v25 = vpack.c.bf16 %v1354_v1, %v1353_v62  ;;  %v1100_v31 = vadd.f32 %v5447_v14, %v4444_v28  ;;  %v1091_v35 = vpop.f32.mrb[65].mxu0  ;;  %v1721_v18 = vshll.u32 %v3864_v51, 16  ;;  %v1735_v63 = vshll.u32 %v3866_v55, 16  ;;  %v4744_v62 = vld [vmem:[%s5815_s3 + $0x1e0] sm:$0xff]   ;;  %v4763_v23 = vld [vmem:[%s5815_s3 + $0x210] sm:$0xff]   ;;  %v4765_v55 = vld [vmem:[%s5815_s3 + $0x218] sm:$0xff]  }
 0x17b   : > { %1379 = vst [vmem:[#allocation2 + $0xf8] sm:$0xff] %v1369_v26  ;;  %v1092_v9 = vadd.f32 %v5447_v14, %v1091_v35  ;;  %v4445_v16 = vpop.f32.mrb[66].mxu0  ;;  %v4725_v12 = vld [vmem:[#allocation2 + $0xd8] ss:$8 sps:$4 sm:$0xff]   ;;  %v3905_v24 = vcombine.low %v1696_v54, %v1710_v44  ;;  %v1719_v38 = vrot.slane %v1718_v58, 4  ;;  %v1733_v10 = vrot.slane %v1732_v7, 4 }
 0x17c   : > { %1378 = vst [vmem:[#allocation2 + $0xf0] sm:$0xff] %v1368_v25  ;;  %v1188_v39 = vmax.f32 %v1100_v31, 0.0  ;;  %v1103_v40 = vadd.f32 %v5447_v14, %v4445_v16  ;;  %v1094_v41 = vpop.f32.mrb[67].mxu0  ;;  %2855 = vmatmul.mubr.bf16.vlgmr.msra.gmra.mrb[32].mxu1 %v4725_v12  ;;  %v1723_v26 = vrot.slane %v1721_v18, 5  ;;  %v1737_v1 = vrot.slane %v1735_v63, 5  ;;  %v4749_v31 = vld [vmem:[%s5815_s3 + $0x1a0] sm:$0xff]  }
 0x17d   : > { %v1186_v45 = vmax.f32 %v1092_v9, 0.0  ;;  %v1095_v46 = vadd.f32 %v5447_v14, %v1094_v41  ;;  %2862 = vmatprep.mubr.bf16.mxu1 %v3904_v8  ;;  %4269 = vmatpush3.bf16.msra.mxu1 %v4731_v2  ;;  %v4756_v16 = vld [vmem:[%s5815_s3 + $0x1f8] sm:$0xff]   ;;  %v4761_v41 = vld [vmem:[%s5815_s3 + $0x208] sm:$0xff]   ;;  %v5596_v3 = vld [vmem:[#allocation2 + $0x20] sm:$0x1f] }
 0x17e   : > { %v1189_v48 = vmax.f32 %v1103_v40, 0.0  ;;  %4270 = vmatprep.subr.bf16.mxu1 %v4732_v33  ;;  %v1359_v56 = vsel %vm5104_vm10, %v1188_v39, 0.0  ;;  %v1724_v2 = vsel %vm5252_vm14, %v1719_v38, %v1723_v26  ;;  %v1738_v30 = vsel %vm5252_vm14, %v1733_v10, %v1737_v1  ;;  %v4751_v33 = vld [vmem:[%s5815_s3 + $0x1a8] sm:$0xff]   ;;  %v4755_v12 = vld [vmem:[#allocation2 + $0x50] ss:$8 sps:$4 sm:$0xff]  }
 0x17f   : > { %v1187_v52 = vmax.f32 %v1095_v46, 0.0  ;;  %v1357_v59 = vsel %vm5104_vm10, %v1186_v45, 0.0  ;;  %v3906_v34 = vcombine.low %v1724_v2, %v1738_v30  ;;  %v4757_v8 = vld [vmem:[%s5815_s3 + $0x1b8] sm:$0xff]   ;;  %v1758_v39 = vld [vmem:[#allocation2 + $0x10] sm:$0x1f]  ;;  %v3867_v46 = vcombine.low %v1757_v42, %v1757_v42 }
 0x180   : > { %v1360_v57 = vsel %vm5111_vm11, %v1189_v48, 0.0  ;;  %v4758_v40 = vld [vmem:[#allocation2 + $0x8] ss:$8 sps:$4 sm:$0xff]   ;;  %v3869_v45 = vcombine.low %v1758_v39, %v1758_v39  ;;  %v4762_v54 = vld [vmem:[#allocation2 + $0x18] ss:$8 sps:$4 sm:$0xff]   ;;  %v3873_v44 = vcombine.low %v5596_v3, %v5596_v3 }
 0x181   : > { %v1371_v61 = vpack.c.bf16 %v1360_v57, %v1359_v56  ;;  %v1358_v4 = vsel %vm5111_vm11, %v1187_v52, 0.0  ;;  %v4448_v6 = vpop.f32.mrb[68].mxu0  ;;  %4271 = vmatpush3.bf16.msra.mxu1 %v4733_v50  ;;  %v4760_v43 = vld [vmem:[#allocation2 + $0x60] ss:$8 sps:$4 sm:$0xff]   ;;  %v5594_v50 = vld [vmem:[#allocation2 + $0x18] sm:$0x1f] }
 0x182   : > { %v1370_v49 = vpack.c.bf16 %v1358_v4, %v1357_v59  ;;  %v1107_v13 = vpop.f32.mrb[69].mxu0  ;;  %4272 = vmatprep.subr.bf16.mxu1 %v4735_v53  ;;  %v1820_v47 = vshrl.u32 %v3869_v45, 16  ;;  %v1823_v48 = vshll.u32 %v3869_v45, 16  ;;  %v1806_v51 = vshrl.u32 %v3867_v46, 16  ;;  %v5598_v53 = vld [vmem:[#allocation2 + $0x30] sm:$0x1f] }
 0x183   : > { %1381 = vst [vmem:[#allocation2 + $0x108] sm:$0xff] %v1371_v61  ;;  %v1108_v19 = vadd.f32 %v5447_v14, %v1107_v13  ;;  %v4449_v0 = vpop.f32.mrb[70].mxu0  ;;  %v4734_v20 = vld [vmem:[#allocation2 + $0xe8] ss:$8 sps:$4 sm:$0xff]   ;;  %v1809_v52 = vshll.u32 %v3867_v46, 16  ;;  %v3871_v57 = vcombine.low %v5594_v50, %v5594_v50  ;;  %v3877_v4 = vcombine.low %v5598_v53, %v5598_v53 }
 0x184   : > { %1380 = vst [vmem:[#allocation2 + $0x100] sm:$0xff] %v1370_v49  ;;  %v1110_v22 = vpop.f32.mrb[71].mxu0  ;;  %2863 = vmatmul.mubr.bf16.gmra.mrb[36].mxu1 %v4734_v20  ;;  %v4764_v56 = vld [vmem:[#allocation2 + $0x70] ss:$8 sps:$4 sm:$0xff]   ;;  %v5607_v58 = vld [vmem:[#allocation2 + $0x28] sm:$0x1f]  ;;  %v3868_v13 = vcombine.high %v1757_v42, %v1757_v42 }
 0x185   : > { %v1190_v27 = vmax.f32 %v1108_v19, 0.0  ;;  %v1111_v21 = vadd.f32 %v5447_v14, %v1110_v22  ;;  %2870 = vmatprep.mubr.bf16.mxu1 %v3905_v24  ;;  %4273 = vmatpush3.bf16.msra.mxu1 %v4740_v15  ;;  %v1822_v59 = vrot.slane %v1820_v47, 4  ;;  %v1825_v61 = vrot.slane %v1823_v48, 5  ;;  %v4767_v49 = vld [vmem:[%s5815_s3 + $0x220] sm:$0xff]   ;;  %v5618_v10 = vld [vmem:[#allocation2 + $0x38] sm:$0x1f] }
 0x186   : > { %4274 = vmatprep.subr.bf16.mxu1 %v4741_v17  ;;  %v1808_v6 = vrot.slane %v1806_v51, 4  ;;  %v1811_v7 = vrot.slane %v1809_v52, 5  ;;  %v3870_v15 = vcombine.high %v1758_v39, %v1758_v39  ;;  %v3875_v17 = vcombine.low %v5607_v58, %v5607_v58  ;;  %v4770_v51 = vld [vmem:[#allocation2 + $0x38] ss:$8 sps:$4 sm:$0xff]  }
 0x187   : > { %v1191_v11 = vmax.f32 %v1111_v21, 0.0  ;;  %v1361_v14 = vsel %vm5104_vm10, %v1190_v27, 0.0  ;;  %v1834_v18 = vshrl.u32 %v3871_v57, 16  ;;  %v1848_v19 = vshrl.u32 %v3873_v44, 16  ;;  %v5616_v27 = vld [vmem:[#allocation2 + $0x40] sm:$0x1f] }
 0x188   : > { %v1851_v0 = vshll.u32 %v3873_v44, 16  ;;  %v1826_v20 = vor.u32 %v1825_v61, %v1822_v59  ;;  %v1837_v63 = vshll.u32 %v3871_v57, 16  ;;  %v1876_v22 = vshrl.u32 %v3877_v4, 16  ;;  %v4766_v21 = vld [vmem:[#allocation2 + $0x28] ss:$8 sps:$4 sm:$0xff]  }
 0x189   : > { %v1362_v28 = vsel %vm5111_vm11, %v1191_v11, 0.0  ;;  %4275 = vmatpush3.bf16.msra.mxu1 %v4742_v60  ;;  %v1879_v24 = vshll.u32 %v3877_v4, 16  ;;  %v1812_v38 = vor.u32 %v1811_v7, %v1808_v6  ;;  %v4769_v60 = vld [vmem:[%s5815_s3 + $0x228] sm:$0xff]   ;;  %v1815_v11 = vshll.u32 %v3868_v13, 16 }
 0x18a   : > { %v1372_v25 = vpack.c.bf16 %v1362_v28, %v1361_v14  ;;  %4276 = vmatprep.subr.bf16.mxu1 %v4744_v62  ;;  %v1829_v62 = vshll.u32 %v3870_v15, 16  ;;  %v1862_v26 = vshrl.u32 %v3875_v17, 16  ;;  %v1865_v1 = vshll.u32 %v3875_v17, 16  ;;  %v4768_v14 = vld [vmem:[#allocation2 + $0x80] ss:$8 sps:$4 sm:$0xff]  }
 0x18b   : > { %v4743_v35 = vld [vmem:[#allocation2 + $0xf8] ss:$8 sps:$4 sm:$0xff]   ;;  %v1836_v28 = vrot.slane %v1834_v18, 4  ;;  %v1850_v2 = vrot.slane %v1848_v19, 4  ;;  %v1853_v30 = vrot.slane %v1851_v0, 5 }
 0x18c   : > { %1382 = vst [vmem:[#allocation2 + $0x110] sm:$0xff] %v1372_v25  ;;  %2871 = vmatmul.mubr.bf16.gmra.mrb[40].mxu1 %v4743_v35  ;;  %v3881_v25 = vcombine.low %v5616_v27, %v5616_v27  ;;  %v1839_v35 = vrot.slane %v1837_v63, 5  ;;  %v1867_v39 = vrot.slane %v1865_v1, 5 }
 0x18d   : > { %2878 = vmatprep.mubr.bf16.mxu1 %v3906_v34  ;;  %4277 = vmatpush3.bf16.msra.mxu1 %v4749_v31  ;;  %v1827_v31 = vrot.slane %v1826_v20, 4  ;;  %v1881_v34 = vrot.slane %v1879_v24, 5  ;;  %v3880_v20 = vcombine.high %v5618_v10, %v5618_v10 }
 0x18e   : > { %4278 = vmatprep.subr.bf16.mxu1 %v4750_v29  ;;  %v1878_v29 = vrot.slane %v1876_v22, 4  ;;  %v1904_v42 = vshrl.u32 %v3881_v25, 16  ;;  %v1840_v46 = vor.u32 %v1839_v35, %v1836_v28 }
 0x190   : > { %v1882_v47 = vor.u32 %v1881_v34, %v1878_v29  ;;  %v1841_v61 = vrot.slane %v1840_v46, 4 }
 0x191   : > { %4279 = vmatpush3.bf16.msra.mxu1 %v4751_v33  ;;  %v1813_v33 = vrot.slane %v1812_v38, 4 }
 0x192   : > { %4280 = vmatprep.subr.bf16.mxu1 %v4753_v36  ;;  %v3872_v36 = vcombine.high %v5594_v50, %v5594_v50  ;;  %v1883_v6 = vrot.slane %v1882_v47, 4 }
 0x193   : > { %v4752_v9 = vld [vmem:[#allocation2 + $0x108] ss:$8 sps:$4 sm:$0xff]  }
 0x194   : > { %2879 = vmatmul.mubr.bf16.gmra.mrb[44].mxu1 %v4752_v9  ;;  %v3879_v9 = vcombine.low %v5618_v10, %v5618_v10 }
 0x195   : > { %4281 = vmatpush3.bf16.msra.mxu1 %v4754_v32  ;;  %2919 = vmatprep.mubr.bf16.mxu1 %v4755_v12  ;;  %v3874_v32 = vcombine.high %v5596_v3, %v5596_v3  ;;  %v1831_v12 = vrot.slane %v1829_v62, 5 }
 0x196   : > { %4282 = vmatprep.subr.bf16.mxu1 %v4756_v16  ;;  %v4771_v16 = vld [vmem:[%s5815_s3 + $0x230] sm:$0xff]   ;;  %v1890_v50 = vshrl.u32 %v3879_v9, 16  ;;  %v1893_v3 = vshll.u32 %v3879_v9, 16 }
 0x197   : > { %v1832_v45 = vsel %vm5252_vm14, %v1827_v31, %v1831_v12  ;;  %v1857_v48 = vshll.u32 %v3874_v32, 16 }
 0x198   : > { %v1892_v13 = vrot.slane %v1890_v50, 4  ;;  %v1895_v15 = vrot.slane %v1893_v3, 5 }
 0x199   : > { %4283 = vmatpush3.bf16.msra.mxu1 %v4757_v8  ;;  %v3878_v8 = vcombine.high %v5598_v53, %v5598_v53  ;;  %v4776_v53 = vld [vmem:[%s5815_s3 + $0x238] sm:$0xff]   ;;  %v1859_v7 = vrot.slane %v1857_v48, 5 }
 0x19a   : > { %4450 = vmatprep.subr.bf16.mxu1 %v4759_v37 }
 0x19c   : > { %2920 = vmatmul.mubr.bf16.vlgmr.msra.gmra.mrb[48].mxu1 %v4758_v40  ;;  %v1817_v40 = vrot.slane %v1815_v11, 5 }
 0x19d   : > { %2927 = vmatprep.mubr.bf16.mxu1 %v4760_v43  ;;  %4451 = vmatpush3.bf16.msra.mxu1 %v4759_v37  ;;  %v1864_v37 = vrot.slane %v1862_v26, 4  ;;  %v1907_v43 = vshll.u32 %v3881_v25, 16  ;;  %v1899_v26 = vshll.u32 %v3880_v20, 16 }
 0x19e   : > { %4452 = vmatprep.subr.bf16.mxu1 %v4761_v41  ;;  %v1818_v52 = vsel %vm5252_vm14, %v1813_v33, %v1817_v40 }
 0x19f   : > { %v3915_v57 = vcombine.low %v1818_v52, %v1832_v45  ;;  %v1909_v59 = vrot.slane %v1907_v43, 5  ;;  %v1901_v28 = vrot.slane %v1899_v26, 5  ;;  %v4831_v43 = vmov 0.0   ;;  %v3919_v52 = vld [vmem:[%s5816_s4] ss:$0 sm:$0xff] }
 0x1a1   : > { %4453 = vmatpush3.bf16.msra.mxu1 %v4761_v41  ;;  %v1854_v41 = vor.u32 %v1853_v30, %v1850_v2 }
 0x1a2   : > { %4454 = vmatprep.subr.bf16.mxu1 %v4763_v23 }
 0x1a3   : > { %v1855_v44 = vrot.slane %v1854_v41, 4 }
 0x1a4   : > { %2928 = vmatmul.mubr.bf16.gmra.mrb[52].mxu1 %v4762_v54  ;;  %v1843_v54 = vshll.u32 %v3872_v36, 16 }
 0x1a5   : > { %2935 = vmatprep.mubr.bf16.mxu1 %v4764_v56  ;;  %4455 = vmatpush3.bf16.msra.mxu1 %v4763_v23  ;;  %v3876_v23 = vcombine.high %v5607_v58, %v5607_v58  ;;  %v1885_v56 = vshll.u32 %v3878_v8, 16  ;;  %v1906_v58 = vrot.slane %v1904_v42, 4  ;;  %v1860_v0 = vsel %vm5252_vm14, %v1855_v44, %v1859_v7  ;;  %v4791_v7 = vld [vmem:[%s5817_s5 + $0x10] sm:$0xff]  }
 0x1a6   : > { %4456 = vmatprep.subr.bf16.mxu1 %v4765_v55  ;;  %v1845_v19 = vrot.slane %v1843_v54, 5 }
 0x1a7   : > { %v1871_v4 = vshll.u32 %v3876_v23, 16  ;;  %v1887_v18 = vrot.slane %v1885_v56, 5  ;;  %v1910_v63 = vor.u32 %v1909_v59, %v1906_v58 }
 0x1a9   : > { %4457 = vmatpush3.bf16.msra.mxu1 %v4765_v55  ;;  %v1868_v55 = vor.u32 %v1867_v39, %v1864_v37  ;;  %v1873_v22 = vrot.slane %v1871_v4, 5  ;;  %v1888_v24 = vsel %vm5252_vm14, %v1883_v6, %v1887_v18  ;;  %v1911_v1 = vrot.slane %v1910_v63, 4  ;;  %v4790_v4 = vld [vmem:[%s5817_s5 + $0x8] sm:$0xff]  }
 0x1aa   : > { %4458 = vmatprep.subr.bf16.mxu1 %v4767_v49 }
 0x1ab   : > { %v1869_v17 = vrot.slane %v1868_v55, 4 }
 0x1ac   : > { %2936 = vmatmul.mubr.bf16.gmra.mrb[56].mxu1 %v4766_v21  ;;  %v1896_v21 = vor.u32 %v1895_v15, %v1892_v13 }
 0x1ad   : > { %2943 = vmatprep.mubr.bf16.mxu1 %v4768_v14  ;;  %4459 = vmatpush3.bf16.msra.mxu1 %v4767_v49  ;;  %v3882_v49 = vcombine.high %v5616_v27, %v5616_v27  ;;  %v1846_v27 = vsel %vm5252_vm14, %v1841_v61, %v1845_v19  ;;  %v1874_v11 = vsel %vm5252_vm14, %v1869_v17, %v1873_v22 }
 0x1ae   : > { %4460 = vmatprep.subr.bf16.mxu1 %v4769_v60  ;;  %v3917_v62 = vcombine.low %v1874_v11, %v1888_v24  ;;  %v1897_v10 = vrot.slane %v1896_v21, 4 }
 0x1af   : > { %v1913_v38 = vshll.u32 %v3882_v49, 16 }
 0x1b0   : > { %v1902_v30 = vsel %vm5252_vm14, %v1897_v10, %v1901_v28 }
 0x1b1   : > { %4461 = vmatpush3.bf16.msra.mxu1 %v4769_v60  ;;  %v3916_v60 = vcombine.low %v1846_v27, %v1860_v0  ;;  %v1915_v14 = vrot.slane %v1913_v38, 5  ;;  %v4792_v0 = vld [vmem:[%s5817_s5 + $0x18] sm:$0xff]   ;;  %v4793_v27 = vld [vmem:[%s5817_s5 + $0x20] sm:$0xff]  }
 0x1b2   : > { %4462 = vmatprep.subr.bf16.mxu1 %v4771_v16 }
 0x1b3   : > { %v1916_v2 = vsel %vm5252_vm14, %v1911_v1, %v1915_v14  ;;  %v4794_v1 = vld [vmem:[%s5817_s5 + $0x28] sm:$0xff]  }
 0x1b4   : > { %2944 = vmatmul.mubr.bf16.gmra.mrb[60].mxu1 %v4770_v51  ;;  %v3918_v25 = vcombine.low %v1902_v30, %v1916_v2  ;;  %v4795_v30 = vld [vmem:[%s5817_s5 + $0x30] sm:$0xff]  }
 0x1b5   : > { %4463 = vmatpush3.bf16.msra.mxu1 %v4771_v16  ;;  %4466 = vmatprep.mubr.bf16.mxu1 %v3915_v57 }
 0x1b6   : > { %4464 = vmatprep.subr.bf16.mxu1 %v4776_v53 }
 0x1b9   : > { %4465 = vmatpush3.bf16.msra.mxu1 %v4776_v53 }
 0x1ba   : > { %4474 = vmatprep.subr.bf16.mxu1 %v4831_v43 }
 0x1bc   : > { %4467 = vmatmul.mubr.bf16.vlgmr.msra.gmra.mrb[64].mxu1 %v3916_v60 }
 0x1bd   : > { %4470 = vmatprep.mubr.bf16.mxu1 %v3917_v62  ;;  %4475 = vmatpush3.bf16.msra.mxu1 %v4789_v5 }
 0x1be   : > { %4476 = vmatprep.subr.bf16.mxu1 %v4831_v43 }
 0x1c1   : > { %4477 = vmatpush3.bf16.msra.mxu1 %v4790_v4 }
 0x1c2   : > { %4478 = vmatprep.subr.bf16.mxu1 %v4831_v43 }
 0x1c4   : > { %4471 = vmatmul.mubr.bf16.gmra.mrb[68].mxu1 %v3918_v25 }
 0x1c5   : > { %4490 = vmatprep.mubr.msk.bf16.mxu1 %vm4832_vm15, %v4831_v43  ;;  %4479 = vmatpush3.bf16.msra.mxu1 %v4791_v7 }
 0x1c6   : > { %4480 = vmatprep.subr.bf16.mxu1 %v4831_v43 }
 0x1c9   : > { %4481 = vmatpush3.bf16.msra.mxu1 %v4792_v0 }
 0x1ca   : > { %4482 = vmatprep.subr.bf16.mxu1 %v4831_v43 }
 0x1cd   : > { %4483 = vmatpush3.bf16.msra.mxu1 %v4793_v27 }
 0x1ce   : > { %4484 = vmatprep.subr.bf16.mxu1 %v4831_v43 }
 0x1d1   : > { %4485 = vmatpush3.bf16.msra.mxu1 %v4794_v1 }
 0x1d2   : > { %4486 = vmatprep.subr.bf16.mxu1 %v4831_v43 }
 0x1d5   : > { %4487 = vmatpush3.bf16.msra.mxu1 %v4795_v30 }
 0x1d6   : > { %4488 = vmatprep.subr.bf16.mxu1 %v4831_v43 }
 0x208   : > { %v4164_v31 = vpop.f32.mrb[0].mxu1 }
 0x209   : > { %v4165_v35 = vpop.f32.mrb[1].mxu1 }
 0x20a   : > { %v4166_v29 = vadd.f32 %v4165_v35, %v4164_v31  ;;  %v4167_v34 = vpop.f32.mrb[2].mxu1 }
 0x20b   : > { %v4168_v33 = vpop.f32.mrb[3].mxu1 }
 0x20c   : > { %v4169_v36 = vadd.f32 %v4168_v33, %v4167_v34  ;;  %v2727_v55 = vadd.f32 %v4166_v29, %v3919_v52 }
 0x20e   : > { %v2730_v58 = vadd.f32 %v4169_v36, %v3919_v52  ;;  %v4796_v36 = vld [vmem:[%s5817_s5 + $0x38] sm:$0xff]  }
 0x20f   : > { %4489 = vmatpush3.bf16.msra.mxu1 %v4796_v36 }
 0x210   : > { %v4170_v32 = vpop.f32.mrb[4].mxu1  ;;  %4494 = vmatprep.subr.bf16.mxu1 %v4831_v43 }
 0x211   : > { %v4171_v9 = vpop.f32.mrb[5].mxu1 }
 0x212   : > { %v4172_v16 = vadd.f32 %v4171_v9, %v4170_v32  ;;  %v4173_v12 = vpop.f32.mrb[6].mxu1 }
 0x213   : > { %v4174_v8 = vpop.f32.mrb[7].mxu1 }
 0x214   : > { %v4175_v37 = vadd.f32 %v4174_v8, %v4173_v12  ;;  %v2735_v15 = vadd.f32 %v4172_v16, %v3919_v52 }
 0x216   : > { %v2738_v20 = vadd.f32 %v4175_v37, %v3919_v52 }
 0x218   : > { %v4176_v39 = vpop.f32.mrb[8].mxu1 }
 0x219   : > { %v4177_v40 = vpop.f32.mrb[9].mxu1 }
 0x21a   : > { %v4178_v41 = vadd.f32 %v4177_v40, %v4176_v39  ;;  %v4179_v42 = vpop.f32.mrb[10].mxu1 }
 0x21b   : > { %v4180_v45 = vpop.f32.mrb[11].mxu1 }
 0x21c   : > { %v4181_v46 = vadd.f32 %v4180_v45, %v4179_v42  ;;  %v2743_v60 = vadd.f32 %v4178_v41, %v3919_v52 }
 0x21e   : > { %v2746_v10 = vadd.f32 %v4181_v46, %v3919_v52 }
 0x220   : > { %v4182_v23 = vpop.f32.mrb[12].mxu1 }
 0x221   : > { %v4183_v47 = vpop.f32.mrb[13].mxu1 }
 0x222   : > { %v4184_v48 = vadd.f32 %v4183_v47, %v4182_v23  ;;  %v4185_v50 = vpop.f32.mrb[14].mxu1 }
 0x223   : > { %v4186_v3 = vpop.f32.mrb[15].mxu1 }
 0x224   : > { %v4187_v51 = vadd.f32 %v4186_v3, %v4185_v50  ;;  %v2751_v35 = vadd.f32 %v4184_v48, %v3919_v52 }
 0x226   : > { %v2754_v32 = vadd.f32 %v4187_v51, %v3919_v52 }
 0x228   : > { %v4204_v53 = vpop.f32.mrb[16].mxu1 }
 0x229   : > { %v4205_v54 = vpop.f32.mrb[17].mxu1 }
 0x22a   : > { %v4206_v56 = vadd.f32 %v4205_v54, %v4204_v53  ;;  %v4207_v57 = vpop.f32.mrb[18].mxu1 }
 0x22b   : > { %v4208_v44 = vpop.f32.mrb[19].mxu1 }
 0x22c   : > { %v2792_v59 = vadd.f32 %v4206_v56, %v2727_v55  ;;  %v4209_v61 = vadd.f32 %v4208_v44, %v4207_v57 }
 0x22e   : > { %v2795_v6 = vadd.f32 %v4209_v61, %v2730_v58 }
 0x230   : > { %v4210_v49 = vpop.f32.mrb[20].mxu1 }
 0x231   : > { %v4211_v13 = vpop.f32.mrb[21].mxu1 }
 0x232   : > { %v4212_v17 = vadd.f32 %v4211_v13, %v4210_v49  ;;  %v4213_v18 = vpop.f32.mrb[22].mxu1 }
 0x233   : > { %v4214_v19 = vpop.f32.mrb[23].mxu1 }
 0x234   : > { %v2800_v63 = vadd.f32 %v4212_v17, %v2735_v15  ;;  %v4215_v22 = vadd.f32 %v4214_v19, %v4213_v18 }
 0x236   : > { %v2803_v24 = vadd.f32 %v4215_v22, %v2738_v20 }
 0x238   : > { %v4216_v21 = vpop.f32.mrb[24].mxu1 }
 0x239   : > { %v4217_v38 = vpop.f32.mrb[25].mxu1 }
 0x23a   : > { %v4218_v11 = vadd.f32 %v4217_v38, %v4216_v21  ;;  %v4219_v62 = vpop.f32.mrb[26].mxu1 }
 0x23b   : > { %v4220_v26 = vpop.f32.mrb[27].mxu1 }
 0x23c   : > { %v2808_v14 = vadd.f32 %v4218_v11, %v2743_v60  ;;  %v4221_v28 = vadd.f32 %v4220_v26, %v4219_v62 }
 0x23e   : > { %v2811_v2 = vadd.f32 %v4221_v28, %v2746_v10 }
 0x240   : > { %v4222_v25 = vpop.f32.mrb[28].mxu1 }
 0x241   : > { %v4223_v31 = vpop.f32.mrb[29].mxu1 }
 0x242   : > { %v4224_v29 = vadd.f32 %v4223_v31, %v4222_v25  ;;  %v4225_v34 = vpop.f32.mrb[30].mxu1 }
 0x243   : > { %v4226_v33 = vpop.f32.mrb[31].mxu1 }
 0x244   : > { %v2816_v9 = vadd.f32 %v4224_v29, %v2751_v35  ;;  %v4227_v16 = vadd.f32 %v4226_v33, %v4225_v34 }
 0x246   : > { %v2819_v12 = vadd.f32 %v4227_v16, %v2754_v32 }
 0x24f   : > { %v4244_v8 = vpop.f32.mrb[32].mxu1 }
 0x250   : > { %v4245_v37 = vpop.f32.mrb[33].mxu1 }
 0x251   : > { %v4246_v39 = vadd.f32 %v4245_v37, %v4244_v8  ;;  %v4247_v40 = vpop.f32.mrb[34].mxu1 }
 0x252   : > { %v4248_v5 = vpop.f32.mrb[35].mxu1 }
 0x253   : > { %v2857_v41 = vadd.f32 %v4246_v39, %v2792_v59  ;;  %v4249_v42 = vadd.f32 %v4248_v5, %v4247_v40 }
 0x255   : > { %v2860_v45 = vadd.f32 %v4249_v42, %v2795_v6 }
 0x257   : > { %v4250_v46 = vpop.f32.mrb[36].mxu1 }
 0x258   : > { %v4251_v23 = vpop.f32.mrb[37].mxu1 }
 0x259   : > { %v4252_v47 = vadd.f32 %v4251_v23, %v4250_v46  ;;  %v4253_v48 = vpop.f32.mrb[38].mxu1 }
 0x25a   : > { %v4254_v50 = vpop.f32.mrb[39].mxu1 }
 0x25b   : > { %v2865_v3 = vadd.f32 %v4252_v47, %v2800_v63  ;;  %v4255_v51 = vadd.f32 %v4254_v50, %v4253_v48 }
 0x25d   : > { %v2868_v52 = vadd.f32 %v4255_v51, %v2803_v24 }
 0x25f   : > { %v4256_v53 = vpop.f32.mrb[40].mxu1 }
 0x260   : > { %v4257_v54 = vpop.f32.mrb[41].mxu1 }
 0x261   : > { %v4258_v55 = vadd.f32 %v4257_v54, %v4256_v53  ;;  %v4259_v56 = vpop.f32.mrb[42].mxu1 }
 0x262   : > { %v4260_v57 = vpop.f32.mrb[43].mxu1 }
 0x263   : > { %v2873_v44 = vadd.f32 %v4258_v55, %v2808_v14  ;;  %v4261_v58 = vadd.f32 %v4260_v57, %v4259_v56 }
 0x265   : > { %v2876_v61 = vadd.f32 %v4261_v58, %v2811_v2 }
 0x267   : > { %v4262_v4 = vpop.f32.mrb[44].mxu1 }
 0x268   : > { %v4263_v59 = vpop.f32.mrb[45].mxu1 }
 0x269   : > { %v4264_v7 = vadd.f32 %v4263_v59, %v4262_v4  ;;  %v4265_v6 = vpop.f32.mrb[46].mxu1 }
 0x26a   : > { %v4266_v49 = vpop.f32.mrb[47].mxu1 }
 0x26b   : > { %v2881_v13 = vadd.f32 %v4264_v7, %v2816_v9  ;;  %v4267_v15 = vadd.f32 %v4266_v49, %v4265_v6 }
 0x26d   : > { %v2884_v17 = vadd.f32 %v4267_v15, %v2819_v12 }
 0x26f   : > { %v4284_v18 = vpop.f32.mrb[48].mxu1 }
 0x270   : > { %v4285_v19 = vpop.f32.mrb[49].mxu1 }
 0x271   : > { %v4286_v0 = vadd.f32 %v4285_v19, %v4284_v18  ;;  %v4287_v20 = vpop.f32.mrb[50].mxu1 }
 0x272   : > { %v4288_v63 = vpop.f32.mrb[51].mxu1 }
 0x273   : > { %v4289_v22 = vadd.f32 %v4288_v63, %v4287_v20  ;;  %v2922_v24 = vadd.f32 %v4286_v0, %v2857_v41 }
 0x275   : > { %v2925_v27 = vadd.f32 %v4289_v22, %v2860_v45 }
 0x277   : > { %v4290_v21 = vpop.f32.mrb[52].mxu1 }
 0x278   : > { %v4291_v38 = vpop.f32.mrb[53].mxu1 }
 0x279   : > { %v4292_v60 = vadd.f32 %v4291_v38, %v4290_v21  ;;  %v4293_v11 = vpop.f32.mrb[54].mxu1 }
 0x27a   : > { %v4294_v62 = vpop.f32.mrb[55].mxu1 }
 0x27b   : > { %v4295_v26 = vadd.f32 %v4294_v62, %v4293_v11  ;;  %v2930_v1 = vadd.f32 %v4292_v60, %v2865_v3  ;;  %v4797_v11 = vld [vmem:[%s5819_s7] sm:$0xff]  }
 0x27d   : > { %v2933_v10 = vadd.f32 %v4295_v26, %v2868_v52  ;;  %v4798_v26 = vld [vmem:[%s5819_s7 + $0x8] sm:$0xff]  }
 0x27f   : > { %v4296_v14 = vpop.f32.mrb[56].mxu1 }
 0x280   : > { %v4297_v28 = vpop.f32.mrb[57].mxu1 }
 0x281   : > { %v4298_v2 = vadd.f32 %v4297_v28, %v4296_v14  ;;  %v4299_v30 = vpop.f32.mrb[58].mxu1  ;;  %v4801_v14 = vld [vmem:[%s5819_s7 + $0x20] sm:$0xff]   ;;  %v4802_v28 = vld [vmem:[%s5819_s7 + $0x28] sm:$0xff]  }
 0x282   : > { %v4300_v25 = vpop.f32.mrb[59].mxu1 }
 0x283   : > { %v4301_v31 = vadd.f32 %v4300_v25, %v4299_v30  ;;  %v2938_v35 = vadd.f32 %v4298_v2, %v2873_v44  ;;  %v4803_v2 = vld [vmem:[%s5819_s7 + $0x30] sm:$0xff]   ;;  %v4804_v30 = vld [vmem:[%s5819_s7 + $0x38] sm:$0xff]   ;;  %v3057_v25 = vld [vmem:[%s5818_s6] sm:$0x1] }
 0x285   : > { %v2941_v29 = vadd.f32 %v4301_v31, %v2876_v61 }
 0x287   : > { %v4302_v34 = vpop.f32.mrb[60].mxu1 }
 0x288   : > { %v4303_v33 = vpop.f32.mrb[61].mxu1 }
 0x289   : > { %v4304_v36 = vadd.f32 %v4303_v33, %v4302_v34  ;;  %v4305_v32 = vpop.f32.mrb[62].mxu1 }
 0x28a   : > { %v4306_v9 = vpop.f32.mrb[63].mxu1 }
 0x28b   : > { %v4307_v16 = vadd.f32 %v4306_v9, %v4305_v32  ;;  %v2946_v12 = vadd.f32 %v4304_v36, %v2881_v13  ;;  %v4833_v9 = vmov 0  }
 0x28c   : > { %4600 = vset.pattern.permute.xlu1 %v4833_v9 }
 0x28d   : > { %v2949_v8 = vadd.f32 %v4307_v16, %v2884_v17  ;;  %v3164_v16 = vld [vmem:[%s5820_s8] sm:$0x1] }
 0x28f   : > { %v4468_v37 = vpop.f32.mrb[64].mxu1 }
 0x290   : > { %v2995_v39 = vadd.f32 %v4468_v37, %v2930_v1  ;;  %v2986_v40 = vpop.f32.mrb[65].mxu1  ;;  %v4799_v1 = vld [vmem:[%s5819_s7 + $0x10] sm:$0xff]  }
 0x291   : > { %v2987_v5 = vadd.f32 %v2986_v40, %v2922_v24  ;;  %v4469_v41 = vpop.f32.mrb[66].mxu1 }
 0x292   : > { %v2998_v42 = vadd.f32 %v4469_v41, %v2933_v10  ;;  %v2989_v45 = vpop.f32.mrb[67].mxu1  ;;  %v3019_v23 = vmax.f32 %v2995_v39, 0.0  ;;  %v4800_v10 = vld [vmem:[%s5819_s7 + $0x18] sm:$0xff]  }
 0x293   : > { %v2990_v46 = vadd.f32 %v2989_v45, %v2925_v27  ;;  %v3017_v48 = vmax.f32 %v2987_v5, 0.0 }
 0x294   : > { %v3020_v47 = vmax.f32 %v2998_v42, 0.0 }
 0x295   : > { %v3018_v50 = vmax.f32 %v2990_v46, 0.0 }
 0x296   : > { %v5699_v3 = vpack.c.bf16 %v3020_v47, %v3019_v23 }
 0x297   : > { %v3025_v51 = vadd.f32 %v3018_v50, %v3017_v48  ;;  %v3427_v52 = vpack.c.bf16 %v3018_v50, %v3017_v48  ;;  %v4472_v53 = vpop.f32.mrb[68].mxu1 }
 0x298   : > { %v3011_v54 = vadd.f32 %v4472_v53, %v2946_v12  ;;  %v3002_v55 = vpop.f32.mrb[69].mxu1 }
 0x299   : > { %v3026_v56 = vadd.f32 %v3025_v51, %v3019_v23  ;;  %v3003_v57 = vadd.f32 %v3002_v55, %v2938_v35  ;;  %v4473_v44 = vpop.f32.mrb[70].mxu1  ;;  %4530 = vmatprep.mubr.bf16.mxu0 %v3427_v52 }
 0x29a   : > { %v3014_v58 = vadd.f32 %v4473_v44, %v2949_v8  ;;  %v3005_v61 = vpop.f32.mrb[71].mxu1  ;;  %v3023_v6 = vmax.f32 %v3011_v54, 0.0 }
 0x29b   : > { %v3021_v4 = vmax.f32 %v3003_v57, 0.0  ;;  %v3027_v59 = vadd.f32 %v3026_v56, %v3020_v47  ;;  %v3006_v7 = vadd.f32 %v3005_v61, %v2941_v29 }
 0x29c   : > { %v3024_v49 = vmax.f32 %v3014_v58, 0.0 }
 0x29d   : > { %v3028_v13 = vadd.f32 %v3027_v59, %v3021_v4  ;;  %v3022_v15 = vmax.f32 %v3006_v7, 0.0 }
 0x29e   : > { %v5701_v17 = vpack.c.bf16 %v3024_v49, %v3023_v6 }
 0x29f   : > { %v3029_v18 = vadd.f32 %v3028_v13, %v3022_v15  ;;  %v5703_v19 = vpack.c.bf16 %v3022_v15, %v3021_v4  ;;  %v4043_v4 = vld [vmem:[%s5821_s9] sm:$0xff]  }
 0x2a0   : > { %v4044_v59 = vunpack.c.l.bf16 %v4043_v4  ;;  %v4045_v7 = vunpack.c.h.bf16 %v4043_v4 }
 0x2a1   : > { %v3030_v0 = vadd.f32 %v3029_v18, %v3023_v6  ;;  %v4094_v18 = vld [vmem:[%s5821_s9 + $0x8] sm:$0xff]  }
 0x2a3   : > { %v3031_v20 = vadd.f32 %v3030_v0, %v3024_v49 }
 0x2a5   : > { %v3032_v63 = vrot.slane %v3031_v20, 4 }
 0x2a7   : > { %v3033_v22 = vadd.f32 %v3032_v63, %v3031_v20  ;;  %v4048_v63 = vunpack.c.l.bf16 %v4094_v18 }
 0x2a9   : > { %v3034_v24 = vrot.slane %v3033_v22, 2 }
 0x2ab   : > { %v3035_v27 = vadd.f32 %v3034_v24, %v3033_v22  ;;  %v4049_v22 = vunpack.c.h.bf16 %v4094_v18  ;;  %v4808_v18 = vld [vmem:[%s5823_s11 + $0x18] sm:$0xff]  }
 0x2ad   : > { %v3036_v21 = vrot.slane %v3035_v27, 1 }
 0x2af   : > { %v3037_v38 = vadd.f32 %v3036_v21, %v3035_v27 }
 0x2b1   : > { %v3039_v60 = vmul.f32 0.015625, %v3037_v38  ;;  %v4095_v38 = vld [vmem:[%s5821_s9 + $0x10] sm:$0xff]  }
 0x2b3   : > { %v3040_v62 = vpack.c.bf16 %v3039_v60, %v3039_v60 }
 0x2b5   : > { %4491 = vmatmul.mubr.bf16.vlgmr.msra.gmra.mrb[72].mxu1 %v3040_v62  ;;  %v4052_v62 = vunpack.c.l.bf16 %v4095_v38 }
 0x2b6   : > { %4495 = vmatpush3.bf16.msra.mxu1 %v4797_v11  ;;  %4510 = vmatprep.mubr.msk.bf16.mxu1 %vm4832_vm15, %v4831_v43 }
 0x2b7   : > { %4496 = vmatprep.subr.bf16.mxu1 %v4831_v43 }
 0x2ba   : > { %4497 = vmatpush3.bf16.msra.mxu1 %v4798_v26  ;;  %v4053_v26 = vunpack.c.h.bf16 %v4095_v38 }
 0x2bb   : > { %4498 = vmatprep.subr.bf16.mxu1 %v4831_v43 }
 0x2be   : > { %4499 = vmatpush3.bf16.msra.mxu1 %v4799_v1 }
 0x2bf   : > { %4500 = vmatprep.subr.bf16.mxu1 %v4831_v43 }
 0x2c2   : > { %4501 = vmatpush3.bf16.msra.mxu1 %v4800_v10 }
 0x2c3   : > { %4502 = vmatprep.subr.bf16.mxu1 %v4831_v43 }
 0x2c6   : > { %4503 = vmatpush3.bf16.msra.mxu1 %v4801_v14 }
 0x2c7   : > { %4504 = vmatprep.subr.bf16.mxu1 %v4831_v43 }
 0x2ca   : > { %4505 = vmatpush3.bf16.msra.mxu1 %v4802_v28  ;;  %v4096_v28 = vld [vmem:[%s5821_s9 + $0x18] sm:$0xff]  }
 0x2cb   : > { %4506 = vmatprep.subr.bf16.mxu1 %v4831_v43 }
 0x2ce   : > { %4507 = vmatpush3.bf16.msra.mxu1 %v4803_v2 }
 0x2cf   : > { %4508 = vmatprep.subr.bf16.mxu1 %v4831_v43 }
 0x2d2   : > { %4509 = vmatpush3.bf16.msra.mxu1 %v4804_v30 }
 0x388   : > { %v3140_v31 = vpop.f32.mrb[72].mxu1 }
 0x389   : > { %v3141_v35 = vadd.f32 %v3140_v31, %v3057_v25  ;;  %v4492_v29 = vpop.f32.mrb[73].mxu1  ;;  %v4056_v25 = vunpack.c.l.bf16 %v4096_v28  ;;  %v4057_v31 = vunpack.c.h.bf16 %v4096_v28 }
 0x38a   : > { %v3143_v34 = vpop.f32.mrb[74].mxu1 }
 0x38b   : > { %v3146_v33 = vmax.f32 %v3141_v35, 0.0  ;;  %v4493_v36 = vpop.f32.mrb[75].mxu1 }
 0x38d   : > { %v3147_v32 = vpack.c.bf16 %v3146_v33, %v3146_v33  ;;  %v4097_v33 = vld [vmem:[%s5821_s9 + $0x20] sm:$0xff]  }
 0x38f   : > { %4511 = vmatmul.mubr.bf16.vlgmr.msra.gmra.mrb[76].mxu1 %v3147_v32 }
 0x462   : > { %v3247_v43 = vpop.f32.mrb[76].mxu1 }
 0x463   : > { %v3248_v12 = vadd.f32 %v3247_v43, %v3164_v16  ;;  %v4512_v8 = vpop.f32.mrb[77].mxu1  ;;  %v4061_v16 = vunpack.c.h.bf16 %v4097_v33 }
 0x464   : > { %v3250_v37 = vpop.f32.mrb[78].mxu1 }
 0x465   : > { %v4008_v39 = vmul.f32 -1.442695, %v3248_v12  ;;  %v4513_v40 = vpop.f32.mrb[79].mxu1  ;;  %v4098_v37 = vld [vmem:[%s5821_s9 + $0x28] sm:$0xff]  }
 0x467   : > { %4817 = vpow2.f32 %v4008_v39 }
 0x471   : > { %v4818_v5 = vpop.eup %4817 }
 0x472   : > { %v3256_v41 = vadd.f32 1.0, %v4818_v5  ;;  %v4064_v5 = vunpack.c.l.bf16 %v4098_v37 }
 0x474   : > { %4819 = vrcp.f32 %v3256_v41  ;;  %v4065_v41 = vunpack.c.h.bf16 %v4098_v37 }
 0x47e   : > { %v4820_v42 = vpop.eup %4819 }
 0x47f   : > { %3275 = vxpose.xlu0.b32.start.end [1/1] (short) %v4820_v42, 128 }
 0x4a8   : > { %4599 = vset.pattern.permute.xlu0 %v4833_v9  ;;  %v4060_v9 = vunpack.c.l.bf16 %v4097_v33 }
 0x4ff   : > { %v3291_v45 = vpop.trf.xlu0 }
 0x500   : > { %3325 = vperm.xlu0 %4599, %v3291_v45  }
 0x503   : > { %v3292_v46 = vpop.trf.xlu0 }
 0x504   : > { %3330 = vperm.xlu1 %4600, %v3292_v46  }
 0x507   : > { %v3293_v23 = vpop.trf.xlu0 }
 0x508   : > { %3335 = vperm.xlu1 %4600, %v3293_v23   ;;  %v4099_v23 = vld [vmem:[%s5821_s9 + $0x30] sm:$0xff]  }
 0x50b   : > { %v3294_v47 = vpop.trf.xlu0 }
 0x50c   : > { %3340 = vperm.xlu1 %4600, %v3294_v47  }
 0x50f   : > { %v3295_v48 = vpop.trf.xlu0 }
 0x510   : > { %3345 = vperm.xlu1 %4600, %v3295_v48  }
 0x513   : > { %v3296_v50 = vpop.trf.xlu0 }
 0x514   : > { %3350 = vperm.xlu1 %4600, %v3296_v50   ;;  %v4068_v50 = vunpack.c.l.bf16 %v4099_v23 }
 0x517   : > { %v3297_v51 = vpop.trf.xlu0 }
 0x518   : > { %3355 = vperm.xlu1 %4600, %v3297_v51   ;;  %v4069_v51 = vunpack.c.h.bf16 %v4099_v23 }
 0x51b   : > { %v3298_v52 = vpop.trf.xlu0 }
 0x51c   : > { %3360 = vperm.xlu1 %4600, %v3298_v52  }
 0x51f   : > { %v3299_v53 = vpop.trf.xlu0 }
 0x520   : > { %3365 = vperm.xlu1 %4600, %v3299_v53  }
 0x523   : > { %v3300_v54 = vpop.trf.xlu0 }
 0x524   : > { %3370 = vperm.xlu1 %4600, %v3300_v54  }
 0x527   : > { %v3301_v55 = vpop.trf.xlu0 }
 0x528   : > { %3375 = vperm.xlu1 %4600, %v3301_v55   ;;  %v4100_v55 = vld [vmem:[%s5821_s9 + $0x38] sm:$0xff]  }
 0x52b   : > { %v3302_v56 = vpop.trf.xlu0 }
 0x52c   : > { %3380 = vperm.xlu1 %4600, %v3302_v56  }
 0x52f   : > { %v3303_v57 = vpop.trf.xlu0 }
 0x530   : > { %3385 = vperm.xlu1 %4600, %v3303_v57  }
 0x533   : > { %v3304_v44 = vpop.trf.xlu0 }
 0x534   : > { %3390 = vperm.xlu1 %4600, %v3304_v44   ;;  %v4072_v44 = vunpack.c.l.bf16 %v4100_v55 }
 0x537   : > { %v3305_v58 = vpop.trf.xlu0 }
 0x538   : > { %3395 = vperm.xlu1 %4600, %v3305_v58   ;;  %v4073_v58 = vunpack.c.h.bf16 %v4100_v55 }
 0x53b   : > { %v3306_v61 = vpop.trf.xlu0 }
 0x53c   : > { %3400 = vperm.xlu1 %4600, %v3306_v61  }
 0x57f   : > { %v3326_v6 = vpop.permute.xlu0 %3325 }
 0x580   : > { %v3403_v13 = vmul.f32 %v4044_v59, %v3326_v6  ;;  %v4805_v6 = vld [vmem:[%s5823_s11] sm:$0xff]  }
 0x583   : > { %v3331_v49 = vpop.permute.xlu1 %3330 }
 0x584   : > { %v3404_v15 = vmul.f32 %v4045_v7, %v3331_v49  ;;  %v4806_v49 = vld [vmem:[%s5823_s11 + $0x8] sm:$0xff]  }
 0x586   : > { %v3419_v0 = vpack.c.bf16 %v3404_v15, %v3403_v13  ;;  %v4807_v13 = vld [vmem:[%s5823_s11 + $0x10] sm:$0xff]   ;;  %v4813_v15 = vld [vmem:[%s4927_s19 + $0xd8] ss:$8 sps:$4 sm:$0xff]  }
 0x587   : > { %v3336_v20 = vpop.permute.xlu1 %3335 }
 0x588   : > { %4514 = vmatprep.subr.bf16.mxu0 %v3419_v0  ;;  %v3405_v27 = vmul.f32 %v4048_v63, %v3336_v20  ;;  %v4814_v20 = vld [vmem:[%s4927_s19 + $0xe8] ss:$8 sps:$4 sm:$0xff]   ;;  %v4815_v63 = vld [vmem:[%s4927_s19 + $0xf8] ss:$8 sps:$4 sm:$0xff]  }
 0x589   : > { %4515 = vmatpush3.bf16.msra.mxu0 %v3419_v0  ;;  %v4812_v0 = vld [vmem:[%s5823_s11 + $0x38] sm:$0xff]  }
 0x58b   : > { %v3341_v24 = vpop.permute.xlu1 %3340 }
 0x58c   : > { %v3406_v21 = vmul.f32 %v4049_v22, %v3341_v24  ;;  %v4816_v22 = vld [vmem:[%s4927_s19 + $0x108] ss:$8 sps:$4 sm:$0xff]   ;;  %v4009_v24 = vld [vmem:[%s5822_s10] ss:$0 sm:$0xff] }
 0x58e   : > { %v3420_v60 = vpack.c.bf16 %v3406_v21, %v3405_v27  ;;  %v4010_v27 = vld [vmem:[%s5824_s12] ss:$0 sm:$0xff] }
 0x58f   : > { %v3346_v11 = vpop.permute.xlu1 %3345  ;;  %v4568_v21 = vadd.f32 %v4010_v27, %v4009_v24 }
 0x590   : > { %4516 = vmatprep.subr.bf16.mxu0 %v3420_v60  ;;  %v3407_v10 = vmul.f32 %v4052_v62, %v3346_v11 }
 0x591   : > { %4517 = vmatpush3.bf16.msra.mxu0 %v3420_v60 }
 0x593   : > { %v3351_v1 = vpop.permute.xlu1 %3350 }
 0x594   : > { %v3408_v14 = vmul.f32 %v4053_v26, %v3351_v1 }
 0x596   : > { %v3421_v2 = vpack.c.bf16 %v3408_v14, %v3407_v10 }
 0x597   : > { %v3356_v30 = vpop.permute.xlu1 %3355 }
 0x598   : > { %4518 = vmatprep.subr.bf16.mxu0 %v3421_v2  ;;  %v3409_v29 = vmul.f32 %v4056_v25, %v3356_v30 }
 0x599   : > { %4519 = vmatpush3.bf16.msra.mxu0 %v3421_v2 }
 0x59b   : > { %v3361_v35 = vpop.permute.xlu1 %3360 }
 0x59c   : > { %v3410_v34 = vmul.f32 %v4057_v31, %v3361_v35 }
 0x59e   : > { %v3422_v36 = vpack.c.bf16 %v3410_v34, %v3409_v29 }
 0x59f   : > { %v3366_v32 = vpop.permute.xlu1 %3365 }
 0x5a0   : > { %4520 = vmatprep.subr.bf16.mxu0 %v3422_v36  ;;  %v3411_v12 = vmul.f32 %v4060_v9, %v3366_v32 }
 0x5a1   : > { %4521 = vmatpush3.bf16.msra.mxu0 %v3422_v36 }
 0x5a3   : > { %v3371_v43 = vpop.permute.xlu1 %3370 }
 0x5a4   : > { %v3412_v8 = vmul.f32 %v4061_v16, %v3371_v43 }
 0x5a6   : > { %v3423_v39 = vpack.c.bf16 %v3412_v8, %v3411_v12 }
 0x5a7   : > { %v3376_v40 = vpop.permute.xlu1 %3375 }
 0x5a8   : > { %4522 = vmatprep.subr.bf16.mxu0 %v3423_v39  ;;  %v3413_v45 = vmul.f32 %v4064_v5, %v3376_v40 }
 0x5a9   : > { %4523 = vmatpush3.bf16.msra.mxu0 %v3423_v39 }
 0x5ab   : > { %v3381_v42 = vpop.permute.xlu1 %3380 }
 0x5ac   : > { %v3414_v46 = vmul.f32 %v4065_v41, %v3381_v42 }
 0x5ae   : > { %v3424_v47 = vpack.c.bf16 %v3414_v46, %v3413_v45 }
 0x5af   : > { %v3386_v48 = vpop.permute.xlu1 %3385 }
 0x5b0   : > { %4524 = vmatprep.subr.bf16.mxu0 %v3424_v47  ;;  %v3415_v53 = vmul.f32 %v4068_v50, %v3386_v48 }
 0x5b1   : > { %4525 = vmatpush3.bf16.msra.mxu0 %v3424_v47 }
 0x5b3   : > { %v3391_v52 = vpop.permute.xlu1 %3390 }
 0x5b4   : > { %v3416_v54 = vmul.f32 %v4069_v51, %v3391_v52 }
 0x5b6   : > { %v3425_v56 = vpack.c.bf16 %v3416_v54, %v3415_v53 }
 0x5b7   : > { %v3396_v57 = vpop.permute.xlu1 %3395 }
 0x5b8   : > { %4526 = vmatprep.subr.bf16.mxu0 %v3425_v56  ;;  %v3417_v4 = vmul.f32 %v4072_v44, %v3396_v57 }
 0x5b9   : > { %4527 = vmatpush3.bf16.msra.mxu0 %v3425_v56 }
 0x5bb   : > { %v3401_v61 = vpop.permute.xlu1 %3400 }
 0x5bc   : > { %v3418_v59 = vmul.f32 %v4073_v58, %v3401_v61 }
 0x5be   : > { %v3426_v7 = vpack.c.bf16 %v3418_v59, %v3417_v4 }
 0x5c0   : > { %4528 = vmatprep.subr.bf16.mxu0 %v3426_v7 }
 0x5c1   : > { %4529 = vmatpush3.bf16.msra.mxu0 %v3426_v7 }
 0x5c2   : > { %4538 = vmatprep.subr.bf16.mxu0 %v4805_v6 }
 0x5c4   : > { %4531 = vmatmul.mubr.bf16.vlgmr.msra.gmra.mrb[72].mxu0 %v5699_v3  ;;  %v4809_v3 = vld [vmem:[%s5823_s11 + $0x20] sm:$0xff]  }
 0x5c5   : > { %4534 = vmatprep.mubr.bf16.mxu0 %v5703_v19  ;;  %4539 = vmatpush3.bf16.msra.mxu0 %v4805_v6  ;;  %v4810_v19 = vld [vmem:[%s5823_s11 + $0x28] sm:$0xff]  }
 0x5c6   : > { %4540 = vmatprep.subr.bf16.mxu0 %v4806_v49 }
 0x5c9   : > { %4541 = vmatpush3.bf16.msra.mxu0 %v4806_v49 }
 0x5ca   : > { %4542 = vmatprep.subr.bf16.mxu0 %v4807_v13 }
 0x5cc   : > { %4535 = vmatmul.mubr.bf16.gmra.mrb[76].mxu0 %v5701_v17  ;;  %v4811_v17 = vld [vmem:[%s5823_s11 + $0x30] sm:$0xff]  }
 0x5cd   : > { %4543 = vmatpush3.bf16.msra.mxu0 %v4807_v13  ;;  %4554 = vmatprep.mubr.bf16.mxu0 %v4813_v15 }
 0x5ce   : > { %4544 = vmatprep.subr.bf16.mxu0 %v4808_v18 }
 0x5d1   : > { %4545 = vmatpush3.bf16.msra.mxu0 %v4808_v18 }
 0x5d2   : > { %4546 = vmatprep.subr.bf16.mxu0 %v4809_v3 }
 0x5d5   : > { %4547 = vmatpush3.bf16.msra.mxu0 %v4809_v3 }
 0x5d6   : > { %4548 = vmatprep.subr.bf16.mxu0 %v4810_v19 }
 0x5d9   : > { %4549 = vmatpush3.bf16.msra.mxu0 %v4810_v19 }
 0x5da   : > { %4550 = vmatprep.subr.bf16.mxu0 %v4811_v17 }
 0x5dd   : > { %4551 = vmatpush3.bf16.msra.mxu0 %v4811_v17 }
 0x5de   : > { %4552 = vmatprep.subr.bf16.mxu0 %v4812_v0 }
 0x5e1   : > { %4553 = vmatpush3.bf16.msra.mxu0 %v4812_v0 }
 0x5e4   : > { %4555 = vmatmul.mubr.bf16.vlgmr.msra.gmra.mrb[72].mxu0 %v4814_v20 }
 0x5e5   : > { %4558 = vmatprep.mubr.bf16.mxu0 %v4815_v63 }
 0x5ec   : > { %4559 = vmatmul.mubr.bf16.gmra.mrb[76].mxu0 %v4816_v22 }
 0x6b7   : > { %v4556_v38 = vpop.f32.mrb[72].mxu0 }
 0x6b8   : > { %v4562_v60 = vadd.f32 %v4556_v38, %v4009_v24  ;;  %v3640_v11 = vpop.f32.mrb[73].mxu0 }
 0x6b9   : > { %v4564_v62 = vadd.f32 %v4009_v24, %v3640_v11  ;;  %v4557_v26 = vpop.f32.mrb[74].mxu0 }
 0x6ba   : > { %v4563_v1 = vadd.f32 %v4562_v60, %v4010_v27  ;;  %v4567_v10 = vadd.f32 %v4568_v21, %v4557_v26  ;;  %v3643_v14 = vpop.f32.mrb[75].mxu0 }
 0x6bb   : > { %v4565_v28 = vadd.f32 %v4564_v62, %v4010_v27  ;;  %v4569_v2 = vadd.f32 %v4568_v21, %v3643_v14 }
 0x6bc   : > { %v3681_v30 = vmax.f32 %v4563_v1, 0.0  ;;  %v3682_v25 = vmax.f32 %v4567_v10, 0.0 }
 0x6bd   : > { %v3679_v31 = vmax.f32 %v4565_v28, 0.0  ;;  %v3680_v35 = vmax.f32 %v4569_v2, 0.0 }
 0x6be   : > { %v4082_v29 = vpack.c.bf16 %v3682_v25, %v3681_v30 }
 0x6bf   : > { %v4077_v34 = vpack.c.bf16 %v3680_v35, %v3679_v31  ;;  %v4560_v33 = vpop.f32.mrb[76].mxu0 }
 0x6c0   : > { %4101 = vst [vmem:[%s440_s15 + $0x8] sm:$0xff] %v4082_v29   ;;  %v4571_v36 = vadd.f32 %v4568_v21, %v4560_v33  ;;  %v3656_v32 = vpop.f32.mrb[77].mxu0 }
 0x6c1   : > { %4078 = vst [vmem:[%s440_s15] sm:$0xff] %v4077_v34   ;;  %v4573_v9 = vadd.f32 %v4568_v21, %v3656_v32  ;;  %v4561_v16 = vpop.f32.mrb[78].mxu0 }
 0x6c2   : > { %v4575_v43 = vadd.f32 %v4568_v21, %v4561_v16  ;;  %v3659_v12 = vpop.f32.mrb[79].mxu0  ;;  %v3685_v37 = vmax.f32 %v4571_v36, 0.0 }
 0x6c3   : > { %v4577_v8 = vadd.f32 %v4568_v21, %v3659_v12  ;;  %v3683_v40 = vmax.f32 %v4573_v9, 0.0 }
 0x6c4   : > { %v3686_v39 = vmax.f32 %v4575_v43, 0.0 }
 0x6c5   : > { %v3684_v5 = vmax.f32 %v4577_v8, 0.0 }
 0x6c6   : > { %v4092_v41 = vpack.c.bf16 %v3686_v39, %v3685_v37 }
 0x6c7   : > { %v4087_v42 = vpack.c.bf16 %v3684_v5, %v3683_v40 }
 0x6c8   : > { %4103 = vst [vmem:[%s440_s15 + $0x18] sm:$0xff] %v4092_v41  }
 0x6c9   : > { %4102 = vst [vmem:[%s440_s15 + $0x10] sm:$0xff] %v4087_v42  }
 0x6ca PF: > { %s23_s25 = sadd.s32 1, %s4828_s25  }
 0x6cb   : > { %p20_p4 = scmp.ge.s32.totalorder %s23_s25, 4  }
 0x6cd   :  { %22 = sbr.rel (!%p20_p4) target bundleno = 1 (0x1), region = 107 }

// kernel: anystage_forward_pallas.3
= control target key start
LH: loop header
LB: loop body
LE: loop exit
PB: predicated region body
PF: predicated region fallthrough
CT: control target
= control target key end

     0   :  { %s4370_s25 = smov 0   ;;  %s5042_s0 = inlined_call_operand.vmem [shape: bf16[2,1,160,128], index: 0, kind: input, shape index: {}]   ;;  %s5043_s1 = inlined_call_operand.vmem [shape: bf16[128,128], index: 1, kind: input, shape index: {}]   ;;  %s5044_s2 = inlined_call_operand.vmem [shape: f32[1,128], index: 2, kind: input, shape index: {}]   ;;  %s5045_s3 = inlined_call_operand.vmem [shape: bf16[1152,128], index: 3, kind: input, shape index: {}]   ;;  %s5046_s4 = inlined_call_operand.vmem [shape: f32[1,128], index: 4, kind: input, shape index: {}]   ;;  %s5047_s5 = inlined_call_operand.vmem [shape: bf16[128,128], index: 5, kind: input, shape index: {}]   ;;  %s5048_s6 = inlined_call_operand.vmem [shape: f32[1,128], index: 6, kind: input, shape index: {}]   ;;  %s5049_s7 = inlined_call_operand.vmem [shape: bf16[128,128], index: 7, kind: input, shape index: {}]   ;;  %s5050_s8 = inlined_call_operand.vmem [shape: f32[1,128], index: 8, kind: input, shape index: {}]   ;;  %s5051_s9 = inlined_call_operand.vmem [shape: bf16[128,128], index: 9, kind: input, shape index: {}]   ;;  %s5052_s10 = inlined_call_operand.vmem [shape: f32[1,128], index: 10, kind: input, shape index: {}]   ;;  %s5053_s11 = inlined_call_operand.vmem [shape: bf16[8,128], index: 11, kind: input, shape index: {}]   ;;  %s5054_s12 = inlined_call_operand.vmem [shape: f32[1,128], index: 12, kind: input, shape index: {}]   ;;  %s5055_s13 = inlined_call_operand.vmem [shape: bf16[2,64,128], index: 13, kind: output, shape index: {}]  }
   0x1 LB: > { %s3356_s26 = sadd.s32 4294967295, %s4294_s25   ;;  %p3360_p0 = scmp.ge.s32.totalorder %s4294_s25, 1  ;;  %s4294_s25 = sphi %s4370_s25, %s23_s25  }
   0x2   : > { %p387_p1 = scmp.lt.s32.totalorder %s4294_s25, 3 }
   0x4   : > { %p388_p2 = pnand %p3360_p0, %p387_p1 }
   0x5   : > { %v4070_v0 = vld [vmem:[%s5043_s1] sm:$0xff] (!%p388_p2)   ;;  %p431_p3 = scmp.lt.s32.totalorder (!%p388_p2), %s3356_s26, 1  ;;  %v4071_v1 = vld [vmem:[%s5043_s1 + $0x8] sm:$0xff] (!%p388_p2)   ;;  %v4072_v2 = vld [vmem:[%s5043_s1 + $0x10] sm:$0xff] (!%p388_p2)   ;;  %v4296_v28 = vmov (!%p388_p2), 0.0|0.0   ;;  %v726_v53 = vlaneseq (!%p388_p2)  ;;  %vm1006_vm4 = vcmask (!%p388_p2), 1042432  }
   0x6   : > { %391 = sbr.rel (%p388_p2) target bundleno = 1648 (0x670), region = 72  ;;  %3931 = vmatprep.subr.bf16.mxu0 (!%p388_p2), %v4070_v0  ;;  %v4073_v3 = vld [vmem:[%s5043_s1 + $0x18] sm:$0xff] (!%p388_p2)   ;;  %v4074_v5 = vld [vmem:[%s5043_s1 + $0x20] sm:$0xff] (!%p388_p2)   ;;  %v4075_v6 = vld [vmem:[%s5043_s1 + $0x28] sm:$0xff] (!%p388_p2)   ;;  %777 = vst [vmem:[#allocation2] sm:$0xff] (!%p388_p2), %v4296_v28  ;;  %vm1007_vm5 = vcmask (!%p388_p2), 1046532  }
   0x7   : > { %3932 = vmatpush3.bf16.msra.mxu0 (!%p388_p2), %v4070_v0  ;;  %v4076_v7 = vld [vmem:[%s5043_s1 + $0x30] sm:$0xff] (!%p388_p2)   ;;  %v4077_v8 = vld [vmem:[%s5043_s1 + $0x38] sm:$0xff] (!%p388_p2)   ;;  %v4088_v18 = vld [vmem:[%s5045_s3 + $0x40] sm:$0xff] (!%p388_p2)   ;;  %786 = vst [vmem:[#allocation2 + $0x48] sm:$0xff] (!%p388_p2), %v4296_v28  ;;  %v4525_v55 = vshrl.u32 (!%p388_p2), %v726_v53, 7  ;;  %vm4298_vm8 = vmmov (!%p388_p2), 0  }
   0x8   : > { %3933 = vmatprep.subr.bf16.mxu0 (!%p388_p2), %v4071_v1  ;;  %v4089_v19 = vld [vmem:[%s5045_s3] sm:$0xff] (!%p388_p2)   ;;  %3729 = vmatprep.subr.bf16.mxu1 (!%p388_p2), %v4088_v18  ;;  %v4090_v20 = vld [vmem:[%s5045_s3 + $0x48] sm:$0xff] (!%p388_p2)   ;;  %v4092_v22 = vld [vmem:[%s5045_s3 + $0x50] sm:$0xff] (!%p388_p2)   ;;  %vm843_vm2 = vsmask.f32 (!%p388_p2), 3328 }
   0x9   : > { %3730 = vmatpush3.bf16.msra.mxu1 (!%p388_p2), %v4089_v19  ;;  %v4091_v21 = vld [vmem:[%s5045_s3 + $0x8] sm:$0xff] (!%p388_p2)   ;;  %v4093_v23 = vld [vmem:[%s5045_s3 + $0x140] sm:$0xff] (!%p388_p2)   ;;  %v4094_v24 = vld [vmem:[%s5045_s3 + $0x10] sm:$0xff] (!%p388_p2)   ;;  %v4533_v59 = vadd.s32 (!%p388_p2), 8, %v4525_v55  ;;  %vm729_vm0 = vcmp.ge.s32.totalorder (!%p388_p2), %v4525_v55, 1 }
   0xa   : > { %3731 = vmatprep.subr.bf16.mxu1 (!%p388_p2), %v4090_v20  ;;  %v4095_v25 = vld [vmem:[%s5045_s3 + $0x100] sm:$0xff] (!%p388_p2)   ;;  %v4096_v26 = vld [vmem:[%s5045_s3 + $0x58] sm:$0xff] (!%p388_p2)   ;;  %v4097_v27 = vld [vmem:[%s5045_s3 + $0x148] sm:$0xff] (!%p388_p2)   ;;  %vm844_vm3 = vsmask.f32 (!%p388_p2), 7440 }
   0xb   : > { %3934 = vmatpush3.bf16.msra.mxu0 (!%p388_p2), %v4071_v1  ;;  %v4098_v29 = vld [vmem:[%s5045_s3 + $0x18] sm:$0xff] (!%p388_p2)   ;;  %v4099_v30 = vld [vmem:[%s5045_s3 + $0x108] sm:$0xff] (!%p388_p2)   ;;  %v4100_v31 = vld [vmem:[%s5045_s3 + $0x60] sm:$0xff] (!%p388_p2)   ;;  %vm732_vm1 = vcmp.le.s32.totalorder (!%p388_p2), %v4533_v59, 8 }
   0xc   : > { %3935 = vmatprep.subr.bf16.mxu0 (!%p388_p2), %v4072_v2  ;;  %v4101_v32 = vld [vmem:[%s5045_s3 + $0x150] sm:$0xff] (!%p388_p2)   ;;  %v4102_v33 = vld [vmem:[%s5045_s3 + $0x20] sm:$0xff] (!%p388_p2)   ;;  %v4104_v35 = vld [vmem:[%s5045_s3 + $0x68] sm:$0xff] (!%p388_p2)  }
   0xd   : > { %s5061_s26 = smov (!%p431_p3, %s3356_s26), 1  ;;  %3732 = vmatpush3.bf16.msra.mxu1 %v4091_v21  ;;  %v4103_v34 = vld [vmem:[%s5045_s3 + $0x110] sm:$0xff]   ;;  %v4105_v36 = vld [vmem:[%s5045_s3 + $0x158] sm:$0xff]   ;;  %v4106_v37 = vld [vmem:[%s5045_s3 + $0x28] sm:$0xff]  }
   0xe   : > { %s4055_s14 = smul.u32 80, %s5061_s26  ;;  %3733 = vmatprep.subr.bf16.mxu1 %v4092_v22  ;;  %v4107_v38 = vld [vmem:[%s5045_s3 + $0x118] sm:$0xff]   ;;  %v4108_v39 = vld [vmem:[%s5045_s3 + $0x70] sm:$0xff]   ;;  %v4109_v40 = vld [vmem:[%s5045_s3 + $0x160] sm:$0xff]  }
   0xf   : > { %3936 = vmatpush3.bf16.msra.mxu0 %v4072_v2  ;;  %v4110_v41 = vld [vmem:[%s5045_s3 + $0x30] sm:$0xff]   ;;  %v4111_v42 = vld [vmem:[%s5045_s3 + $0x120] sm:$0xff]   ;;  %v4112_v43 = vld [vmem:[%s5045_s3 + $0x78] sm:$0xff]  }
  0x10   : > { %s4393_s17 = scalar_lea.vmem %s5042_s0, %s4055_s14  ;;  %3937 = vmatprep.subr.bf16.mxu0 %v4073_v3  ;;  %v4113_v44 = vld [vmem:[%s5045_s3 + $0x168] sm:$0xff]   ;;  %v4114_v45 = vld [vmem:[%s5045_s3 + $0x38] sm:$0xff]   ;;  %v4122_v47 = vld [vmem:[%s5045_s3 + $0x170] sm:$0xff]  }
  0x11   : > { %v4078_v4 = vld [vmem:[%s4393_s17] sm:$0xff]   ;;  %v4079_v9 = vld [vmem:[%s4393_s17 + $0x8] sm:$0xff]   ;;  %v4080_v10 = vld [vmem:[%s4393_s17 + $0x10] sm:$0xff]   ;;  %3734 = vmatpush3.bf16.msra.mxu1 %v4094_v24 }
  0x12   : > { %3947 = vmatprep.mubr.bf16.mxu0 %v4078_v4  ;;  %v4081_v11 = vld [vmem:[%s4393_s17 + $0x18] sm:$0xff]   ;;  %v4082_v12 = vld [vmem:[%s4393_s17 + $0x20] sm:$0xff]   ;;  %v4083_v13 = vld [vmem:[%s4393_s17 + $0x28] sm:$0xff]   ;;  %3735 = vmatprep.subr.bf16.mxu1 %v4096_v26 }
  0x13   : > { %3938 = vmatpush3.bf16.msra.mxu0 %v4073_v3  ;;  %v4084_v14 = vld [vmem:[%s4393_s17 + $0x30] sm:$0xff]   ;;  %v4085_v15 = vld [vmem:[%s4393_s17 + $0x38] sm:$0xff]   ;;  %v4086_v16 = vld [vmem:[%s4393_s17 + $0x40] sm:$0xff]  }
  0x14   : > { %3939 = vmatprep.subr.bf16.mxu0 %v4074_v5  ;;  %v4087_v17 = vld [vmem:[%s4393_s17 + $0x48] sm:$0xff]   ;;  %v4121_v48 = vld [vmem:[%s5045_s3 + $0xc0] sm:$0xff]   ;;  %v4124_v49 = vld [vmem:[%s5045_s3 + $0x130] sm:$0xff]  }
  0x15   : > { %3736 = vmatpush3.bf16.msra.mxu1 %v4098_v29  ;;  %v4115_v46 = vld [vmem:[%s5045_s3 + $0x128] sm:$0xff]   ;;  %v4130_v50 = vld [vmem:[%s5045_s3 + $0x178] sm:$0xff]   ;;  %v4522_v52 = vld [vmem:[%s5045_s3 + $0x200] sm:$0xff]  }
  0x16   : > { %3737 = vmatprep.subr.bf16.mxu1 %v4100_v31  ;;  %v4132_v51 = vld [vmem:[%s5045_s3 + $0x138] sm:$0xff]   ;;  %v795_v54 = vld [vmem:[#allocation2] sm:$0x1f]  ;;  %v1466_v21 = vld [vmem:[#allocation2 + $0x48] sm:$0x1e] }
  0x17   : > { %3940 = vmatpush3.bf16.msra.mxu0 %v4074_v5  ;;  %v3383_v56 = vcombine.low %v795_v54, %v795_v54  ;;  %v4530_v57 = vld [vmem:[%s5044_s2] ss:$0 sm:$0xff]  ;;  %v3384_v4 = vcombine.high %v795_v54, %v795_v54  ;;  %vm4548_vm6 = vmor %vm843_vm2, %vm844_vm3 }
  0x18   : > { %3941 = vmatprep.subr.bf16.mxu0 %v4075_v6  ;;  %vm4556_vm7 = vmor %vm1006_vm4, %vm1007_vm5 }
  0x19   : > { %3738 = vmatpush3.bf16.msra.mxu1 %v4102_v33  ;;  %v847_v60 = vshrl.u32 %v3383_v56, 16  ;;  %v850_v61 = vshll.u32 %v3383_v56, 16  ;;  %v3493_v33 = vcombine.low %v1466_v21, %v1466_v21 }
  0x1a   : > { %3739 = vmatprep.subr.bf16.mxu1 %v4104_v35 }
  0x1b   : > { %3942 = vmatpush3.bf16.msra.mxu0 %v4075_v6  ;;  %v849_v5 = vrot.slane %v847_v60, 4  ;;  %v852_v6 = vrot.slane %v850_v61, 5 }
  0x1c   : > { %3943 = vmatprep.subr.bf16.mxu0 %v4076_v7 }
  0x1d   : > { %3740 = vmatpush3.bf16.msra.mxu1 %v4106_v37 }
  0x1e   : > { %3741 = vmatprep.subr.bf16.mxu1 %v4108_v39 }
  0x1f   : > { %3944 = vmatpush3.bf16.msra.mxu0 %v4076_v7 }
  0x20   : > { %3945 = vmatprep.subr.bf16.mxu0 %v4077_v8 }
  0x21   : > { %3742 = vmatpush3.bf16.msra.mxu1 %v4110_v41 }
  0x22   : > { %3743 = vmatprep.subr.bf16.mxu1 %v4112_v43 }
  0x23   : > { %3946 = vmatpush3.bf16.msra.mxu0 %v4077_v8  ;;  %v958_v8 = vld [vmem:[#allocation2] sm:$0x1e] }
  0x24   : > { %3809 = vmatprep.subr.bf16.mxu0 %v4093_v23  ;;  %v3400_v18 = vcombine.high %v958_v8, %v958_v8 }
  0x25   : > { %3744 = vmatpush3.bf16.msra.mxu1 %v4114_v45 }
  0x26   : > { %3948 = vmatmul.mubr.bf16.vlgmr.msra.gmra.mrb[0].mxu0 %v4079_v9  ;;  %3769 = vmatprep.subr.bf16.mxu1 %v4121_v48 }
  0x27   : > { %3951 = vmatprep.mubr.bf16.mxu0 %v4080_v10  ;;  %3810 = vmatpush3.bf16.msra.mxu0 %v4095_v25 }
  0x28   : > { %3811 = vmatprep.subr.bf16.mxu0 %v4097_v27 }
  0x2b   : > { %3812 = vmatpush3.bf16.msra.mxu0 %v4099_v30 }
  0x2c   : > { %3813 = vmatprep.subr.bf16.mxu0 %v4101_v32  ;;  %v4554_v32 = vrot.slane %v3400_v18, 5 }
  0x2e   : > { %3952 = vmatmul.mubr.bf16.gmra.mrb[4].mxu0 %v4081_v11 }
  0x2f   : > { %3955 = vmatprep.mubr.bf16.mxu0 %v4082_v12  ;;  %3814 = vmatpush3.bf16.msra.mxu0 %v4103_v34 }
  0x30   : > { %3815 = vmatprep.subr.bf16.mxu0 %v4105_v36  ;;  %v3494_v36 = vcombine.high %v1466_v21, %v1466_v21 }
  0x33   : > { %3816 = vmatpush3.bf16.msra.mxu0 %v4107_v38 }
  0x34   : > { %3817 = vmatprep.subr.bf16.mxu0 %v4109_v40 }
  0x36   : > { %3956 = vmatmul.mubr.bf16.gmra.mrb[8].mxu0 %v4083_v13  ;;  %v853_v13 = vor.u32 %v852_v6, %v849_v5 }
  0x37   : > { %3959 = vmatprep.mubr.bf16.mxu0 %v4084_v14  ;;  %3818 = vmatpush3.bf16.msra.mxu0 %v4111_v42  ;;  %v856_v14 = vshll.u32 %v3384_v4, 16 }
  0x38   : > { %3819 = vmatprep.subr.bf16.mxu0 %v4113_v44  ;;  %v854_v27 = vrot.slane %v853_v13, 4 }
  0x39   : > { %v858_v28 = vrot.slane %v856_v14, 5 }
  0x3b   : > { %3820 = vmatpush3.bf16.msra.mxu0 %v4115_v46  ;;  %v4570_v43 = vsel %vm4548_vm6, %v854_v27, %v858_v28 }
  0x3c   : > { %3821 = vmatprep.subr.bf16.mxu0 %v4122_v47 }
  0x3e   : > { %3960 = vmatmul.mubr.bf16.gmra.mrb[12].mxu0 %v4085_v15 }
  0x3f   : > { %3963 = vmatprep.mubr.bf16.mxu0 %v4086_v16  ;;  %3822 = vmatpush3.bf16.msra.mxu0 %v4124_v49  ;;  %v4577_v49 = vrot.slane %v3493_v33, 9 }
  0x40   : > { %3823 = vmatprep.subr.bf16.mxu0 %v4130_v50 }
  0x43   : > { %3824 = vmatpush3.bf16.msra.mxu0 %v4132_v51 }
  0x44   : > { %3967 = vmatprep.subr.bf16.mxu0 %v4522_v52 }
  0x46   : > { %3964 = vmatmul.mubr.bf16.gmra.mrb[16].mxu0 %v4087_v17  ;;  %v3399_v17 = vcombine.low %v958_v8, %v958_v8 }
  0x48   : > { %v4552_v31 = vrot.slane %v3399_v17, 9 }
  0x4a   : > { %v1012_v48 = vsel %vm4556_vm7, %v4552_v31, %v4554_v32 }
  0xf9   : > { %v3949_v58 = vpop.f32.mrb[0].mxu0 }
  0xfa   : > { %v636_v62 = vadd.f32 %v3949_v58, %v4530_v57  ;;  %v627_v63 = vpop.f32.mrb[1].mxu0  ;;  %v4580_v58 = vrot.slane %v3494_v36, 5 }
  0xfb   : > { %v3950_v0 = vpop.f32.mrb[2].mxu0 }
  0xfc   : > { %v708_v1 = vmax.f32 %v636_v62, 0.0  ;;  %v639_v2 = vadd.f32 %v3950_v0, %v4530_v57  ;;  %v630_v3 = vpop.f32.mrb[3].mxu0 }
  0xfe   : > { %v709_v7 = vmax.f32 %v639_v2, 0.0  ;;  %v749_v9 = vsel %vm729_vm0, %v708_v1, 0.0 }
 0x100   : > { %v750_v10 = vsel %vm732_vm1, %v709_v7, 0.0 }
 0x101   : > { %v768_v11 = vpack.c.bf16 %v750_v10, %v749_v9  ;;  %v3953_v12 = vpop.f32.mrb[4].mxu0 }
 0x102   : > { %v652_v15 = vadd.f32 %v3953_v12, %v4530_v57  ;;  %v643_v16 = vpop.f32.mrb[5].mxu0 }
 0x103   : > { %778 = vst [vmem:[#allocation2 + $0x8] sm:$0xff] %v768_v11  ;;  %v644_v19 = vadd.f32 %v4530_v57, %v643_v16  ;;  %v3954_v20 = vpop.f32.mrb[6].mxu0 }
 0x104   : > { %v712_v22 = vmax.f32 %v652_v15, 0.0  ;;  %v655_v23 = vadd.f32 %v3954_v20, %v4530_v57  ;;  %v646_v24 = vpop.f32.mrb[7].mxu0 }
 0x105   : > { %v710_v25 = vmax.f32 %v644_v19, 0.0  ;;  %v647_v26 = vadd.f32 %v4530_v57, %v646_v24 }
 0x106   : > { %v713_v29 = vmax.f32 %v655_v23, 0.0  ;;  %v753_v37 = vsel %vm729_vm0, %v712_v22, 0.0 }
 0x107   : > { %v711_v34 = vmax.f32 %v647_v26, 0.0  ;;  %v751_v39 = vsel %vm729_vm0, %v710_v25, 0.0 }
 0x108   : > { %v754_v38 = vsel %vm732_vm1, %v713_v29, 0.0 }
 0x109   : > { %v770_v40 = vpack.c.bf16 %v754_v38, %v753_v37  ;;  %v752_v41 = vsel %vm732_vm1, %v711_v34, 0.0  ;;  %v3957_v42 = vpop.f32.mrb[8].mxu0 }
 0x10a   : > { %v769_v44 = vpack.c.bf16 %v752_v41, %v751_v39  ;;  %v668_v45 = vadd.f32 %v3957_v42, %v4530_v57  ;;  %v659_v46 = vpop.f32.mrb[9].mxu0  ;;  %v796_v47 = vld [vmem:[#allocation2 + $0x8] sm:$0x1f] }
 0x10b   : > { %780 = vst [vmem:[#allocation2 + $0x18] sm:$0xff] %v770_v40  ;;  %v660_v50 = vadd.f32 %v4530_v57, %v659_v46  ;;  %v3958_v51 = vpop.f32.mrb[10].mxu0  ;;  %v3385_v53 = vcombine.low %v796_v47, %v796_v47  ;;  %v3386_v54 = vcombine.high %v796_v47, %v796_v47  ;;  %v1210_v56 = vld [vmem:[#allocation2 + $0x8] sm:$0x1e] }
 0x10c   : > { %779 = vst [vmem:[#allocation2 + $0x10] sm:$0xff] %v769_v44  ;;  %v716_v60 = vmax.f32 %v668_v45, 0.0  ;;  %v671_v61 = vadd.f32 %v3958_v51, %v4530_v57  ;;  %v662_v62 = vpop.f32.mrb[11].mxu0  ;;  %v3439_v63 = vcombine.low %v1210_v56, %v1210_v56  ;;  %v3440_v0 = vcombine.high %v1210_v56, %v1210_v56  ;;  %v4584_v5 = vld [vmem:[#allocation2 + $0x8] sm:$0x1f] }
 0x10d   : > { %v714_v1 = vmax.f32 %v660_v50, 0.0  ;;  %v663_v2 = vadd.f32 %v4530_v57, %v662_v62  ;;  %v861_v3 = vshrl.u32 %v3385_v53, 16  ;;  %v864_v4 = vshll.u32 %v3385_v53, 16 }
 0x10e   : > { %v757_v6 = vsel %vm729_vm0, %v716_v60, 0.0  ;;  %v717_v7 = vmax.f32 %v671_v61, 0.0  ;;  %v870_v8 = vshll.u32 %v3386_v54, 16  ;;  %v4588_v9 = vrot.slane %v3439_v63, 9  ;;  %v4120_v60 = vld [vmem:[#allocation2] ss:$8 sps:$4 sm:$0xff]  }
 0x10f   : > { %v755_v10 = vsel %vm729_vm0, %v714_v1, 0.0  ;;  %v715_v11 = vmax.f32 %v663_v2, 0.0  ;;  %v863_v12 = vrot.slane %v861_v3, 4  ;;  %v866_v13 = vrot.slane %v864_v4, 5  ;;  %v4123_v61 = vld [vmem:[%s5045_s3 + $0x80] sm:$0xff]   ;;  %v4129_v2 = vld [vmem:[%s5045_s3 + $0xc8] sm:$0xff]  }
 0x110   : > { %v758_v14 = vsel %vm732_vm1, %v717_v7, 0.0  ;;  %v872_v15 = vrot.slane %v870_v8, 5  ;;  %v1260_v16 = vrot.slane %v3440_v0, 5  ;;  %v4596_v17 = vcombine.low %v4584_v5, %v4584_v5 }
 0x111   : > { %v772_v18 = vpack.c.bf16 %v758_v14, %v757_v6  ;;  %v756_v19 = vsel %vm732_vm1, %v715_v11, 0.0  ;;  %v3961_v20 = vpop.f32.mrb[12].mxu0  ;;  %v867_v21 = vor.u32 %v866_v13, %v863_v12  ;;  %v3424_v22 = vcombine.high %v4584_v5, %v4584_v5 }
 0x112   : > { %v771_v23 = vpack.c.bf16 %v756_v19, %v755_v10  ;;  %v684_v24 = vadd.f32 %v3961_v20, %v4530_v57  ;;  %v675_v25 = vpop.f32.mrb[13].mxu0  ;;  %v1261_v26 = vsel %vm4556_vm7, %v4588_v9, %v1260_v16  ;;  %v798_v27 = vld [vmem:[#allocation2 + $0x18] sm:$0x1f]  ;;  %v1099_v28 = vshrl.u32 %v4596_v17, 16 }
 0x113   : > { %782 = vst [vmem:[#allocation2 + $0x28] sm:$0xff] %v772_v18  ;;  %v676_v29 = vadd.f32 %v4530_v57, %v675_v25  ;;  %v3962_v33 = vpop.f32.mrb[14].mxu0  ;;  %v868_v34 = vrot.slane %v867_v21, 4  ;;  %v1211_v36 = vld [vmem:[#allocation2 + $0x10] sm:$0x1e]  ;;  %v3389_v38 = vcombine.low %v798_v27, %v798_v27  ;;  %v3390_v39 = vcombine.high %v798_v27, %v798_v27  ;;  %v4131_v18 = vld [vmem:[%s5045_s3 + $0x88] sm:$0xff]  }
 0x114   : > { %v797_v37 = vld [vmem:[#allocation2 + $0x10] sm:$0x1f]  ;;  %781 = vst [vmem:[#allocation2 + $0x20] sm:$0xff] %v771_v23  ;;  %v720_v40 = vmax.f32 %v684_v24, 0.0  ;;  %v687_v41 = vadd.f32 %v3962_v33, %v4530_v57  ;;  %v678_v42 = vpop.f32.mrb[15].mxu0  ;;  %v3441_v44 = vcombine.low %v1211_v36, %v1211_v36  ;;  %v3442_v45 = vcombine.high %v1211_v36, %v1211_v36 }
 0x115   : > { %v718_v46 = vmax.f32 %v676_v29, 0.0  ;;  %v679_v47 = vadd.f32 %v4530_v57, %v678_v42  ;;  %v873_v50 = vsel %vm4548_vm6, %v868_v34, %v872_v15  ;;  %v3387_v51 = vcombine.low %v797_v37, %v797_v37  ;;  %v1051_v13 = vld [vmem:[#allocation2 + $0x10] sm:$0x1f] }
 0x116   : > { %v761_v53 = vsel %vm729_vm0, %v720_v40, 0.0  ;;  %v721_v54 = vmax.f32 %v687_v41, 0.0  ;;  %v3507_v56 = vcombine.low %v4570_v43, %v873_v50  ;;  %v3456_v62 = vrot.slane %v3441_v44, 9  ;;  %v4137_v29 = vld [vmem:[%s5045_s3 + $0xd0] sm:$0xff]  }
 0x117   : > { %v759_v63 = vsel %vm729_vm0, %v718_v46, 0.0  ;;  %v719_v0 = vmax.f32 %v679_v47, 0.0  ;;  %v1264_v1 = vrot.slane %v3442_v45, 5  ;;  %v3388_v3 = vcombine.high %v797_v37, %v797_v37 }
 0x118   : > { %v762_v4 = vsel %vm732_vm1, %v721_v54, 0.0  ;;  %2322 = vmatprep.mubr.bf16.mxu1 %v3507_v56  ;;  %v875_v43 = vshrl.u32 %v3387_v51, 16  ;;  %v878_v6 = vshll.u32 %v3387_v51, 16  ;;  %v889_v7 = vshrl.u32 %v3389_v38, 16  ;;  %v4149_v54 = vld [vmem:[%s5045_s3 + $0xd8] sm:$0xff]  }
 0x119   : > { %v774_v8 = vpack.c.bf16 %v762_v4, %v761_v53  ;;  %v760_v9 = vsel %vm732_vm1, %v719_v0, 0.0  ;;  %v3965_v10 = vpop.f32.mrb[16].mxu0  ;;  %2323 = vmatmul.mubr.bf16.vlgmr.msra.gmra.mrb[0].mxu1 %v4120_v60  ;;  %v1265_v11 = vsel %vm4556_vm7, %v3456_v62, %v1264_v1  ;;  %v884_v12 = vshll.u32 %v3388_v3, 16  ;;  %v1212_v53 = vld [vmem:[#allocation2 + $0x18] sm:$0x1e] }
 0x11a   : > { %v773_v14 = vpack.c.bf16 %v760_v9, %v759_v63  ;;  %v691_v15 = vpop.f32.mrb[17].mxu0  ;;  %3770 = vmatpush3.bf16.msra.mxu1 %v4123_v61  ;;  %v3523_v16 = vcombine.low %v1261_v26, %v1265_v11  ;;  %v877_v19 = vrot.slane %v875_v43, 4  ;;  %v880_v20 = vrot.slane %v878_v6, 5  ;;  %v4151_v4 = vld [vmem:[%s5045_s3 + $0x98] sm:$0xff]   ;;  %v4156_v9 = vld [vmem:[%s5045_s3 + $0xe0] sm:$0xff]  }
 0x11b   : > { %784 = vst [vmem:[#allocation2 + $0x38] sm:$0xff] %v774_v8  ;;  %v692_v21 = vadd.f32 %v4530_v57, %v691_v15  ;;  %v3966_v23 = vpop.f32.mrb[18].mxu0  ;;  %3771 = vmatprep.subr.bf16.mxu1 %v4129_v2  ;;  %v886_v24 = vrot.slane %v884_v12, 5  ;;  %v891_v25 = vrot.slane %v889_v7, 4  ;;  %v892_v27 = vshll.u32 %v3389_v38, 16  ;;  %v4144_v38 = vld [vmem:[%s5045_s3 + $0x90] sm:$0xff]  }
 0x11c   : > { %783 = vst [vmem:[#allocation2 + $0x30] sm:$0xff] %v773_v14  ;;  %2452 = vmatprep.mubr.bf16.mxu0 %v3523_v16  ;;  %v694_v26 = vpop.f32.mrb[19].mxu0  ;;  %v881_v33 = vor.u32 %v880_v20, %v877_v19  ;;  %v898_v34 = vshll.u32 %v3390_v39, 16  ;;  %v3425_v36 = vcombine.low %v1051_v13, %v1051_v13  ;;  %v3426_v37 = vcombine.high %v1051_v13, %v1051_v13  ;;  %v1213_v5 = vld [vmem:[#allocation2 + $0x20] sm:$0x1e] }
 0x11d   : > { %v722_v40 = vmax.f32 %v692_v21, 0.0  ;;  %v695_v41 = vadd.f32 %v4530_v57, %v694_v26  ;;  %v894_v42 = vrot.slane %v892_v27, 5  ;;  %v1101_v44 = vrot.slane %v1099_v28, 4  ;;  %v799_v43 = vld [vmem:[#allocation2 + $0x20] sm:$0x1f] }
 0x11e   : > { %3772 = vmatpush3.bf16.msra.mxu1 %v4131_v18  ;;  %v882_v45 = vrot.slane %v881_v33, 4  ;;  %v900_v46 = vrot.slane %v898_v34, 5  ;;  %v1102_v47 = vshll.u32 %v4596_v17, 16  ;;  %v1108_v39 = vshll.u32 %v3424_v22, 16  ;;  %v800_v14 = vld [vmem:[#allocation2 + $0x28] sm:$0x1f] }
 0x11f   : > { %v763_v57 = vsel %vm729_vm0, %v722_v40, 0.0  ;;  %v723_v50 = vmax.f32 %v695_v41, 0.0  ;;  %v895_v51 = vor.u32 %v894_v42, %v891_v25  ;;  %3773 = vmatprep.subr.bf16.mxu1 %v4137_v29  ;;  %v1113_v28 = vshrl.u32 %v3425_v36, 16  ;;  %v4143_v15 = vld [vmem:[#allocation2 + $0x10] ss:$8 sps:$4 sm:$0xff]   ;;  %v4163_v27 = vld [vmem:[%s5045_s3 + $0xa0] sm:$0xff]  }
 0x120   : > { %v887_v56 = vsel %vm4548_vm6, %v882_v45, %v886_v24  ;;  %v1104_v17 = vrot.slane %v1102_v47, 5  ;;  %v1110_v60 = vrot.slane %v1108_v39, 5  ;;  %v1116_v61 = vshll.u32 %v3425_v36, 16  ;;  %v1052_v36 = vld [vmem:[#allocation2 + $0x18] sm:$0x1f]  ;;  %v4150_v47 = vld [vmem:[%s5045_s3 + $0x208] sm:$0xff]  }
 0x121   : > { %v764_v55 = vsel %vm732_vm1, %v723_v50, 0.0  ;;  %v896_v22 = vrot.slane %v895_v51, 4  ;;  %v1115_v62 = vrot.slane %v1113_v28, 4  ;;  %v1122_v63 = vshll.u32 %v3426_v37, 16  ;;  %v4168_v37 = vld [vmem:[%s5045_s3 + $0xe8] sm:$0xff]  }
 0x122   : > { %v775_v0 = vpack.c.bf16 %v764_v55, %v763_v57  ;;  %v1105_v1 = vor.u32 %v1104_v17, %v1101_v44  ;;  %v1118_v2 = vrot.slane %v1116_v61, 5  ;;  %3774 = vmatpush3.bf16.msra.mxu1 %v4144_v38  ;;  %v3443_v3 = vcombine.low %v1212_v53, %v1212_v53  ;;  %v1053_v38 = vld [vmem:[#allocation2 + $0x20] sm:$0x1f]  ;;  %v4175_v55 = vld [vmem:[%s5045_s3 + $0xf0] sm:$0xff]  }
 0x123   : > { %v901_v6 = vsel %vm4548_vm6, %v896_v22, %v900_v46  ;;  %v1124_v7 = vrot.slane %v1122_v63, 5  ;;  %v3444_v8 = vcombine.high %v1212_v53, %v1212_v53  ;;  %v3445_v59 = vcombine.low %v1213_v5, %v1213_v5  ;;  %3775 = vmatprep.subr.bf16.mxu1 %v4149_v54  ;;  %v4170_v54 = vld [vmem:[%s5045_s3 + $0xa8] sm:$0xff]  }
 0x124   : > { %785 = vst [vmem:[#allocation2 + $0x40] sm:$0xff] %v775_v0  ;;  %v3508_v10 = vcombine.low %v887_v56, %v901_v6  ;;  %v1106_v11 = vrot.slane %v1105_v1, 4  ;;  %v1119_v12 = vor.u32 %v1118_v2, %v1115_v62  ;;  %v3446_v13 = vcombine.high %v1213_v5, %v1213_v5  ;;  %v4161_v5 = vld [vmem:[%s5045_s3 + $0x210] sm:$0xff]   ;;  %v1214_v1 = vld [vmem:[#allocation2 + $0x28] sm:$0x1e] }
 0x125   : > { %v3457_v16 = vrot.slane %v3443_v3, 9  ;;  %v1268_v18 = vrot.slane %v3444_v8, 5  ;;  %v3458_v19 = vrot.slane %v3445_v59, 9  ;;  %v3391_v20 = vcombine.low %v799_v43, %v799_v43  ;;  %v1215_v2 = vld [vmem:[#allocation2 + $0x30] sm:$0x1e] }
 0x126   : > { %2330 = vmatprep.mubr.bf16.mxu1 %v3508_v10  ;;  %v1111_v21 = vsel %vm4548_vm6, %v1106_v11, %v1110_v60  ;;  %v1120_v23 = vrot.slane %v1119_v12, 4  ;;  %v1272_v24 = vrot.slane %v3446_v13, 5  ;;  %3776 = vmatpush3.bf16.msra.mxu1 %v4151_v4  ;;  %v3392_v25 = vcombine.high %v799_v43, %v799_v43  ;;  %v4182_v3 = vld [vmem:[%s5045_s3 + $0xb0] sm:$0xff]   ;;  %v4188_v11 = vld [vmem:[%s5045_s3 + $0xf8] sm:$0xff]  }
 0x127   : > { %2331 = vmatmul.mubr.bf16.gmra.mrb[4].mxu1 %v4143_v15  ;;  %v1269_v29 = vsel %vm4556_vm7, %v3457_v16, %v1268_v18  ;;  %v3393_v26 = vcombine.low %v800_v14, %v800_v14  ;;  %v3394_v33 = vcombine.high %v800_v14, %v800_v14  ;;  %v903_v34 = vshrl.u32 %v3391_v20, 16  ;;  %3777 = vmatprep.subr.bf16.mxu1 %v4156_v9  ;;  %v801_v8 = vld [vmem:[#allocation2 + $0x30] sm:$0x1f] }
 0x128   : > { %v1125_v40 = vsel %vm4548_vm6, %v1120_v23, %v1124_v7  ;;  %v1273_v41 = vsel %vm4556_vm7, %v3458_v19, %v1272_v24  ;;  %v906_v42 = vshll.u32 %v3391_v20, 16  ;;  %v912_v44 = vshll.u32 %v3392_v25, 16 }
 0x129   : > { %v3519_v45 = vcombine.low %v1111_v21, %v1125_v40  ;;  %v3524_v46 = vcombine.low %v1269_v29, %v1273_v41  ;;  %v905_v39 = vrot.slane %v903_v34, 4  ;;  %v917_v57 = vshrl.u32 %v3393_v26, 16  ;;  %v802_v34 = vld [vmem:[#allocation2 + $0x38] sm:$0x1f] }
 0x12a   : > { %v908_v50 = vrot.slane %v906_v42, 5  ;;  %v914_v51 = vrot.slane %v912_v44, 5  ;;  %v920_v28 = vshll.u32 %v3393_v26, 16  ;;  %v926_v53 = vshll.u32 %v3394_v33, 16  ;;  %3778 = vmatpush3.bf16.msra.mxu1 %v4163_v27  ;;  %v4169_v27 = vld [vmem:[%s5045_s3 + $0x218] sm:$0xff]  }
 0x12b   : > { %2453 = vmatmul.mubr.bf16.vlgmr.msra.gmra.mrb[20].mxu0 %v3519_v45  ;;  %v919_v56 = vrot.slane %v917_v57, 4  ;;  %v3427_v17 = vcombine.low %v1052_v36, %v1052_v36  ;;  %v3428_v60 = vcombine.high %v1052_v36, %v1052_v36  ;;  %v3429_v61 = vcombine.low %v1053_v38, %v1053_v38  ;;  %3779 = vmatprep.subr.bf16.mxu1 %v4168_v37  ;;  %v4190_v44 = vld [vmem:[%s5045_s3 + $0xb8] sm:$0xff]   ;;  %v4162_v45 = vld [vmem:[#allocation2 + $0x20] ss:$8 sps:$4 sm:$0xff]  }
 0x12c   : > { %3968 = vmatpush3.bf16.msra.mxu0 %v4522_v52  ;;  %2460 = vmatprep.mubr.bf16.mxu0 %v3524_v46  ;;  %v909_v22 = vor.u32 %v908_v50, %v905_v39  ;;  %v922_v62 = vrot.slane %v920_v28, 5  ;;  %v928_v63 = vrot.slane %v926_v53, 5  ;;  %v3430_v0 = vcombine.high %v1053_v38, %v1053_v38  ;;  %v4195_v57 = vld [vmem:[%s5045_s3 + $0x1c0] sm:$0xff]  }
 0x12d   : > { %3969 = vmatprep.subr.bf16.mxu0 %v4150_v47  ;;  %v1127_v4 = vshrl.u32 %v3427_v17, 16  ;;  %v1130_v43 = vshll.u32 %v3427_v17, 16  ;;  %v1136_v6 = vshll.u32 %v3428_v60, 16  ;;  %v1141_v7 = vshrl.u32 %v3429_v61, 16  ;;  %v4180_v17 = vld [vmem:[%s5045_s3 + $0x220] sm:$0xff]  }
 0x12e   : > { %v910_v59 = vrot.slane %v909_v22, 4  ;;  %v923_v9 = vor.u32 %v922_v62, %v919_v56  ;;  %v1144_v52 = vshll.u32 %v3429_v61, 16  ;;  %v1150_v10 = vshll.u32 %v3430_v0, 16  ;;  %3780 = vmatpush3.bf16.msra.mxu1 %v4170_v54  ;;  %v1054_v54 = vld [vmem:[#allocation2 + $0x28] sm:$0x1f] }
 0x12f   : > { %v1129_v12 = vrot.slane %v1127_v4, 4  ;;  %v1132_v13 = vrot.slane %v1130_v43, 5  ;;  %v1138_v14 = vrot.slane %v1136_v6, 5  ;;  %v1143_v15 = vrot.slane %v1141_v7, 4  ;;  %3781 = vmatprep.subr.bf16.mxu1 %v4175_v55  ;;  %v1055_v56 = vld [vmem:[#allocation2 + $0x30] sm:$0x1f] }
 0x130   : > { %3970 = vmatpush3.bf16.msra.mxu0 %v4150_v47  ;;  %v915_v16 = vsel %vm4548_vm6, %v910_v59, %v914_v51  ;;  %v924_v18 = vrot.slane %v923_v9, 4  ;;  %v1146_v19 = vrot.slane %v1144_v52, 5  ;;  %v1152_v20 = vrot.slane %v1150_v10, 5  ;;  %v4189_v59 = vld [vmem:[%s5045_s3 + $0x228] sm:$0xff]  }
 0x131   : > { %v1133_v21 = vor.u32 %v1132_v13, %v1129_v12  ;;  %3971 = vmatprep.subr.bf16.mxu0 %v4161_v5  ;;  %v3447_v23 = vcombine.low %v1214_v1, %v1214_v1  ;;  %v3448_v24 = vcombine.high %v1214_v1, %v1214_v1  ;;  %v3449_v25 = vcombine.low %v1215_v2, %v1215_v2 }
 0x132   : > { %v929_v29 = vsel %vm4548_vm6, %v924_v18, %v928_v63  ;;  %v1147_v26 = vor.u32 %v1146_v19, %v1143_v15  ;;  %v3450_v33 = vcombine.high %v1215_v2, %v1215_v2  ;;  %v3395_v36 = vcombine.low %v801_v8, %v801_v8  ;;  %3782 = vmatpush3.bf16.msra.mxu1 %v4182_v3 }
 0x133   : > { %v3509_v37 = vcombine.low %v915_v16, %v929_v29  ;;  %v1134_v40 = vrot.slane %v1133_v21, 4  ;;  %v3459_v41 = vrot.slane %v3447_v23, 9  ;;  %v1276_v42 = vrot.slane %v3448_v24, 5  ;;  %3783 = vmatprep.subr.bf16.mxu1 %v4188_v11  ;;  %v1216_v16 = vld [vmem:[#allocation2 + $0x38] sm:$0x1e]  ;;  %v4196_v24 = vld [vmem:[%s5045_s3 + $0x230] sm:$0xff]  }
 0x134   : > { %v1148_v38 = vrot.slane %v1147_v26, 4  ;;  %3972 = vmatpush3.bf16.msra.mxu0 %v4161_v5  ;;  %v3460_v46 = vrot.slane %v3449_v25, 9  ;;  %v1280_v47 = vrot.slane %v3450_v33, 5  ;;  %v3396_v39 = vcombine.high %v801_v8, %v801_v8  ;;  %v1217_v23 = vld [vmem:[#allocation2 + $0x40] sm:$0x1e] }
 0x135   : > { %2338 = vmatprep.mubr.bf16.mxu1 %v3509_v37  ;;  %v1139_v50 = vsel %vm4548_vm6, %v1134_v40, %v1138_v14  ;;  %v1277_v51 = vsel %vm4556_vm7, %v3459_v41, %v1276_v42  ;;  %3973 = vmatprep.subr.bf16.mxu0 %v4169_v27  ;;  %v3397_v28 = vcombine.low %v802_v34, %v802_v34  ;;  %v931_v53 = vshrl.u32 %v3395_v36, 16 }
 0x136   : > { %v1153_v60 = vsel %vm4548_vm6, %v1148_v38, %v1152_v20  ;;  %2339 = vmatmul.mubr.bf16.gmra.mrb[8].mxu1 %v4162_v45  ;;  %v1281_v61 = vsel %vm4556_vm7, %v3460_v46, %v1280_v47  ;;  %v3398_v5 = vcombine.high %v802_v34, %v802_v34  ;;  %v934_v55 = vshll.u32 %v3395_v36, 16  ;;  %v1056_v38 = vld [vmem:[#allocation2 + $0x38] sm:$0x1f] }
 0x137   : > { %v3520_v22 = vcombine.low %v1139_v50, %v1153_v60  ;;  %v3525_v62 = vcombine.low %v1277_v51, %v1281_v61  ;;  %v933_v63 = vrot.slane %v931_v53, 4  ;;  %v940_v0 = vshll.u32 %v3396_v39, 16  ;;  %3784 = vmatpush3.bf16.msra.mxu1 %v4190_v44 }
 0x138   : > { %3974 = vmatpush3.bf16.msra.mxu0 %v4169_v27  ;;  %v936_v1 = vrot.slane %v934_v55, 5  ;;  %v945_v2 = vshrl.u32 %v3397_v28, 16  ;;  %v948_v3 = vshll.u32 %v3397_v28, 16  ;;  %v954_v4 = vshll.u32 %v3398_v5, 16  ;;  %3849 = vmatprep.subr.bf16.mxu1 %v4195_v57  ;;  %v1057_v57 = vld [vmem:[#allocation2 + $0x40] sm:$0x1f] }
 0x139   : > { %2461 = vmatmul.mubr.bf16.gmra.mrb[24].mxu0 %v3520_v22  ;;  %v942_v43 = vrot.slane %v940_v0, 5  ;;  %v3431_v6 = vcombine.low %v1054_v54, %v1054_v54  ;;  %v3432_v7 = vcombine.high %v1054_v54, %v1054_v54  ;;  %v3433_v8 = vcombine.low %v1055_v56, %v1055_v56  ;;  %3975 = vmatprep.subr.bf16.mxu0 %v4180_v17  ;;  %v4208_v54 = vld [vmem:[%s5045_s3 + $0x238] sm:$0xff]   ;;  %v4183_v22 = vld [vmem:[#allocation2 + $0x8] ss:$8 sps:$4 sm:$0xff]  }
 0x13a   : > { %2468 = vmatprep.mubr.bf16.mxu0 %v3525_v62  ;;  %v937_v9 = vor.u32 %v936_v1, %v933_v63  ;;  %v947_v52 = vrot.slane %v945_v2, 4  ;;  %v950_v10 = vrot.slane %v948_v3, 5  ;;  %v956_v11 = vrot.slane %v954_v4, 5 }
 0x13b   : > { %v3434_v12 = vcombine.high %v1055_v56, %v1055_v56  ;;  %v1155_v13 = vshrl.u32 %v3431_v6, 16  ;;  %v1158_v14 = vshll.u32 %v3431_v6, 16  ;;  %v1164_v15 = vshll.u32 %v3432_v7, 16 }
 0x13c   : > { %v938_v18 = vrot.slane %v937_v9, 4  ;;  %v951_v19 = vor.u32 %v950_v10, %v947_v52  ;;  %v1169_v20 = vshrl.u32 %v3433_v8, 16  ;;  %v1172_v21 = vshll.u32 %v3433_v8, 16  ;;  %3976 = vmatpush3.bf16.msra.mxu0 %v4180_v17  ;;  %v4181_v17 = vld [vmem:[#allocation2 + $0x30] ss:$8 sps:$4 sm:$0xff]  }
 0x13d   : > { %v1157_v25 = vrot.slane %v1155_v13, 4  ;;  %v1160_v27 = vrot.slane %v1158_v14, 5  ;;  %v1166_v29 = vrot.slane %v1164_v15, 5  ;;  %v1178_v26 = vshll.u32 %v3434_v12, 16  ;;  %3977 = vmatprep.subr.bf16.mxu0 %v4189_v59  ;;  %v1459_v9 = vld [vmem:[#allocation2 + $0x10] sm:$0x1e] }
 0x13e   : > { %v943_v33 = vsel %vm4548_vm6, %v938_v18, %v942_v43  ;;  %v952_v34 = vrot.slane %v951_v19, 4  ;;  %v1171_v36 = vrot.slane %v1169_v20, 4  ;;  %v1174_v37 = vrot.slane %v1172_v21, 5  ;;  %v959_v43 = vld [vmem:[#allocation2 + $0x8] sm:$0x1e] }
 0x13f   : > { %v1161_v40 = vor.u32 %v1160_v27, %v1157_v25  ;;  %v1180_v41 = vrot.slane %v1178_v26, 5  ;;  %v3451_v42 = vcombine.low %v1216_v16, %v1216_v16  ;;  %v3452_v44 = vcombine.high %v1216_v16, %v1216_v16  ;;  %v1460_v18 = vld [vmem:[#allocation2 + $0x18] sm:$0x1e] }
 0x140   : > { %v957_v45 = vsel %vm4548_vm6, %v952_v34, %v956_v11  ;;  %v1175_v46 = vor.u32 %v1174_v37, %v1171_v36  ;;  %v3453_v47 = vcombine.low %v1217_v23, %v1217_v23  ;;  %v3454_v39 = vcombine.high %v1217_v23, %v1217_v23  ;;  %3978 = vmatpush3.bf16.msra.mxu0 %v4189_v59 }
 0x141   : > { %v3510_v50 = vcombine.low %v943_v33, %v957_v45  ;;  %v1162_v51 = vrot.slane %v1161_v40, 4  ;;  %v3461_v28 = vrot.slane %v3451_v42, 9  ;;  %v1284_v53 = vrot.slane %v3452_v44, 5  ;;  %3979 = vmatprep.subr.bf16.mxu0 %v4196_v24  ;;  %v1462_v40 = vld [vmem:[#allocation2 + $0x28] sm:$0x1e]  ;;  %v4201_v44 = vld [vmem:[%s5045_s3 + $0x180] sm:$0xff]  }
 0x142   : > { %v1176_v56 = vrot.slane %v1175_v46, 4  ;;  %v3462_v60 = vrot.slane %v3453_v47, 9  ;;  %v1288_v61 = vrot.slane %v3454_v39, 5  ;;  %v3435_v5 = vcombine.low %v1056_v38, %v1056_v38 }
 0x143   : > { %2346 = vmatprep.mubr.bf16.mxu1 %v3510_v50  ;;  %v1167_v55 = vsel %vm4548_vm6, %v1162_v51, %v1166_v29  ;;  %v1285_v62 = vsel %vm4556_vm7, %v3461_v28, %v1284_v53  ;;  %v3436_v63 = vcombine.high %v1056_v38, %v1056_v38  ;;  %v3437_v0 = vcombine.low %v1057_v57, %v1057_v57  ;;  %v4207_v50 = vld [vmem:[%s5045_s3 + $0x1c8] sm:$0xff]   ;;  %v4206_v53 = vld [vmem:[#allocation2 + $0x18] ss:$8 sps:$4 sm:$0xff]  }
 0x144   : > { %v1181_v1 = vsel %vm4548_vm6, %v1176_v56, %v1180_v41  ;;  %2347 = vmatmul.mubr.bf16.gmra.mrb[12].mxu1 %v4181_v17  ;;  %v1289_v2 = vsel %vm4556_vm7, %v3462_v60, %v1288_v61  ;;  %v3438_v3 = vcombine.high %v1057_v57, %v1057_v57  ;;  %v1183_v4 = vshrl.u32 %v3435_v5, 16  ;;  %3980 = vmatpush3.bf16.msra.mxu0 %v4196_v24  ;;  %v1461_v24 = vld [vmem:[#allocation2 + $0x20] sm:$0x1e]  ;;  %v960_v17 = vld [vmem:[#allocation2 + $0x10] sm:$0x1e] }
 0x145   : > { %v3521_v6 = vcombine.low %v1167_v55, %v1181_v1  ;;  %2387 = vmatprep.mubr.bf16.mxu1 %v4183_v22  ;;  %v3526_v7 = vcombine.low %v1285_v62, %v1289_v2  ;;  %v1186_v8 = vshll.u32 %v3435_v5, 16  ;;  %v1192_v59 = vshll.u32 %v3436_v63, 16  ;;  %3981 = vmatprep.subr.bf16.mxu0 %v4208_v54  ;;  %v961_v60 = vld [vmem:[#allocation2 + $0x18] sm:$0x1e]  ;;  %v1463_v5 = vld [vmem:[#allocation2 + $0x30] sm:$0x1e] }
 0x146   : > { %v1185_v52 = vrot.slane %v1183_v4, 4  ;;  %v1197_v10 = vshrl.u32 %v3437_v0, 16  ;;  %v1200_v11 = vshll.u32 %v3437_v0, 16  ;;  %v1206_v12 = vshll.u32 %v3438_v3, 16  ;;  %v4209_v62 = vld [vmem:[%s5045_s3 + $0x188] sm:$0xff]   ;;  %v4210_v1 = vld [vmem:[%s5045_s3 + $0x1d0] sm:$0xff]  }
 0x147   : > { %2469 = vmatmul.mubr.bf16.gmra.mrb[28].mxu0 %v3521_v6  ;;  %v1188_v13 = vrot.slane %v1186_v8, 5  ;;  %v1194_v14 = vrot.slane %v1192_v59, 5  ;;  %v3401_v15 = vcombine.low %v959_v43, %v959_v43  ;;  %v3402_v16 = vcombine.high %v959_v43, %v959_v43  ;;  %v1464_v6 = vld [vmem:[#allocation2 + $0x38] sm:$0x1e] }
 0x148   : > { %2476 = vmatprep.mubr.bf16.mxu0 %v3526_v7  ;;  %v1199_v19 = vrot.slane %v1197_v10, 4  ;;  %v1202_v20 = vrot.slane %v1200_v11, 5  ;;  %v1208_v21 = vrot.slane %v1206_v12, 5  ;;  %v3479_v23 = vcombine.low %v1459_v9, %v1459_v9  ;;  %3982 = vmatpush3.bf16.msra.mxu0 %v4208_v54 }
 0x149   : > { %v1189_v25 = vor.u32 %v1188_v13, %v1185_v52  ;;  %v3416_v27 = vrot.slane %v3401_v15, 9  ;;  %v1015_v29 = vrot.slane %v3402_v16, 5  ;;  %v3480_v26 = vcombine.high %v1459_v9, %v1459_v9  ;;  %v962_v52 = vld [vmem:[#allocation2 + $0x20] sm:$0x1e]  ;;  %v4219_v16 = vld [vmem:[%s5045_s3 + $0x190] sm:$0xff]  }
 0x14a   : > { %v1203_v33 = vor.u32 %v1202_v20, %v1199_v19  ;;  %v3481_v34 = vcombine.low %v1460_v18, %v1460_v18  ;;  %v3482_v36 = vcombine.high %v1460_v18, %v1460_v18  ;;  %v3495_v37 = vrot.slane %v3479_v23, 9  ;;  %v963_v20 = vld [vmem:[#allocation2 + $0x28] sm:$0x1e] }
 0x14b   : > { %v1190_v41 = vrot.slane %v1189_v25, 4  ;;  %v1016_v42 = vsel %vm4556_vm7, %v3416_v27, %v1015_v29  ;;  %v1509_v38 = vrot.slane %v3480_v26, 5  ;;  %v3483_v45 = vcombine.low %v1461_v24, %v1461_v24  ;;  %v4225_v25 = vld [vmem:[%s5045_s3 + $0x1d8] sm:$0xff]   ;;  %v1465_v29 = vld [vmem:[#allocation2 + $0x40] sm:$0x1e] }
 0x14c   : > { %v1204_v46 = vrot.slane %v1203_v33, 4  ;;  %v3511_v47 = vcombine.low %v1012_v48, %v1016_v42  ;;  %v3496_v39 = vrot.slane %v3481_v34, 9  ;;  %v1513_v57 = vrot.slane %v3482_v36, 5 }
 0x14d   : > { %v1195_v51 = vsel %vm4548_vm6, %v1190_v41, %v1194_v14  ;;  %v1510_v28 = vsel %vm4556_vm7, %v3495_v37, %v1509_v38  ;;  %v3484_v54 = vcombine.high %v1461_v24, %v1461_v24  ;;  %v3485_v56 = vcombine.low %v1462_v40, %v1462_v40  ;;  %v4226_v41 = vld [vmem:[%s5045_s3 + $0x198] sm:$0xff]   ;;  %v964_v38 = vld [vmem:[#allocation2 + $0x30] sm:$0x1e] }
 0x14e   : > { %v1209_v31 = vsel %vm4548_vm6, %v1204_v46, %v1208_v21  ;;  %2388 = vmatmul.mubr.bf16.vlgmr.msra.gmra.mrb[16].mxu1 %v3511_v47  ;;  %v1514_v32 = vsel %vm4556_vm7, %v3496_v39, %v1513_v57  ;;  %v3486_v48 = vcombine.high %v1462_v40, %v1462_v40  ;;  %v3497_v61 = vrot.slane %v3483_v45, 9  ;;  %v4224_v46 = vld [vmem:[#allocation2 + $0x28] ss:$8 sps:$4 sm:$0xff]  }
 0x14f   : > { %v3522_v55 = vcombine.low %v1195_v51, %v1209_v31  ;;  %3850 = vmatpush3.bf16.msra.mxu1 %v4201_v44  ;;  %v3535_v22 = vcombine.low %v1510_v28, %v1514_v32  ;;  %2395 = vmatprep.mubr.bf16.mxu1 %v4206_v53  ;;  %v1517_v63 = vrot.slane %v3484_v54, 5  ;;  %v3498_v0 = vrot.slane %v3485_v56, 9  ;;  %v4227_v28 = vld [vmem:[%s5045_s3 + $0x1e0] sm:$0xff]  }
 0x150   : > { %3851 = vmatprep.subr.bf16.mxu1 %v4207_v50  ;;  %v1521_v2 = vrot.slane %v3486_v48, 5  ;;  %v3403_v3 = vcombine.low %v960_v17, %v960_v17  ;;  %v3404_v4 = vcombine.high %v960_v17, %v960_v17  ;;  %v3405_v43 = vcombine.low %v961_v60, %v961_v60  ;;  %v965_v50 = vld [vmem:[#allocation2 + $0x38] sm:$0x1e]  ;;  %v1299_v17 = vld [vmem:[#allocation2 + $0x10] sm:$0x1f] }
 0x151   : > { %2477 = vmatmul.mubr.bf16.gmra.mrb[32].mxu0 %v3522_v55  ;;  %v1518_v7 = vsel %vm4556_vm7, %v3497_v61, %v1517_v63  ;;  %v3406_v8 = vcombine.high %v961_v60, %v961_v60  ;;  %v3487_v59 = vcombine.low %v1463_v5, %v1463_v5  ;;  %v3488_v9 = vcombine.high %v1463_v5, %v1463_v5  ;;  %v4798_v63 = vld [vmem:[#allocation2 + $0x48] sm:$0x1f] }
 0x152   : > { %3983 = vmatprep.mubr.bf16.mxu0 %v3535_v22  ;;  %v1522_v10 = vsel %vm4556_vm7, %v3498_v0, %v1521_v2  ;;  %v3417_v11 = vrot.slane %v3403_v3, 9  ;;  %v1019_v12 = vrot.slane %v3404_v4, 5  ;;  %v3418_v13 = vrot.slane %v3405_v43, 9  ;;  %v4234_v3 = vld [vmem:[%s5045_s3 + $0x1e8] sm:$0xff]  }
 0x153   : > { %3852 = vmatpush3.bf16.msra.mxu1 %v4209_v62  ;;  %v3536_v14 = vcombine.low %v1518_v7, %v1522_v10  ;;  %v1023_v15 = vrot.slane %v3406_v8, 5  ;;  %v3489_v18 = vcombine.low %v1464_v6, %v1464_v6  ;;  %v3490_v19 = vcombine.high %v1464_v6, %v1464_v6  ;;  %v1300_v62 = vld [vmem:[#allocation2 + $0x18] sm:$0x1f] }
 0x154   : > { %3853 = vmatprep.subr.bf16.mxu1 %v4210_v1  ;;  %v1020_v21 = vsel %vm4556_vm7, %v3417_v11, %v1019_v12  ;;  %v3499_v23 = vrot.slane %v3487_v59, 9  ;;  %v1525_v24 = vrot.slane %v3488_v9, 5  ;;  %v3407_v27 = vcombine.low %v962_v52, %v962_v52  ;;  %v4235_v12 = vld [vmem:[%s5045_s3 + $0x1a8] sm:$0xff]  }
 0x155   : > { %v1024_v26 = vsel %vm4556_vm7, %v3418_v13, %v1023_v15  ;;  %v3500_v33 = vrot.slane %v3489_v18, 9  ;;  %v1529_v34 = vrot.slane %v3490_v19, 5  ;;  %v3408_v36 = vcombine.high %v962_v52, %v962_v52  ;;  %v1301_v52 = vld [vmem:[#allocation2 + $0x20] sm:$0x1f] }
 0x156   : > { %v3512_v37 = vcombine.low %v1020_v21, %v1024_v26  ;;  %v1526_v40 = vsel %vm4556_vm7, %v3499_v23, %v1525_v24  ;;  %v3409_v42 = vcombine.low %v963_v20, %v963_v20  ;;  %v3410_v44 = vcombine.high %v963_v20, %v963_v20  ;;  %v1302_v23 = vld [vmem:[#allocation2 + $0x28] sm:$0x1f]  ;;  %v4240_v24 = vld [vmem:[%s5045_s3 + $0x1f0] sm:$0xff]  }
 0x157   : > { %3854 = vmatpush3.bf16.msra.mxu1 %v4219_v16  ;;  %v1530_v45 = vsel %vm4556_vm7, %v3500_v33, %v1529_v34  ;;  %v3419_v47 = vrot.slane %v3407_v27, 9  ;;  %v1027_v39 = vrot.slane %v3408_v36, 5  ;;  %v3491_v57 = vcombine.low %v1465_v29, %v1465_v29  ;;  %v4233_v16 = vld [vmem:[#allocation2 + $0x38] ss:$8 sps:$4 sm:$0xff]   ;;  %v4824_v33 = vld [vmem:[#allocation2 + $0x30] sm:$0x1f] }
 0x158   : > { %2396 = vmatmul.mubr.bf16.gmra.mrb[20].mxu1 %v3512_v37  ;;  %v3537_v51 = vcombine.low %v1526_v40, %v1530_v45  ;;  %3855 = vmatprep.subr.bf16.mxu1 %v4225_v25  ;;  %v3420_v53 = vrot.slane %v3409_v42, 9  ;;  %v1031_v54 = vrot.slane %v3410_v44, 5  ;;  %v3492_v56 = vcombine.high %v1465_v29, %v1465_v29 }
 0x159   : > { %3984 = vmatmul.mubr.bf16.vlgmr.msra.gmra.mrb[36].mxu0 %v3536_v14  ;;  %2403 = vmatprep.mubr.bf16.mxu1 %v4224_v46  ;;  %v3501_v60 = vrot.slane %v3491_v57, 9  ;;  %v1538_v31 = vsel %vm4556_vm7, %v4577_v49, %v4580_v58  ;;  %v3411_v32 = vcombine.low %v964_v38, %v964_v38  ;;  %v3412_v48 = vcombine.high %v964_v38, %v964_v38  ;;  %v4232_v49 = vld [vmem:[%s5045_s3 + $0x1a0] sm:$0xff]   ;;  %v4245_v38 = vld [vmem:[%s5045_s3 + $0x1b0] sm:$0xff]   ;;  %v4250_v46 = vld [vmem:[%s5045_s3 + $0x1f8] sm:$0xff]  }
 0x15a   : > { %3987 = vmatprep.mubr.bf16.mxu0 %v3537_v51  ;;  %v1028_v61 = vsel %vm4556_vm7, %v3419_v47, %v1027_v39  ;;  %v1533_v5 = vrot.slane %v3492_v56, 5  ;;  %v3413_v55 = vcombine.low %v965_v50, %v965_v50  ;;  %v3414_v22 = vcombine.high %v965_v50, %v965_v50 }
 0x15b   : > { %3856 = vmatpush3.bf16.msra.mxu1 %v4226_v41  ;;  %v1032_v0 = vsel %vm4556_vm7, %v3420_v53, %v1031_v54  ;;  %v3421_v58 = vrot.slane %v3411_v32, 9  ;;  %v1035_v1 = vrot.slane %v3412_v48, 5  ;;  %v3463_v2 = vcombine.low %v1299_v17, %v1299_v17  ;;  %v1304_v54 = vld [vmem:[#allocation2 + $0x38] sm:$0x1f] }
 0x15c   : > { %3857 = vmatprep.subr.bf16.mxu1 %v4227_v28  ;;  %v1534_v4 = vsel %vm4556_vm7, %v3501_v60, %v1533_v5  ;;  %v3422_v43 = vrot.slane %v3413_v55, 9  ;;  %v1039_v6 = vrot.slane %v3414_v22, 5  ;;  %v3464_v7 = vcombine.high %v1299_v17, %v1299_v17  ;;  %v4251_v22 = vld [vmem:[%s5045_s3 + $0x1b8] sm:$0xff]  }
 0x15d   : > { %v3538_v8 = vcombine.low %v1534_v4, %v1538_v31  ;;  %v3465_v59 = vcombine.low %v1300_v62, %v1300_v62  ;;  %v3466_v9 = vcombine.high %v1300_v62, %v1300_v62  ;;  %v4812_v10 = vcombine.low %v4798_v63, %v4798_v63 }
 0x15e   : > { %v3513_v11 = vcombine.low %v1028_v61, %v1032_v0  ;;  %v1348_v13 = vshrl.u32 %v3463_v2, 16  ;;  %v1351_v14 = vshll.u32 %v3463_v2, 16  ;;  %v1357_v15 = vshll.u32 %v3464_v7, 16 }
 0x15f   : > { %3858 = vmatpush3.bf16.msra.mxu1 %v4232_v49  ;;  %v1036_v18 = vsel %vm4556_vm7, %v3421_v58, %v1035_v1  ;;  %v1040_v19 = vsel %vm4556_vm7, %v3422_v43, %v1039_v6  ;;  %v1362_v20 = vshrl.u32 %v3465_v59, 16  ;;  %v1365_v21 = vshll.u32 %v3465_v59, 16 }
 0x160   : > { %2404 = vmatmul.mubr.bf16.gmra.mrb[24].mxu1 %v3513_v11  ;;  %3859 = vmatprep.subr.bf16.mxu1 %v4234_v3  ;;  %v1350_v25 = vrot.slane %v1348_v13, 4  ;;  %v1353_v27 = vrot.slane %v1351_v14, 5  ;;  %v1371_v29 = vshll.u32 %v3466_v9, 16  ;;  %v3467_v26 = vcombine.low %v1301_v52, %v1301_v52 }
 0x161   : > { %2411 = vmatprep.mubr.bf16.mxu1 %v4233_v16  ;;  %3988 = vmatmul.mubr.bf16.gmra.mrb[40].mxu0 %v3538_v8  ;;  %v1359_v34 = vrot.slane %v1357_v15, 5  ;;  %v1364_v35 = vrot.slane %v1362_v20, 4  ;;  %v1367_v36 = vrot.slane %v1365_v21, 5  ;;  %v3468_v37 = vcombine.high %v1301_v52, %v1301_v52  ;;  %v1305_v8 = vld [vmem:[#allocation2 + $0x40] sm:$0x1f] }
 0x162   : > { %v1354_v40 = vor.u32 %v1353_v27, %v1350_v25  ;;  %v3469_v41 = vcombine.low %v1302_v23, %v1302_v23  ;;  %v3470_v42 = vcombine.high %v1302_v23, %v1302_v23  ;;  %v1376_v44 = vshrl.u32 %v3467_v26, 16  ;;  %v4252_v25 = vld [vmem:[#allocation2 + $0x10] ss:$8 sps:$4 sm:$0xff]  }
 0x163   : > { %3860 = vmatpush3.bf16.msra.mxu1 %v4235_v12  ;;  %v1368_v45 = vor.u32 %v1367_v36, %v1364_v35  ;;  %v1379_v47 = vshll.u32 %v3467_v26, 16  ;;  %v1385_v39 = vshll.u32 %v3468_v37, 16  ;;  %v3471_v57 = vcombine.low %v4824_v33, %v4824_v33 }
 0x164   : > { %3861 = vmatprep.subr.bf16.mxu1 %v4240_v24  ;;  %v1355_v50 = vrot.slane %v1354_v40, 4  ;;  %v1378_v51 = vrot.slane %v1376_v44, 4  ;;  %v1390_v28 = vshrl.u32 %v3469_v41, 16  ;;  %v1393_v53 = vshll.u32 %v3469_v41, 16 }
 0x165   : > { %v1369_v56 = vrot.slane %v1368_v45, 4  ;;  %v1373_v17 = vrot.slane %v1371_v29, 5  ;;  %v1381_v60 = vrot.slane %v1379_v47, 5  ;;  %v1399_v31 = vshll.u32 %v3470_v42, 16 }
 0x166   : > { %v3514_v32 = vcombine.low %v1036_v18, %v1040_v19  ;;  %v1360_v48 = vsel %vm4548_vm6, %v1355_v50, %v1359_v34  ;;  %v1392_v61 = vrot.slane %v1390_v28, 4  ;;  %v1395_v5 = vrot.slane %v1393_v53, 5  ;;  %v4257_v50 = vld [vmem:[#allocation2 + $0x20] ss:$8 sps:$4 sm:$0xff]  }
 0x167   : > { %3862 = vmatpush3.bf16.msra.mxu1 %v4245_v38  ;;  %v1374_v55 = vsel %vm4548_vm6, %v1369_v56, %v1373_v17  ;;  %v1382_v62 = vor.u32 %v1381_v60, %v1378_v51  ;;  %v1387_v0 = vrot.slane %v1385_v39, 5  ;;  %v3473_v49 = vcombine.low %v1304_v54, %v1304_v54 }
 0x168   : > { %2412 = vmatmul.mubr.bf16.gmra.mrb[28].mxu1 %v3514_v32  ;;  %v3531_v58 = vcombine.low %v1360_v48, %v1374_v55  ;;  %3863 = vmatprep.subr.bf16.mxu1 %v4250_v46  ;;  %v1396_v1 = vor.u32 %v1395_v5, %v1392_v61  ;;  %v3472_v2 = vcombine.high %v4824_v33, %v4824_v33  ;;  %v1404_v3 = vshrl.u32 %v3471_v57, 16  ;;  %v4267_v48 = vld [vmem:[#allocation2 + $0x40] ss:$8 sps:$4 sm:$0xff]  }
 0x169   : > { %v1383_v4 = vrot.slane %v1382_v62, 4  ;;  %v1401_v43 = vrot.slane %v1399_v31, 5  ;;  %v1407_v6 = vshll.u32 %v3471_v57, 16  ;;  %v1418_v7 = vshrl.u32 %v3473_v49, 16  ;;  %v4262_v31 = vld [vmem:[#allocation2 + $0x30] ss:$8 sps:$4 sm:$0xff]  }
 0x16a   : > { %2517 = vmatprep.mubr.bf16.mxu1 %v3531_v58  ;;  %v1397_v59 = vrot.slane %v1396_v1, 4  ;;  %v3474_v9 = vcombine.high %v1304_v54, %v1304_v54  ;;  %v1406_v52 = vrot.slane %v1404_v3, 4  ;;  %v1421_v11 = vshll.u32 %v3473_v49, 16  ;;  %v4268_v61 = vld [vmem:[%s5047_s5] sm:$0xff]   ;;  %v4269_v55 = vld [vmem:[%s5047_s5 + $0x8] sm:$0xff]   ;;  %v4271_v3 = vld [vmem:[%s5047_s5 + $0x18] sm:$0xff]  }
 0x16b   : > { %3864 = vmatpush3.bf16.msra.mxu1 %v4251_v22  ;;  %v1409_v12 = vrot.slane %v1407_v6, 5  ;;  %v1420_v13 = vrot.slane %v1418_v7, 4  ;;  %v1446_v14 = vshrl.u32 %v4812_v10, 16  ;;  %v1449_v15 = vshll.u32 %v4812_v10, 16  ;;  %v4276_v6 = vld [vmem:[%s5049_s7] sm:$0xff]  }
 0x16c   : > { %v1388_v16 = vsel %vm4548_vm6, %v1383_v4, %v1387_v0  ;;  %v1402_v18 = vsel %vm4548_vm6, %v1397_v59, %v1401_v43  ;;  %v1423_v19 = vrot.slane %v1421_v11, 5  ;;  %v3475_v20 = vcombine.low %v1305_v8, %v1305_v8  ;;  %v4272_v4 = vld [vmem:[%s5047_s5 + $0x20] sm:$0xff]  }
 0x16d   : > { %v1410_v21 = vor.u32 %v1409_v12, %v1406_v52  ;;  %v1413_v23 = vshll.u32 %v3472_v2, 16  ;;  %v3478_v24 = vcombine.high %v4798_v63, %v4798_v63  ;;  %v1427_v29 = vshll.u32 %v3474_v9, 16  ;;  %v4270_v2 = vld [vmem:[%s5047_s5 + $0x10] sm:$0xff]   ;;  %v4277_v52 = vld [vmem:[%s5049_s7 + $0x8] sm:$0xff]  }
 0x16e   : > { %v1424_v27 = vor.u32 %v1423_v19, %v1420_v13  ;;  %v1432_v26 = vshrl.u32 %v3475_v20, 16  ;;  %v1435_v33 = vshll.u32 %v3475_v20, 16  ;;  %v3532_v34 = vcombine.low %v1388_v16, %v1402_v18  ;;  %v4278_v19 = vld [vmem:[%s5049_s7 + $0x10] sm:$0xff]  }
 0x16f   : > { %v3476_v10 = vcombine.high %v1305_v8, %v1305_v8  ;;  %v1448_v35 = vrot.slane %v1446_v14, 4  ;;  %v1451_v36 = vrot.slane %v1449_v15, 5  ;;  %v1411_v37 = vrot.slane %v1410_v21, 4  ;;  %v4273_v8 = vld [vmem:[%s5047_s5 + $0x28] sm:$0xff]   ;;  %v4274_v15 = vld [vmem:[%s5047_s5 + $0x30] sm:$0xff]  }
 0x170   : > { %2518 = vmatmul.mubr.bf16.vlgmr.msra.gmra.mrb[32].mxu1 %v4252_v25  ;;  %v1425_v40 = vrot.slane %v1424_v27, 4  ;;  %v1434_v41 = vrot.slane %v1432_v26, 4  ;;  %v1437_v42 = vrot.slane %v1435_v33, 5  ;;  %v1415_v44 = vrot.slane %v1413_v23, 5  ;;  %v4275_v23 = vld [vmem:[%s5047_s5 + $0x38] sm:$0xff]   ;;  %v4280_v25 = vld [vmem:[%s5049_s7 + $0x20] sm:$0xff]  }
 0x171   : > { %2525 = vmatprep.mubr.bf16.mxu1 %v3532_v34  ;;  %v1429_v38 = vrot.slane %v1427_v29, 5  ;;  %v1452_v45 = vor.u32 %v1451_v36, %v1448_v35  ;;  %v1455_v46 = vshll.u32 %v3478_v24, 16  ;;  %v1441_v57 = vshll.u32 %v3476_v10, 16  ;;  %v4279_v24 = vld [vmem:[%s5049_s7 + $0x18] sm:$0xff]   ;;  %v4281_v35 = vld [vmem:[%s5049_s7 + $0x28] sm:$0xff]  }
 0x172   : > { %v1416_v63 = vsel %vm4548_vm6, %v1411_v37, %v1415_v44  ;;  %v1438_v39 = vor.u32 %v1437_v42, %v1434_v41  ;;  %v4297_v5 = vmov 0.0  }
 0x173   : > { %v1430_v47 = vsel %vm4548_vm6, %v1425_v40, %v1429_v38  ;;  %v1443_v53 = vrot.slane %v1441_v57, 5  ;;  %v1453_v54 = vrot.slane %v1452_v45, 4  ;;  %v1457_v56 = vrot.slane %v1455_v46, 5  ;;  %3991 = vmatprep.subr.bf16.mxu1 %v4297_v5  ;;  %4011 = vmatprep.subr.bf16.mxu0 %v4297_v5 }
 0x174   : > { %v3533_v51 = vcombine.low %v1416_v63, %v1430_v47  ;;  %v1439_v28 = vrot.slane %v1438_v39, 4  ;;  %3992 = vmatpush3.bf16.msra.mxu1 %v4268_v61  ;;  %4027 = vmatprep.mubr.msk.bf16.mxu0 %vm4298_vm8, %v4297_v5 }
 0x175   : > { %v1458_v60 = vsel %vm4548_vm6, %v1453_v54, %v1457_v56  ;;  %3993 = vmatprep.subr.bf16.mxu1 %v4297_v5  ;;  %4012 = vmatpush3.bf16.msra.mxu0 %v4276_v6  ;;  %v3539_v56 = vld [vmem:[%s5046_s4] ss:$0 sm:$0xff] }
 0x176   : > { %v1444_v17 = vsel %vm4548_vm6, %v1439_v28, %v1443_v53  ;;  %4013 = vmatprep.subr.bf16.mxu0 %v4297_v5 }
 0x177   : > { %v3534_v32 = vcombine.low %v1444_v17, %v1458_v60 }
 0x178   : > { %2526 = vmatmul.mubr.bf16.gmra.mrb[36].mxu1 %v4257_v50 }
 0x179   : > { %2533 = vmatprep.mubr.bf16.mxu1 %v3533_v51  ;;  %3994 = vmatpush3.bf16.msra.mxu1 %v4269_v55 }
 0x17a   : > { %3995 = vmatprep.subr.bf16.mxu1 %v4297_v5  ;;  %4014 = vmatpush3.bf16.msra.mxu0 %v4277_v52 }
 0x17b   : > { %4015 = vmatprep.subr.bf16.mxu0 %v4297_v5 }
 0x17d   : > { %3996 = vmatpush3.bf16.msra.mxu1 %v4270_v2 }
 0x17e   : > { %3997 = vmatprep.subr.bf16.mxu1 %v4297_v5  ;;  %4016 = vmatpush3.bf16.msra.mxu0 %v4278_v19 }
 0x17f   : > { %4017 = vmatprep.subr.bf16.mxu0 %v4297_v5 }
 0x180   : > { %2534 = vmatmul.mubr.bf16.gmra.mrb[40].mxu1 %v4262_v31 }
 0x181   : > { %2541 = vmatprep.mubr.bf16.mxu1 %v3534_v32  ;;  %3998 = vmatpush3.bf16.msra.mxu1 %v4271_v3 }
 0x182   : > { %3999 = vmatprep.subr.bf16.mxu1 %v4297_v5  ;;  %4018 = vmatpush3.bf16.msra.mxu0 %v4279_v24 }
 0x183   : > { %4019 = vmatprep.subr.bf16.mxu0 %v4297_v5 }
 0x185   : > { %4000 = vmatpush3.bf16.msra.mxu1 %v4272_v4 }
 0x186   : > { %4001 = vmatprep.subr.bf16.mxu1 %v4297_v5  ;;  %4020 = vmatpush3.bf16.msra.mxu0 %v4280_v25 }
 0x187   : > { %4021 = vmatprep.subr.bf16.mxu0 %v4297_v5 }
 0x188   : > { %2542 = vmatmul.mubr.bf16.gmra.mrb[44].mxu1 %v4267_v48 }
 0x189   : > { %4007 = vmatprep.mubr.msk.bf16.mxu1 %vm4298_vm8, %v4297_v5  ;;  %4002 = vmatpush3.bf16.msra.mxu1 %v4273_v8 }
 0x18a   : > { %4003 = vmatprep.subr.bf16.mxu1 %v4297_v5  ;;  %4022 = vmatpush3.bf16.msra.mxu0 %v4281_v35 }
 0x18b   : > { %4023 = vmatprep.subr.bf16.mxu0 %v4297_v5 }
 0x18d   : > { %4004 = vmatpush3.bf16.msra.mxu1 %v4274_v15 }
 0x18e   : > { %4005 = vmatprep.subr.bf16.mxu1 %v4297_v5 }
 0x191   : > { %4006 = vmatpush3.bf16.msra.mxu1 %v4275_v23 }
 0x1ec   : > { %v3745_v22 = vpop.f32.mrb[0].mxu1 }
 0x1ed   : > { %v3746_v62 = vpop.f32.mrb[1].mxu1 }
 0x1ee   : > { %v4869_v0 = vadd.f32 %v3746_v62, %v3745_v22  ;;  %v3748_v49 = vpop.f32.mrb[2].mxu1 }
 0x1ef   : > { %v3749_v58 = vpop.f32.mrb[3].mxu1 }
 0x1f0   : > { %v4871_v1 = vadd.f32 %v3749_v58, %v3748_v49  ;;  %v2325_v31 = vadd.f32 %v4869_v0, %v3539_v56 }
 0x1f2   : > { %v2328_v22 = vadd.f32 %v4871_v1, %v3539_v56 }
 0x1fa   : > { %v3751_v43 = vpop.f32.mrb[4].mxu1 }
 0x1fb   : > { %v3752_v7 = vpop.f32.mrb[5].mxu1 }
 0x1fc   : > { %v4892_v59 = vadd.f32 %v3752_v7, %v3751_v43  ;;  %v3754_v9 = vpop.f32.mrb[6].mxu1 }
 0x1fd   : > { %v3755_v11 = vpop.f32.mrb[7].mxu1 }
 0x1fe   : > { %v3825_v12 = vpop.f32.mrb[20].mxu0  ;;  %v4899_v13 = vadd.f32 %v3755_v11, %v3754_v9  ;;  %v2333_v11 = vadd.f32 %v4892_v59, %v3539_v56 }
 0x1ff   : > { %v3826_v14 = vpop.f32.mrb[21].mxu0 }
 0x200   : > { %v4904_v16 = vadd.f32 %v3826_v14, %v3825_v12  ;;  %v3828_v18 = vpop.f32.mrb[22].mxu0  ;;  %v2336_v19 = vadd.f32 %v4899_v13, %v3539_v56 }
 0x201   : > { %v3829_v20 = vpop.f32.mrb[23].mxu0 }
 0x202   : > { %v3830_v21 = vadd.f32 %v3829_v20, %v3828_v18 }
 0x209   : > { %v3757_v27 = vpop.f32.mrb[8].mxu1 }
 0x20a   : > { %v3758_v29 = vpop.f32.mrb[9].mxu1 }
 0x20b   : > { %v4923_v26 = vadd.f32 %v3758_v29, %v3757_v27  ;;  %v3760_v33 = vpop.f32.mrb[10].mxu1 }
 0x20c   : > { %v3831_v34 = vpop.f32.mrb[24].mxu0  ;;  %v3761_v10 = vpop.f32.mrb[11].mxu1 }
 0x20d   : > { %v3832_v36 = vpop.f32.mrb[25].mxu0  ;;  %v4928_v37 = vadd.f32 %v3761_v10, %v3760_v33 }
 0x20e   : > { %v3833_v40 = vadd.f32 %v3832_v36, %v3831_v34  ;;  %v3834_v41 = vpop.f32.mrb[26].mxu0  ;;  %v2341_v34 = vadd.f32 %v4923_v26, %v3539_v56 }
 0x20f   : > { %v3835_v42 = vpop.f32.mrb[27].mxu0  ;;  %v2344_v13 = vadd.f32 %v4928_v37, %v3539_v56 }
 0x210   : > { %v3836_v44 = vadd.f32 %v3835_v42, %v3834_v41 }
 0x217   : > { %v3763_v38 = vpop.f32.mrb[12].mxu1 }
 0x218   : > { %v3764_v45 = vpop.f32.mrb[13].mxu1 }
 0x219   : > { %v4932_v46 = vadd.f32 %v3764_v45, %v3763_v38  ;;  %v3766_v63 = vpop.f32.mrb[14].mxu1 }
 0x21a   : > { %v3837_v47 = vpop.f32.mrb[28].mxu0  ;;  %v3767_v39 = vpop.f32.mrb[15].mxu1 }
 0x21b   : > { %v3838_v57 = vpop.f32.mrb[29].mxu0  ;;  %v3768_v50 = vadd.f32 %v3767_v39, %v3766_v63 }
 0x21c   : > { %v3839_v51 = vadd.f32 %v3838_v57, %v3837_v47  ;;  %v3840_v28 = vpop.f32.mrb[30].mxu0  ;;  %v2349_v57 = vadd.f32 %v4932_v46, %v3539_v56 }
 0x21d   : > { %v3841_v53 = vpop.f32.mrb[31].mxu0 }
 0x21e   : > { %v3842_v54 = vadd.f32 %v3841_v53, %v3840_v28 }
 0x221   : > { %v3785_v17 = vpop.f32.mrb[16].mxu1 }
 0x222   : > { %v3786_v60 = vpop.f32.mrb[17].mxu1 }
 0x223   : > { %v3787_v32 = vadd.f32 %v3786_v60, %v3785_v17  ;;  %v3788_v48 = vpop.f32.mrb[18].mxu1  ;;  %v2352_v17 = vadd.f32 %v3768_v50, %v3539_v56 }
 0x224   : > { %v3843_v61 = vpop.f32.mrb[32].mxu0  ;;  %v3789_v55 = vpop.f32.mrb[19].mxu1 }
 0x225   : > { %v3844_v62 = vpop.f32.mrb[33].mxu0  ;;  %v2390_v49 = vadd.f32 %v3787_v32, %v2325_v31  ;;  %v3790_v58 = vadd.f32 %v3789_v55, %v3788_v48 }
 0x226   : > { %v3845_v2 = vadd.f32 %v3844_v62, %v3843_v61  ;;  %v3846_v3 = vpop.f32.mrb[34].mxu0 }
 0x227   : > { %v3847_v4 = vpop.f32.mrb[35].mxu0  ;;  %v2393_v43 = vadd.f32 %v3790_v58, %v2328_v22  ;;  %v2455_v6 = vadd.f32 %v4904_v16, %v2390_v49 }
 0x228   : > { %v3848_v7 = vadd.f32 %v3847_v4, %v3846_v3 }
 0x229   : > { %v2458_v8 = vadd.f32 %v3830_v21, %v2393_v43 }
 0x22b   : > { %v3791_v9 = vpop.f32.mrb[20].mxu1 }
 0x22c   : > { %v4940_v52 = vpop.f32.mrb[36].mxu0  ;;  %v3792_v0 = vpop.f32.mrb[21].mxu1 }
 0x22d   : > { %v2584_v12 = vpop.f32.mrb[37].mxu0  ;;  %v3793_v14 = vadd.f32 %v3792_v0, %v3791_v9  ;;  %v3794_v1 = vpop.f32.mrb[22].mxu1 }
 0x22e   : > { %v3986_v15 = vpop.f32.mrb[38].mxu0  ;;  %v3795_v18 = vpop.f32.mrb[23].mxu1 }
 0x22f   : > { %v2398_v20 = vadd.f32 %v3793_v14, %v2333_v11  ;;  %v2587_v23 = vpop.f32.mrb[39].mxu0  ;;  %v3796_v24 = vadd.f32 %v3795_v18, %v3794_v1 }
 0x231   : > { %v2401_v25 = vadd.f32 %v3796_v24, %v2336_v19  ;;  %v2463_v16 = vadd.f32 %v3833_v40, %v2398_v20 }
 0x233   : > { %v3797_v27 = vpop.f32.mrb[24].mxu1  ;;  %v2466_v21 = vadd.f32 %v3836_v44, %v2401_v25 }
 0x234   : > { %v3798_v29 = vpop.f32.mrb[25].mxu1  ;;  %v4944_v33 = vpop.f32.mrb[40].mxu0 }
 0x235   : > { %v3799_v59 = vadd.f32 %v3798_v29, %v3797_v27  ;;  %v3800_v10 = vpop.f32.mrb[26].mxu1  ;;  %v2600_v35 = vpop.f32.mrb[41].mxu0 }
 0x236   : > { %v3801_v36 = vpop.f32.mrb[27].mxu1  ;;  %v4947_v41 = vpop.f32.mrb[42].mxu0 }
 0x237   : > { %v2406_v42 = vadd.f32 %v3799_v59, %v2341_v34  ;;  %v3802_v38 = vadd.f32 %v3801_v36, %v3800_v10  ;;  %v2603_v45 = vpop.f32.mrb[43].mxu0 }
 0x239   : > { %v2409_v63 = vadd.f32 %v3802_v38, %v2344_v13  ;;  %v2471_v40 = vadd.f32 %v3839_v51, %v2406_v42 }
 0x23b   : > { %v3803_v47 = vpop.f32.mrb[28].mxu1  ;;  %v2474_v44 = vadd.f32 %v3842_v54, %v2409_v63 }
 0x23c   : > { %v3804_v39 = vpop.f32.mrb[29].mxu1 }
 0x23d   : > { %v3805_v28 = vadd.f32 %v3804_v39, %v3803_v47  ;;  %v3806_v26 = vpop.f32.mrb[30].mxu1 }
 0x23e   : > { %v3807_v53 = vpop.f32.mrb[31].mxu1 }
 0x23f   : > { %v2414_v60 = vadd.f32 %v3805_v28, %v2349_v57  ;;  %v3808_v31 = vadd.f32 %v3807_v53, %v3806_v26 }
 0x241   : > { %v2417_v32 = vadd.f32 %v3808_v31, %v2352_v17  ;;  %v2479_v48 = vadd.f32 %v3845_v2, %v2414_v60 }
 0x243   : > { %v3865_v61 = vpop.f32.mrb[32].mxu1  ;;  %v2482_v37 = vadd.f32 %v3848_v7, %v2417_v32 }
 0x244   : > { %v3866_v55 = vpop.f32.mrb[33].mxu1 }
 0x245   : > { %v3867_v22 = vadd.f32 %v3866_v55, %v3865_v61  ;;  %v3868_v62 = vpop.f32.mrb[34].mxu1 }
 0x246   : > { %v3869_v49 = vpop.f32.mrb[35].mxu1 }
 0x247   : > { %v2520_v51 = vadd.f32 %v3867_v22, %v2455_v6  ;;  %v3870_v58 = vadd.f32 %v3869_v49, %v3868_v62 }
 0x249   : > { %v2585_v54 = vadd.f32 %v2584_v12, %v2520_v51  ;;  %v2523_v3 = vadd.f32 %v3870_v58, %v2458_v8 }
 0x24b   : > { %v2588_v4 = vadd.f32 %v2587_v23, %v2523_v3  ;;  %v3871_v46 = vpop.f32.mrb[36].mxu1  ;;  %v2615_v9 = vmax.f32 %v2585_v54, 0.0 }
 0x24c   : > { %v3872_v43 = vpop.f32.mrb[37].mxu1 }
 0x24d   : > { %v2616_v0 = vmax.f32 %v2588_v4, 0.0  ;;  %v3873_v50 = vadd.f32 %v3872_v43, %v3871_v46  ;;  %v3874_v56 = vpop.f32.mrb[38].mxu1 }
 0x24e   : > { %v3875_v11 = vpop.f32.mrb[39].mxu1 }
 0x24f   : > { %v2623_v14 = vadd.f32 %v2616_v0, %v2615_v9  ;;  %v2528_v2 = vadd.f32 %v3873_v50, %v2463_v16  ;;  %v3876_v1 = vadd.f32 %v3875_v11, %v3874_v56  ;;  %v3025_v7 = vpack.c.bf16 %v2616_v0, %v2615_v9  ;;  %v2762_v11 = vld [vmem:[%s5050_s8] sm:$0x1] }
 0x250   : > { %v4299_v56 = vmov 0  }
 0x251   : > { %v2593_v18 = vadd.f32 %v4940_v52, %v2528_v2  ;;  %v2531_v19 = vadd.f32 %v3876_v1, %v2466_v21  ;;  %4069 = vset.pattern.permute.xlu1 %v4299_v56 }
 0x253   : > { %v2617_v20 = vmax.f32 %v2593_v18, 0.0  ;;  %v2596_v6 = vadd.f32 %v3986_v15, %v2531_v19  ;;  %v3877_v24 = vpop.f32.mrb[40].mxu1 }
 0x254   : > { %v3878_v12 = vpop.f32.mrb[41].mxu1 }
 0x255   : > { %v2624_v8 = vadd.f32 %v2623_v14, %v2617_v20  ;;  %v2618_v23 = vmax.f32 %v2596_v6, 0.0  ;;  %v3879_v25 = vadd.f32 %v3878_v12, %v3877_v24  ;;  %v3880_v27 = vpop.f32.mrb[42].mxu1 }
 0x256   : > { %v3881_v29 = vpop.f32.mrb[43].mxu1 }
 0x257   : > { %v2625_v34 = vadd.f32 %v2624_v8, %v2618_v23  ;;  %v4952_v59 = vpack.c.bf16 %v2618_v23, %v2617_v20  ;;  %v2536_v10 = vadd.f32 %v3879_v25, %v2471_v40  ;;  %v3882_v36 = vadd.f32 %v3881_v29, %v3880_v27 }
 0x259   : > { %v2601_v16 = vadd.f32 %v2600_v35, %v2536_v10  ;;  %v2539_v13 = vadd.f32 %v3882_v36, %v2474_v44 }
 0x25b   : > { %v2619_v42 = vmax.f32 %v2601_v16, 0.0  ;;  %v2604_v38 = vadd.f32 %v2603_v45, %v2539_v13  ;;  %v3883_v52 = vpop.f32.mrb[44].mxu1 }
 0x25c   : > { %v3884_v21 = vpop.f32.mrb[45].mxu1 }
 0x25d   : > { %v2626_v63 = vadd.f32 %v2625_v34, %v2619_v42  ;;  %v2620_v15 = vmax.f32 %v2604_v38, 0.0  ;;  %v3885_v47 = vadd.f32 %v3884_v21, %v3883_v52  ;;  %v3886_v39 = vpop.f32.mrb[46].mxu1 }
 0x25e   : > { %v3887_v57 = vpop.f32.mrb[47].mxu1 }
 0x25f   : > { %v2627_v28 = vadd.f32 %v2626_v63, %v2620_v15  ;;  %v2544_v26 = vadd.f32 %v3885_v47, %v2479_v48  ;;  %v3888_v53 = vadd.f32 %v3887_v57, %v3886_v39  ;;  %v4954_v17 = vpack.c.bf16 %v2620_v15, %v2619_v42  ;;  %v3650_v63 = vld [vmem:[%s5051_s9] sm:$0xff]  }
 0x260   : > { %v3651_v15 = vunpack.c.l.bf16 %v3650_v63  ;;  %v3652_v47 = vunpack.c.h.bf16 %v3650_v63 }
 0x261   : > { %v2609_v60 = vadd.f32 %v4944_v33, %v2544_v26  ;;  %v2547_v40 = vadd.f32 %v3888_v53, %v2482_v37  ;;  %v4282_v33 = vld [vmem:[%s5049_s7 + $0x30] sm:$0xff]   ;;  %v2655_v37 = vld [vmem:[%s5048_s6] sm:$0x1]  ;;  %v3701_v53 = vld [vmem:[%s5051_s9 + $0x8] sm:$0xff]  }
 0x262   : > { %4024 = vmatpush3.bf16.msra.mxu0 %v4282_v33  ;;  %v3703_v33 = vld [vmem:[%s5051_s9 + $0x18] sm:$0xff]  }
 0x263   : > { %v2621_v31 = vmax.f32 %v2609_v60, 0.0  ;;  %v2612_v35 = vadd.f32 %v4947_v41, %v2547_v40  ;;  %v4283_v41 = vld [vmem:[%s5049_s7 + $0x38] sm:$0xff]   ;;  %4025 = vmatprep.subr.bf16.mxu0 %v4297_v5 }
 0x265   : > { %v2628_v44 = vadd.f32 %v2627_v28, %v2621_v31  ;;  %v2622_v45 = vmax.f32 %v2612_v35, 0.0  ;;  %v3656_v35 = vunpack.c.h.bf16 %v3701_v53 }
 0x266   : > { %4026 = vmatpush3.bf16.msra.mxu0 %v4283_v41 }
 0x267   : > { %v2629_v32 = vadd.f32 %v2628_v44, %v2622_v45  ;;  %v4958_v61 = vpack.c.bf16 %v2622_v45, %v2621_v31  ;;  %v3655_v31 = vunpack.c.l.bf16 %v3701_v53 }
 0x269   : > { %v2630_v55 = vrot.slane %v2629_v32, 4 }
 0x26b   : > { %v2631_v22 = vadd.f32 %v2630_v55, %v2629_v32  ;;  %v3702_v55 = vld [vmem:[%s5051_s9 + $0x10] sm:$0xff]  }
 0x26d   : > { %v2632_v62 = vrot.slane %v2631_v22, 2 }
 0x26f   : > { %v2633_v49 = vadd.f32 %v2632_v62, %v2631_v22 }
 0x271   : > { %v2634_v51 = vrot.slane %v2633_v49, 1 }
 0x273   : > { %v2635_v48 = vadd.f32 %v2634_v51, %v2633_v49  ;;  %v3659_v49 = vunpack.c.l.bf16 %v3702_v55  ;;  %v3660_v51 = vunpack.c.h.bf16 %v3702_v55 }
 0x275   : > { %v2637_v58 = vmul.f32 0.015625, %v2635_v48 }
 0x277   : > { %v2638_v54 = vpack.c.bf16 %v2637_v58, %v2637_v58 }
 0x279   : > { %4008 = vmatmul.mubr.bf16.vlgmr.msra.gmra.mrb[48].mxu1 %v2638_v54 }
 0x27a   : > { %4047 = vmatprep.mubr.bf16.mxu1 %v3025_v7 }
 0x34c   : > { %v2738_v3 = vpop.f32.mrb[48].mxu1 }
 0x34d   : > { %v2739_v4 = vadd.f32 %v2738_v3, %v2655_v37  ;;  %v4009_v46 = vpop.f32.mrb[49].mxu1  ;;  %v3663_v3 = vunpack.c.l.bf16 %v3703_v33 }
 0x34e   : > { %v2741_v43 = vpop.f32.mrb[50].mxu1 }
 0x34f   : > { %v2744_v9 = vmax.f32 %v2739_v4, 0.0  ;;  %v4010_v0 = vpop.f32.mrb[51].mxu1  ;;  %v3664_v4 = vunpack.c.h.bf16 %v3703_v33  ;;  %v3109_v33 = vld [vmem:[%s4393_s17 + $0x28] sm:$0xf] }
 0x350   : > { %v3704_v0 = vld [vmem:[%s5051_s9 + $0x20] sm:$0xff]  }
 0x351   : > { %v2745_v50 = vpack.c.bf16 %v2744_v9, %v2744_v9 }
 0x353   : > { %4028 = vmatmul.mubr.bf16.vlgmr.msra.gmra.mrb[44].mxu0 %v2745_v50 }
 0x426   : > { %v2845_v5 = vpop.f32.mrb[44].mxu0 }
 0x427   : > { %v2846_v14 = vadd.f32 %v2845_v5, %v2762_v11  ;;  %v4029_v2 = vpop.f32.mrb[45].mxu0  ;;  %v3667_v11 = vunpack.c.l.bf16 %v3704_v0  ;;  %v3668_v5 = vunpack.c.h.bf16 %v3704_v0 }
 0x428   : > { %v2848_v1 = vpop.f32.mrb[46].mxu0 }
 0x429   : > { %v3628_v7 = vmul.f32 -1.442695, %v2846_v14  ;;  %v4030_v18 = vpop.f32.mrb[47].mxu0 }
 0x42b   : > { %4284 = vpow2.f32 %v3628_v7  ;;  %v3705_v7 = vld [vmem:[%s5051_s9 + $0x28] sm:$0xff]  }
 0x435   : > { %v4285_v19 = vpop.eup %4284 }
 0x436   : > { %v2854_v20 = vadd.f32 1.0, %v4285_v19 }
 0x438   : > { %4286 = vrcp.f32 %v2854_v20  ;;  %v3671_v20 = vunpack.c.l.bf16 %v3705_v7 }
 0x442   : > { %v4287_v6 = vpop.eup %4286 }
 0x443   : > { %2873 = vxpose.xlu0.b32.start.end [1/1] (short) %v4287_v6, 128  ;;  %v3672_v6 = vunpack.c.h.bf16 %v3705_v7 }
 0x46c   : > { %4068 = vset.pattern.permute.xlu0 %v4299_v56 }
 0x4c3   : > { %v2889_v24 = vpop.trf.xlu0 }
 0x4c4   : > { %2923 = vperm.xlu0 %4068, %v2889_v24  }
 0x4c7   : > { %v2890_v12 = vpop.trf.xlu0 }
 0x4c8   : > { %2928 = vperm.xlu1 %4069, %v2890_v12  }
 0x4cb   : > { %v2891_v8 = vpop.trf.xlu0 }
 0x4cc   : > { %2933 = vperm.xlu1 %4069, %v2891_v8  }
 0x4cf   : > { %v2892_v23 = vpop.trf.xlu0 }
 0x4d0   : > { %2938 = vperm.xlu1 %4069, %v2892_v23   ;;  %v3706_v23 = vld [vmem:[%s5051_s9 + $0x30] sm:$0xff]  }
 0x4d3   : > { %v2893_v25 = vpop.trf.xlu0 }
 0x4d4   : > { %2943 = vperm.xlu1 %4069, %v2893_v25  }
 0x4d7   : > { %v2894_v27 = vpop.trf.xlu0 }
 0x4d8   : > { %2948 = vperm.xlu1 %4069, %v2894_v27  }
 0x4db   : > { %v2895_v29 = vpop.trf.xlu0 }
 0x4dc   : > { %2953 = vperm.xlu1 %4069, %v2895_v29   ;;  %v3675_v29 = vunpack.c.l.bf16 %v3706_v23 }
 0x4df   : > { %v2896_v34 = vpop.trf.xlu0 }
 0x4e0   : > { %2958 = vperm.xlu1 %4069, %v2896_v34   ;;  %v3676_v34 = vunpack.c.h.bf16 %v3706_v23 }
 0x4e3   : > { %v2897_v10 = vpop.trf.xlu0 }
 0x4e4   : > { %2963 = vperm.xlu1 %4069, %v2897_v10  }
 0x4e7   : > { %v2898_v36 = vpop.trf.xlu0 }
 0x4e8   : > { %2968 = vperm.xlu1 %4069, %v2898_v36  }
 0x4eb   : > { %v2899_v16 = vpop.trf.xlu0 }
 0x4ec   : > { %2973 = vperm.xlu1 %4069, %v2899_v16  }
 0x4ef   : > { %v2900_v13 = vpop.trf.xlu0 }
 0x4f0   : > { %2978 = vperm.xlu1 %4069, %v2900_v13   ;;  %v3707_v13 = vld [vmem:[%s5051_s9 + $0x38] sm:$0xff]  }
 0x4f3   : > { %v2901_v42 = vpop.trf.xlu0 }
 0x4f4   : > { %2983 = vperm.xlu1 %4069, %v2901_v42  }
 0x4f7   : > { %v2902_v38 = vpop.trf.xlu0 }
 0x4f8   : > { %2988 = vperm.xlu1 %4069, %v2902_v38  }
 0x4fb   : > { %v2903_v52 = vpop.trf.xlu0 }
 0x4fc   : > { %2993 = vperm.xlu1 %4069, %v2903_v52   ;;  %v3679_v52 = vunpack.c.l.bf16 %v3707_v13 }
 0x4ff   : > { %v2904_v21 = vpop.trf.xlu0 }
 0x500   : > { %2998 = vperm.xlu1 %4069, %v2904_v21   ;;  %v3680_v21 = vunpack.c.h.bf16 %v3707_v13 }
 0x543   : > { %v2924_v39 = vpop.permute.xlu0 %2923 }
 0x544   : > { %v3001_v28 = vmul.f32 %v3651_v15, %v2924_v39 }
 0x547   : > { %v2929_v57 = vpop.permute.xlu1 %2928 }
 0x548   : > { %v3002_v26 = vmul.f32 %v3652_v47, %v2929_v57  ;;  %v3105_v57 = vld [vmem:[%s4393_s17 + $0x18] sm:$0xf] }
 0x549   : > { %v3146_v53 = vshrl.u32 %v3105_v57, 16 }
 0x54a   : > { %v3017_v60 = vpack.c.bf16 %v3002_v26, %v3001_v28  ;;  %v3101_v28 = vld [vmem:[%s4393_s17 + $0x8] sm:$0xf]  ;;  %v3107_v26 = vld [vmem:[%s4393_s17 + $0x20] sm:$0xf] }
 0x54b   : > { %v2934_v40 = vpop.permute.xlu1 %2933 }
 0x54c   : > { %4031 = vmatprep.subr.bf16.mxu1 %v3017_v60  ;;  %v3003_v45 = vmul.f32 %v3655_v31, %v2934_v40  ;;  %v3103_v40 = vld [vmem:[%s4393_s17 + $0x10] sm:$0xf]  ;;  %v3118_v31 = vshrl.u32 %v3101_v28, 16 }
 0x54d   : > { %4032 = vmatpush3.bf16.msra.mxu1 %v3017_v60  ;;  %v3149_v60 = vshll.u32 %v3105_v57, 16 }
 0x54f   : > { %v2939_v44 = vpop.permute.xlu1 %2938  ;;  %v3151_v55 = vrot.slane %v3149_v60, 5 }
 0x550   : > { %v3004_v32 = vmul.f32 %v3656_v35, %v2939_v44  ;;  %v3121_v35 = vshll.u32 %v3101_v28, 16  ;;  %v3106_v44 = vld [vmem:[%s4393_s17 + $0x1c] sm:$0xf] }
 0x552   : > { %v3018_v22 = vpack.c.bf16 %v3004_v32, %v3003_v45  ;;  %v3160_v45 = vshrl.u32 %v3107_v26, 16  ;;  %v3163_v32 = vshll.u32 %v3107_v26, 16 }
 0x553   : > { %v2944_v62 = vpop.permute.xlu1 %2943 }
 0x554   : > { %4033 = vmatprep.subr.bf16.mxu1 %v3018_v22  ;;  %v3005_v58 = vmul.f32 %v3659_v49, %v2944_v62  ;;  %v3120_v62 = vrot.slane %v3118_v31, 4  ;;  %v3123_v49 = vrot.slane %v3121_v35, 5  ;;  %v3629_v35 = vld [vmem:[%s5052_s10] ss:$0 sm:$0xff] }
 0x555   : > { %4034 = vmatpush3.bf16.msra.mxu1 %v3018_v22  ;;  %v3155_v22 = vshll.u32 %v3106_v44, 16 }
 0x557   : > { %v2949_v48 = vpop.permute.xlu1 %2948 }
 0x558   : > { %v3006_v54 = vmul.f32 %v3660_v51, %v2949_v48  ;;  %v3113_v51 = vld [vmem:[%s4393_s17 + $0x38] sm:$0xf]  ;;  %v3102_v48 = vld [vmem:[%s4393_s17 + $0xc] sm:$0xf] }
 0x559   : > { %v3205_v0 = vshll.u32 %v3113_v51, 16 }
 0x55a   : > { %v3019_v41 = vpack.c.bf16 %v3006_v54, %v3005_v58  ;;  %v3162_v58 = vrot.slane %v3160_v45, 4  ;;  %v3165_v54 = vrot.slane %v3163_v32, 5 }
 0x55b   : > { %v2954_v37 = vpop.permute.xlu1 %2953 }
 0x55c   : > { %4035 = vmatprep.subr.bf16.mxu1 %v3019_v41  ;;  %v3007_v43 = vmul.f32 %v3663_v3, %v2954_v37 }
 0x55d   : > { %4036 = vmatpush3.bf16.msra.mxu1 %v3019_v41  ;;  %v3108_v41 = vld [vmem:[%s4393_s17 + $0x24] sm:$0xf] }
 0x55f   : > { %v2959_v46 = vpop.permute.xlu1 %2958 }
 0x560   : > { %v3008_v9 = vmul.f32 %v3664_v4, %v2959_v46  ;;  %v3115_v4 = vld [vmem:[%s4393_s17 + $0x40] sm:$0xf] }
 0x561   : > { %v3216_v7 = vshrl.u32 %v3115_v4, 16 }
 0x562   : > { %v3020_v50 = vpack.c.bf16 %v3008_v9, %v3007_v43  ;;  %v3104_v43 = vld [vmem:[%s4393_s17 + $0x14] sm:$0xf]  ;;  %v3202_v9 = vshrl.u32 %v3113_v51, 16 }
 0x563   : > { %v2964_v56 = vpop.permute.xlu1 %2963 }
 0x564   : > { %4037 = vmatprep.subr.bf16.mxu1 %v3020_v50  ;;  %v3009_v2 = vmul.f32 %v3667_v11, %v2964_v56  ;;  %v3124_v56 = vor.u32 %v3123_v49, %v3120_v62  ;;  %v3127_v11 = vshll.u32 %v3102_v48, 16  ;;  %v3204_v23 = vrot.slane %v3202_v9, 4 }
 0x565   : > { %4038 = vmatpush3.bf16.msra.mxu1 %v3020_v50  ;;  %v3111_v50 = vld [vmem:[%s4393_s17 + $0x30] sm:$0xf] }
 0x567   : > { %v2969_v14 = vpop.permute.xlu1 %2968 }
 0x568   : > { %v3010_v1 = vmul.f32 %v3668_v5, %v2969_v14  ;;  %v3174_v5 = vshrl.u32 %v3109_v33, 16  ;;  %v3177_v14 = vshll.u32 %v3109_v33, 16 }
 0x56a   : > { %v3021_v18 = vpack.c.bf16 %v3010_v1, %v3009_v2  ;;  %v3166_v2 = vor.u32 %v3165_v54, %v3162_v58  ;;  %v3169_v1 = vshll.u32 %v3108_v41, 16 }
 0x56b   : > { %v2974_v19 = vpop.permute.xlu1 %2973 }
 0x56c   : > { %4039 = vmatprep.subr.bf16.mxu1 %v3021_v18  ;;  %v3011_v12 = vmul.f32 %v3671_v20, %v2974_v19  ;;  %v3141_v20 = vshll.u32 %v3104_v43, 16  ;;  %v3171_v13 = vrot.slane %v3169_v1, 5 }
 0x56d   : > { %4040 = vmatpush3.bf16.msra.mxu1 %v3021_v18  ;;  %v3219_v18 = vshll.u32 %v3115_v4, 16 }
 0x56f   : > { %v2979_v24 = vpop.permute.xlu1 %2978 }
 0x570   : > { %v3012_v8 = vmul.f32 %v3672_v6, %v2979_v24  ;;  %v3188_v6 = vshrl.u32 %v3111_v50, 16  ;;  %v3191_v24 = vshll.u32 %v3111_v50, 16 }
 0x572   : > { %v3022_v25 = vpack.c.bf16 %v3012_v8, %v3011_v12  ;;  %v3157_v8 = vrot.slane %v3155_v22, 5 }
 0x573   : > { %v2984_v27 = vpop.permute.xlu1 %2983 }
 0x574   : > { %4041 = vmatprep.subr.bf16.mxu1 %v3022_v25  ;;  %v3013_v36 = vmul.f32 %v3675_v29, %v2984_v27  ;;  %v3125_v27 = vrot.slane %v3124_v56, 4  ;;  %v3129_v29 = vrot.slane %v3127_v11, 5 }
 0x575   : > { %4042 = vmatpush3.bf16.msra.mxu1 %v3022_v25  ;;  %v3207_v25 = vrot.slane %v3205_v0, 5 }
 0x576   : > { %v3130_v60 = vsel %vm4548_vm6, %v3125_v27, %v3129_v29 }
 0x577   : > { %v2989_v10 = vpop.permute.xlu1 %2988  ;;  %v3208_v28 = vor.u32 %v3207_v25, %v3204_v23  ;;  %v3237_v62 = vunpack.c.l.bf16 %v3130_v60 }
 0x578   : > { %v3014_v16 = vmul.f32 %v3676_v34, %v2989_v10  ;;  %v3114_v34 = vld [vmem:[%s4393_s17 + $0x3c] sm:$0xf]  ;;  %v3176_v10 = vrot.slane %v3174_v5, 4 }
 0x579   : > { %v3211_v26 = vshll.u32 %v3114_v34, 16  ;;  %v3209_v49 = vrot.slane %v3208_v28, 4 }
 0x57a   : > { %v3023_v42 = vpack.c.bf16 %v3014_v16, %v3013_v36  ;;  %v3179_v36 = vrot.slane %v3177_v14, 5  ;;  %v3167_v16 = vrot.slane %v3166_v2, 4 }
 0x57b   : > { %v2994_v38 = vpop.permute.xlu1 %2993  ;;  %v3213_v51 = vrot.slane %v3211_v26, 5 }
 0x57c   : > { %4043 = vmatprep.subr.bf16.mxu1 %v3023_v42  ;;  %v3015_v15 = vmul.f32 %v3679_v52, %v2994_v38  ;;  %v3218_v38 = vrot.slane %v3216_v7, 4  ;;  %v3221_v52 = vrot.slane %v3219_v18, 5  ;;  %v3172_v44 = vsel %vm4548_vm6, %v3167_v16, %v3171_v13 }
 0x57d   : > { %4044 = vmatpush3.bf16.msra.mxu1 %v3023_v42  ;;  %v3110_v42 = vld [vmem:[%s4393_s17 + $0x2c] sm:$0xf]  ;;  %v3240_v54 = vunpack.c.l.bf16 %v3172_v44  ;;  %v3214_v2 = vsel %vm4548_vm6, %v3209_v49, %v3213_v51 }
 0x57e   : > { %v3183_v31 = vshll.u32 %v3110_v42, 16  ;;  %v3222_v45 = vor.u32 %v3221_v52, %v3218_v38 }
 0x57f   : > { %v2999_v63 = vpop.permute.xlu1 %2998 }
 0x580   : > { %v3016_v47 = vmul.f32 %v3680_v21, %v2999_v63  ;;  %v3143_v63 = vrot.slane %v3141_v20, 5  ;;  %v3185_v41 = vrot.slane %v3183_v31, 5 }
 0x582   : > { %v3024_v39 = vpack.c.bf16 %v3016_v47, %v3015_v15  ;;  %v3116_v15 = vld [vmem:[%s4393_s17 + $0x44] sm:$0xf]  ;;  %v3190_v47 = vrot.slane %v3188_v6, 4 }
 0x583   : > { %v3225_v32 = vshll.u32 %v3116_v15, 16 }
 0x584   : > { %4045 = vmatprep.subr.bf16.mxu1 %v3024_v39 }
 0x585   : > { %4046 = vmatpush3.bf16.msra.mxu1 %v3024_v39  ;;  %v3193_v39 = vrot.slane %v3191_v24, 5  ;;  %v3227_v43 = vrot.slane %v3225_v32, 5  ;;  %v3243_v24 = vunpack.c.l.bf16 %v3214_v2 }
 0x588   : > { %4048 = vmatmul.mubr.bf16.vlgmr.msra.gmra.mrb[52].mxu1 %v4952_v59  ;;  %v3132_v59 = vshrl.u32 %v3103_v40, 16 }
 0x589   : > { %4051 = vmatprep.mubr.bf16.mxu1 %v4954_v17  ;;  %v3135_v17 = vshll.u32 %v3103_v40, 16  ;;  %v3180_v40 = vor.u32 %v3179_v36, %v3176_v10 }
 0x58a   : > { %v3134_v37 = vrot.slane %v3132_v59, 4 }
 0x58b   : > { %v3137_v3 = vrot.slane %v3135_v17, 5  ;;  %v3181_v33 = vrot.slane %v3180_v40, 4 }
 0x58d   : > { %v3138_v19 = vor.u32 %v3137_v3, %v3134_v37  ;;  %v3186_v7 = vsel %vm4548_vm6, %v3181_v33, %v3185_v41 }
 0x58e   : > { %v3241_v27 = vunpack.c.l.bf16 %v3186_v7 }
 0x58f   : > { %v3139_v21 = vrot.slane %v3138_v19, 4 }
 0x590   : > { %4052 = vmatmul.mubr.bf16.gmra.mrb[56].mxu1 %v4958_v61  ;;  %v3148_v61 = vrot.slane %v3146_v53, 4  ;;  %v3112_v53 = vld [vmem:[%s4393_s17 + $0x34] sm:$0xf]  ;;  %s3640_s17 = sshll.u32 %s5061_s26, 5 }
 0x591   : > { %v3144_v17 = vsel %vm4548_vm6, %v3139_v21, %v3143_v63  ;;  %s440_s24 = scalar_lea.vmem %s5055_s13, %s3640_s17 }
 0x592   : > { %v3152_v46 = vor.u32 %v3151_v55, %v3148_v61  ;;  %v3194_v61 = vor.u32 %v3193_v39, %v3190_v47  ;;  %v3197_v55 = vshll.u32 %v3112_v53, 16  ;;  %v3238_v4 = vunpack.c.l.bf16 %v3144_v17 }
 0x594   : > { %v3153_v12 = vrot.slane %v3152_v46, 4  ;;  %v3223_v46 = vrot.slane %v3222_v45, 4  ;;  %v3195_v56 = vrot.slane %v3194_v61, 4  ;;  %v3199_v11 = vrot.slane %v3197_v55, 5 }
 0x596   : > { %v3158_v57 = vsel %vm4548_vm6, %v3153_v12, %v3157_v8  ;;  %v3228_v19 = vsel %vm4548_vm6, %v3223_v46, %v3227_v43  ;;  %v3200_v12 = vsel %vm4548_vm6, %v3195_v56, %v3199_v11 }
 0x597   : > { %v3239_v59 = vunpack.c.l.bf16 %v3158_v57  ;;  %v3244_v36 = vunpack.c.l.bf16 %v3228_v19  ;;  %v3242_v38 = vunpack.c.l.bf16 %v3200_v12 }
 0x65b   : > { %v4049_v22 = vpop.f32.mrb[52].mxu1 }
 0x65c   : > { %v3079_v48 = vadd.f32 %v4049_v22, %v3629_v35  ;;  %v3070_v58 = vpop.f32.mrb[53].mxu1 }
 0x65d   : > { %v3071_v37 = vadd.f32 %v3629_v35, %v3070_v58  ;;  %v4050_v3 = vpop.f32.mrb[54].mxu1 }
 0x65e   : > { %v3247_v9 = vadd.f32 %v3239_v59, %v3079_v48  ;;  %v3082_v0 = vadd.f32 %v4050_v3, %v3629_v35  ;;  %v3073_v50 = vpop.f32.mrb[55].mxu1 }
 0x65f   : > { %v3245_v5 = vadd.f32 %v3237_v62, %v3071_v37  ;;  %v3074_v14 = vadd.f32 %v3629_v35, %v3073_v50 }
 0x660   : > { %v3248_v1 = vadd.f32 %v3240_v54, %v3082_v0  ;;  %v3255_v20 = vmax.f32 %v3247_v9, 0.0 }
 0x661   : > { %v3246_v18 = vadd.f32 %v3238_v4, %v3074_v14  ;;  %v3253_v8 = vmax.f32 %v3245_v5, 0.0 }
 0x662   : > { %v3256_v6 = vmax.f32 %v3248_v1, 0.0 }
 0x663   : > { %v3254_v23 = vmax.f32 %v3246_v18, 0.0  ;;  %v4053_v25 = vpop.f32.mrb[56].mxu1 }
 0x664   : > { %v3689_v29 = vpack.c.bf16 %v3256_v6, %v3255_v20  ;;  %v3095_v34 = vadd.f32 %v4053_v25, %v3629_v35  ;;  %v3086_v10 = vpop.f32.mrb[57].mxu1 }
 0x665   : > { %v3684_v16 = vpack.c.bf16 %v3254_v23, %v3253_v8  ;;  %v3087_v13 = vadd.f32 %v3629_v35, %v3086_v10  ;;  %v4054_v42 = vpop.f32.mrb[58].mxu1 }
 0x666   : > { %3708 = vst [vmem:[%s440_s24 + $0x8] sm:$0xff] %v3689_v29   ;;  %v3251_v52 = vadd.f32 %v3243_v24, %v3095_v34  ;;  %v3098_v30 = vadd.f32 %v4054_v42, %v3629_v35  ;;  %v3089_v21 = vpop.f32.mrb[59].mxu1 }
 0x667   : > { %3685 = vst [vmem:[%s440_s24] sm:$0xff] %v3684_v16   ;;  %v3249_v63 = vadd.f32 %v3241_v27, %v3087_v13  ;;  %v3090_v15 = vadd.f32 %v3629_v35, %v3089_v21 }
 0x668   : > { %v3252_v47 = vadd.f32 %v3244_v36, %v3098_v30  ;;  %v3259_v57 = vmax.f32 %v3251_v52, 0.0 }
 0x669   : > { %v3250_v39 = vadd.f32 %v3242_v38, %v3090_v15  ;;  %v3257_v26 = vmax.f32 %v3249_v63, 0.0 }
 0x66a   : > { %v3260_v28 = vmax.f32 %v3252_v47, 0.0 }
 0x66b   : > { %v3258_v53 = vmax.f32 %v3250_v39, 0.0 }
 0x66c   : > { %v3699_v60 = vpack.c.bf16 %v3260_v28, %v3259_v57 }
 0x66d   : > { %v3694_v40 = vpack.c.bf16 %v3258_v53, %v3257_v26 }
 0x66e   : > { %3710 = vst [vmem:[%s440_s24 + $0x18] sm:$0xff] %v3699_v60  }
 0x66f   : > { %3709 = vst [vmem:[%s440_s24 + $0x10] sm:$0xff] %v3694_v40  }
 0x670 PF: > { %s23_s25 = sadd.s32 1, %s4294_s25  }
 0x671   : > { %p20_p4 = scmp.ge.s32.totalorder %s23_s25, 4  }
 0x673   :  { %22 = sbr.rel (!%p20_p4) target bundleno = 1 (0x1), region = 104 }

</bundles_post_ra>
